<compile_context>
chip_gen: v7x
topology: tpu7x:2x2x1
jax: 0.10.0
libtpu: 0.0.40
codegen_flags: <defaults>
</compile_context>

<pallas_src>
import jax
import jax.numpy as jnp
from jax.experimental import pallas as pl
from jax.experimental.pallas import tpu as pltpu

EPS = 1e-5


def fused_kernel(x_ref, gate_ref, w_ref, gamma_ref, beta_ref, o_ref, acc_ref):
    # x_ref:     (1, tk, HW)    activation slab for this Cin block (f32)
    # gate_ref:  (1, tk, 1)     SE gate (pre-sigmoid) for this Cin block
    # w_ref:     (1, Cout, tk)  1x1 conv weight slab (pre-laid-out per Cin block)
    # gamma_ref: (Cout, 1)      BN scale
    # beta_ref:  (Cout, 1)      BN shift
    # o_ref:     (Cout, HW)     BN output (f32)
    # acc_ref:   (Cout, HW)     f32 matmul accumulator (VMEM scratch)
    k = pl.program_id(0)

    @pl.when(k == 0)
    def _init():
        acc_ref[...] = jnp.zeros_like(acc_ref)

    # x364 = x358 * sigmoid(x362): fold the SE gate into the activation block.
    # Cast operands to bf16 right before the dot (MXU is bf16-native on
    # v5e/v6e/v7x); accumulate in f32.
    g = jax.nn.sigmoid(gate_ref[0])                        # (tk, 1)   EUP
    xb = (x_ref[0] * g).astype(jnp.bfloat16)               # (tk, HW)  VPU
    wb = w_ref[0].astype(jnp.bfloat16)                     # (Cout, tk)
    acc_ref[...] += jnp.dot(wb, xb, preferred_element_type=jnp.float32)

    # BatchNorm2d (training mode, biased variance) — one-pass statistics over
    # the spatial (lane) axis per output channel, finalized on the last step.
    @pl.when(k == pl.num_programs(0) - 1)
    def _finalize():
        y = acc_ref[...]                                   # (Cout, HW) f32
        inv_hw = jnp.float32(1.0 / y.shape[-1])
        s = jnp.sum(y, axis=-1, keepdims=True)             # (Cout, 1)  XLU
        ss = jnp.sum(y * y, axis=-1, keepdims=True)        # (Cout, 1)
        mean = s * inv_hw
        var = jnp.maximum(ss * inv_hw - mean * mean, 0.0)
        scale = gamma_ref[...] * jax.lax.rsqrt(var + EPS)  # EUP
        shift = beta_ref[...] - mean * scale
        o_ref[...] = y * scale + shift


def sigmoid_mul_conv_bn(x358, x362, conv_w, bn_gamma, bn_beta, *, k_steps=2):
    """x358: (N, Cin, H, W), x362: (N, Cin, 1, 1), conv_w: (Cout, Cin, 1, 1)."""
    N, Cin, H, W = x358.shape
    Cout = conv_w.shape[0]
    HW = H * W
    # Gate fold + single BN-stats block assume a single batch element (N == 1,
    # as in the reference module).
    assert N == 1, "kernel specialised for N == 1 (as in the reference module)"
    assert Cin % k_steps == 0
    tk = Cin // k_steps
    assert tk % 8 == 0, "Cin block must be sublane-aligned"

    # Free reshapes (contiguous, no data movement): Cin split becomes a leading
    # grid axis for x and the gate.
    x = x358.reshape(k_steps, tk, HW)
    gate = x362.reshape(k_steps, tk, 1)
    # Weight re-layout (Cout, Cin) -> (k_steps, Cout, tk).  The transpose is a
    # one-time parameter-load transform in a real model.
    w = jnp.transpose(conv_w.reshape(Cout, k_steps, tk), (1, 0, 2))
    gamma = bn_gamma.reshape(Cout, 1)
    beta = bn_beta.reshape(Cout, 1)

    cost = pl.CostEstimate(
        flops=2 * Cout * Cin * HW,
        transcendentals=Cin,
        bytes_accessed=(Cin * HW + Cout * Cin + Cin) * 4 + Cout * HW * 4,
    )

    out = pl.pallas_call(
        fused_kernel,
        out_shape=jax.ShapeDtypeStruct((Cout, HW), jnp.float32),
        grid=(k_steps,),
        in_specs=[
            pl.BlockSpec((1, tk, HW), lambda k: (k, 0, 0)),    # x
            pl.BlockSpec((1, tk, 1), lambda k: (k, 0, 0)),     # gate
            pl.BlockSpec((1, Cout, tk), lambda k: (k, 0, 0)),  # weight
            pl.BlockSpec((Cout, 1), lambda k: (0, 0)),         # gamma
            pl.BlockSpec((Cout, 1), lambda k: (0, 0)),         # beta
        ],
        out_specs=pl.BlockSpec((Cout, HW), lambda k: (0, 0)),
        scratch_shapes=[pltpu.VMEM((Cout, HW), jnp.float32)],
        compiler_params=pltpu.CompilerParams(
            dimension_semantics=("arbitrary",)),
        cost_estimate=cost,
    )(x, gate, w, gamma, beta)

    # Free reshape back to NCHW.
    return out.reshape(N, Cout, H, W)


def _reference(x358, x362, conv_w, bn_gamma, bn_beta):
    g = jax.nn.sigmoid(x362)
    x = x358 * g
    y = jnp.einsum("nchw,oc->nohw", x,
                   conv_w.reshape(conv_w.shape[0], conv_w.shape[1]))
    mean = jnp.mean(y, axis=(0, 2, 3), keepdims=True)
    var = jnp.mean(jnp.square(y - mean), axis=(0, 2, 3), keepdims=True)
    y_hat = (y - mean) * jax.lax.rsqrt(var + EPS)
    return y_hat * bn_gamma.reshape(1, -1, 1, 1) + bn_beta.reshape(1, -1, 1, 1)


if __name__ == "__main__":
    N, Cin, H, W, Cout = 1, 1200, 14, 14, 200

    key = jax.random.PRNGKey(0)
    k1, k2, k3 = jax.random.split(key, 3)
    x358 = jax.random.normal(k1, (N, Cin, H, W), dtype=jnp.float32)
    x362 = jax.random.normal(k2, (N, Cin, 1, 1), dtype=jnp.float32)

    # deterministic parameter init (Conv2d weight; BN affine defaults gamma=1, beta=0)
    conv_w = jax.random.normal(k3, (Cout, Cin, 1, 1), dtype=jnp.float32) * 0.02
    bn_gamma = jnp.ones((Cout,), dtype=jnp.float32)
    bn_beta = jnp.zeros((Cout,), dtype=jnp.float32)

    fn = jax.jit(sigmoid_mul_conv_bn)
    out = jax.block_until_ready(fn(x358, x362, conv_w, bn_gamma, bn_beta))

    ref = _reference(x358, x362, conv_w, bn_gamma, bn_beta)
    assert out.shape == (N, Cout, H, W)
    # bf16 matmul operands with f32 accumulation -> slightly looser tolerance
    # on the ~unit-variance normalized output.
    assert jnp.allclose(out, ref, atol=3e-2, rtol=1e-2), (
        float(jnp.max(jnp.abs(out - ref))))
    assert float(jnp.mean(jnp.abs(out - ref))) < 1e-2

    print("KERNEL_OK")
</pallas_src>

<mosaic_0001>
module attributes {stable_mosaic.version = 11 : i64} {
  func.func @fused_kernel(%arg0: i32, %arg1: memref<1x600x196xf32, #tpu.memory_space<vmem>>, %arg2: memref<1x600x1xf32, #tpu.memory_space<vmem>>, %arg3: memref<1x200x600xf32, #tpu.memory_space<vmem>>, %arg4: memref<200x1xf32, #tpu.memory_space<vmem>>, %arg5: memref<200x1xf32, #tpu.memory_space<vmem>>, %arg6: memref<200x196xf32, #tpu.memory_space<vmem>>, %arg7: memref<200x196xf32, #tpu.memory_space<vmem>>) attributes {dimension_semantics = [#tpu.dimension_semantics<arbitrary>], iteration_bounds = array<i64: 2>, scalar_prefetch = 0 : i64, scratch_operands = 1 : i64, tpu.core_type = #tpu.core_type<tc>, window_params = [{transform_indices = @transform_0, window_bounds = array<i64: 1, 600, 196>}, {transform_indices = @transform_1, window_bounds = array<i64: 1, 600, 1>}, {transform_indices = @transform_2, window_bounds = array<i64: 1, 200, 600>}, {pipeline_mode = #tpu.pipeline_mode<synchronous>, transform_indices = @transform_3, window_bounds = array<i64: 200, 1>}, {pipeline_mode = #tpu.pipeline_mode<synchronous>, transform_indices = @transform_4, window_bounds = array<i64: 200, 1>}, {pipeline_mode = #tpu.pipeline_mode<synchronous>, transform_indices = @transform_5, window_bounds = array<i64: 200, 196>}]} {
    %c0_i32 = arith.constant 0 : i32
    %0 = arith.cmpi eq, %arg0, %c0_i32 : i32
    %1 = arith.extui %0 : i1 to i32
    %c0_i32_0 = arith.constant 0 : i32
    %2 = arith.cmpi ne, %1, %c0_i32_0 : i32
    scf.if %2 {
      %cst_15 = arith.constant 0.000000e+00 : f32
      %25 = vector.broadcast %cst_15 : f32 to vector<200x196xf32>
      %c0_16 = arith.constant 0 : index
      %c0_17 = arith.constant 0 : index
      %26 = vector.load %arg7[%c0_16, %c0_17] : memref<200x196xf32, #tpu.memory_space<vmem>>, vector<200x196xf32>
      tpu.vector_store %arg7[%c0_16, %c0_17], %25 {strides = array<i32>} : memref<200x196xf32, #tpu.memory_space<vmem>>, vector<200x196xf32>,
    } else {
    }
    %c0 = arith.constant 0 : index
    %c0_1 = arith.constant 0 : index
    %c0_2 = arith.constant 0 : index
    %3 = vector.load %arg2[%c0, %c0_1, %c0_2] : memref<1x600x1xf32, #tpu.memory_space<vmem>>, vector<1x600x1xf32>
    %4 = vector.shape_cast %3 : vector<1x600x1xf32> to vector<600x1xf32>
    %5 = arith.negf %4 : vector<600x1xf32>
    %6 = math.exp %5 : vector<600x1xf32>
    %cst = arith.constant 1.000000e+00 : f32
    %7 = vector.broadcast %cst : f32 to vector<600x1xf32>
    %8 = arith.addf %7, %6 : vector<600x1xf32>
    %9 = arith.divf %7, %8 : vector<600x1xf32>
    %c0_3 = arith.constant 0 : index
    %c0_4 = arith.constant 0 : index
    %c0_5 = arith.constant 0 : index
    %10 = vector.load %arg1[%c0_3, %c0_4, %c0_5] : memref<1x600x196xf32, #tpu.memory_space<vmem>>, vector<1x600x196xf32>
    %11 = vector.shape_cast %10 : vector<1x600x196xf32> to vector<600x196xf32>
    %12 = vector.broadcast %9 : vector<600x1xf32> to vector<600x196xf32>
    %13 = arith.mulf %11, %12 : vector<600x196xf32>
    %14 = arith.truncf %13 : vector<600x196xf32> to vector<600x196xbf16>
    %c0_6 = arith.constant 0 : index
    %c0_7 = arith.constant 0 : index
    %c0_8 = arith.constant 0 : index
    %15 = vector.load %arg3[%c0_6, %c0_7, %c0_8] : memref<1x200x600xf32, #tpu.memory_space<vmem>>, vector<1x200x600xf32>
    %16 = vector.shape_cast %15 : vector<1x200x600xf32> to vector<200x600xf32>
    %17 = arith.truncf %16 : vector<200x600xf32> to vector<200x600xbf16>
    %c0_9 = arith.constant 0 : index
    %c0_10 = arith.constant 0 : index
    %18 = vector.load %arg7[%c0_9, %c0_10] : memref<200x196xf32, #tpu.memory_space<vmem>>, vector<200x196xf32>
    %cst_11 = arith.constant dense<0.000000e+00> : vector<200x196xf32>
    %19 = tpu.matmul %17, %14, %cst_11 {dimension_numbers = #tpu.dot_dimension_numbers<[1], [0], [0], [1], [0, 0, 1, 1], [], []>} : vector<200x600xbf16>, vector<600x196xbf16>, vector<200x196xf32> -> vector<200x196xf32>
    %20 = arith.addf %18, %19 : vector<200x196xf32>
    %c0_12 = arith.constant 0 : index
    %c0_13 = arith.constant 0 : index
    %21 = vector.load %arg7[%c0_12, %c0_13] : memref<200x196xf32, #tpu.memory_space<vmem>>, vector<200x196xf32>
    tpu.vector_store %arg7[%c0_12, %c0_13], %20 {strides = array<i32>} : memref<200x196xf32, #tpu.memory_space<vmem>>, vector<200x196xf32>,
    %c1_i32 = arith.constant 1 : i32
    %22 = arith.cmpi eq, %arg0, %c1_i32 : i32
    %23 = arith.extui %22 : i1 to i32
    %c0_i32_14 = arith.constant 0 : i32
    %24 = arith.cmpi ne, %23, %c0_i32_14 : i32
    scf.if %24 {
      %c0_15 = arith.constant 0 : index
      %c0_16 = arith.constant 0 : index
      %25 = vector.load %arg7[%c0_15, %c0_16] : memref<200x196xf32, #tpu.memory_space<vmem>>, vector<200x196xf32>
      %cst_17 = arith.constant dense<0.000000e+00> : vector<200xf32>
      %26 = vector.multi_reduction <add>, %25, %cst_17 [1] : vector<200x196xf32> to vector<200xf32>
      %27 = vector.shape_cast %26 : vector<200xf32> to vector<200x1xf32>
      %28 = arith.mulf %25, %25 : vector<200x196xf32>
      %cst_18 = arith.constant dense<0.000000e+00> : vector<200xf32>
      %29 = vector.multi_reduction <add>, %28, %cst_18 [1] : vector<200x196xf32> to vector<200xf32>
      %30 = vector.shape_cast %29 : vector<200xf32> to vector<200x1xf32>
      %cst_19 = arith.constant 0.00510204071 : f32
      %31 = vector.broadcast %cst_19 : f32 to vector<200x1xf32>
      %32 = arith.mulf %27, %31 : vector<200x1xf32>
      %cst_20 = arith.constant 0.00510204071 : f32
      %33 = vector.broadcast %cst_20 : f32 to vector<200x1xf32>
      %34 = arith.mulf %30, %33 : vector<200x1xf32>
      %35 = arith.mulf %32, %32 : vector<200x1xf32>
      %36 = arith.subf %34, %35 : vector<200x1xf32>
      %cst_21 = arith.constant 0.000000e+00 : f32
      %37 = vector.broadcast %cst_21 : f32 to vector<200x1xf32>
      %38 = arith.maximumf %36, %37 : vector<200x1xf32>
      %c0_22 = arith.constant 0 : index
      %c0_23 = arith.constant 0 : index
      %39 = vector.load %arg4[%c0_22, %c0_23] : memref<200x1xf32, #tpu.memory_space<vmem>>, vector<200x1xf32>
      %cst_24 = arith.constant 9.99999974E-6 : f32
      %40 = vector.broadcast %cst_24 : f32 to vector<200x1xf32>
      %41 = arith.addf %38, %40 : vector<200x1xf32>
      %42 = math.rsqrt %41 : vector<200x1xf32>
      %43 = arith.mulf %39, %42 : vector<200x1xf32>
      %c0_25 = arith.constant 0 : index
      %c0_26 = arith.constant 0 : index
      %44 = vector.load %arg5[%c0_25, %c0_26] : memref<200x1xf32, #tpu.memory_space<vmem>>, vector<200x1xf32>
      %45 = arith.mulf %32, %43 : vector<200x1xf32>
      %46 = arith.subf %44, %45 : vector<200x1xf32>
      %47 = vector.broadcast %43 : vector<200x1xf32> to vector<200x196xf32>
      %48 = arith.mulf %25, %47 : vector<200x196xf32>
      %49 = vector.broadcast %46 : vector<200x1xf32> to vector<200x196xf32>
      %50 = arith.addf %48, %49 : vector<200x196xf32>
      %c0_27 = arith.constant 0 : index
      %c0_28 = arith.constant 0 : index
      %51 = vector.load %arg6[%c0_27, %c0_28] : memref<200x196xf32, #tpu.memory_space<vmem>>, vector<200x196xf32>
      tpu.vector_store %arg6[%c0_27, %c0_28], %50 {strides = array<i32>} : memref<200x196xf32, #tpu.memory_space<vmem>>, vector<200x196xf32>,
    } else {
    }
    return
  }
  func.func @transform_0(%arg0: i32) -> (i32, i32, i32) {
    %c0_i32 = arith.constant 0 : i32
    %c0_i32_0 = arith.constant 0 : i32
    %c0_i32_1 = arith.constant 0 : i32
    return %arg0, %c0_i32, %c0_i32_0 : i32, i32, i32
  }
  func.func @transform_1(%arg0: i32) -> (i32, i32, i32) {
    %c0_i32 = arith.constant 0 : i32
    %c0_i32_0 = arith.constant 0 : i32
    %c0_i32_1 = arith.constant 0 : i32
    return %arg0, %c0_i32, %c0_i32_0 : i32, i32, i32
  }
  func.func @transform_2(%arg0: i32) -> (i32, i32, i32) {
    %c0_i32 = arith.constant 0 : i32
    %c0_i32_0 = arith.constant 0 : i32
    %c0_i32_1 = arith.constant 0 : i32
    return %arg0, %c0_i32, %c0_i32_0 : i32, i32, i32
  }
  func.func @transform_3(%arg0: i32) -> (i32, i32) {
    %c0_i32 = arith.constant 0 : i32
    %c0_i32_0 = arith.constant 0 : i32
    %c0_i32_1 = arith.constant 0 : i32
    return %c0_i32, %c0_i32_0 : i32, i32
  }
  func.func @transform_4(%arg0: i32) -> (i32, i32) {
    %c0_i32 = arith.constant 0 : i32
    %c0_i32_0 = arith.constant 0 : i32
    %c0_i32_1 = arith.constant 0 : i32
    return %c0_i32, %c0_i32_0 : i32, i32
  }
  func.func @transform_5(%arg0: i32) -> (i32, i32) {
    %c0_i32 = arith.constant 0 : i32
    %c0_i32_0 = arith.constant 0 : i32
    %c0_i32_1 = arith.constant 0 : i32
    return %c0_i32, %c0_i32_0 : i32, i32
  }
}

</mosaic_0001>

<bundles_post_ra>
// kernel: sigmoid_mul_conv_bn.1
= control target key start
LH: loop header
LB: loop body
LE: loop exit
PB: predicated region body
PF: predicated region fallthrough
CT: control target
= control target key end

     0   :  { %s4196_s18 = smov 0   ;;  %s5836_s0 = inlined_call_operand.vmem [shape: f32[2,600,196], index: 0, kind: input, shape index: {}]   ;;  %s5837_s1 = inlined_call_operand.vmem [shape: f32[2,600,1], index: 1, kind: input, shape index: {}]   ;;  %s5838_s2 = inlined_call_operand.vmem [shape: f32[2,200,600], index: 2, kind: input, shape index: {}]   ;;  %s5839_s3 = inlined_call_operand.vmem [shape: f32[200,1], index: 3, kind: input, shape index: {}]   ;;  %s5840_s4 = inlined_call_operand.vmem [shape: f32[200,1], index: 4, kind: input, shape index: {}]   ;;  %s5841_s5 = inlined_call_operand.vmem [shape: f32[200,196], index: 5, kind: output, shape index: {}]  }
   0x1 LB: > { %s4202_s19 = sadd.s32 4294967295, %s4161_s18   ;;  %p3512_p0 = scmp.ge.s32.totalorder %s4161_s18, 1  ;;  %s4161_s18 = sphi %s4196_s18, %s15_s18  }
   0x2   : > { %p202_p1 = scmp.lt.s32.totalorder %s4161_s18, 3 }
   0x4   : > { %p203_p2 = pnand %p3512_p0, %p202_p1 }
   0x5   : > { %p235_p3 = scmp.lt.s32.totalorder (!%p203_p2), %s4202_s19, 1  ;;  %p3516_p4 = scmp.ne.s32.totalorder (!%p203_p2), %s4202_s19, 0 }
   0x6   : > { %206 = sbr.rel (%p203_p2) target bundleno = 1143 (0x477), region = 40 }
   0xd   : > { %s236_s20 = scalar_select %p235_p3, %s4202_s19, 1 }
   0xe   : > { %254 = sbr.rel (%p3516_p4) target bundleno = 40 (0x28), region = 44  ;;  %vm256_vm0 = vcmask (!%p3516_p4), 556032   ;;  %v4163_v0 = vmov (!%p3516_p4), 0.0  }
   0xf   : > { %s3737_s21 = smul.u32 1200, %s236_s20  ;;  %255 = vst [vmem:[#allocation2] sm:$0xff] (!%p3516_p4), %v4163_v0  ;;  %258 = vst [vmem:[#allocation2 + $0x10] sm:$0xff] (!%p3516_p4), %v4163_v0 }
  0x10   : > { %s3738_s22 = smul.u32 600, %s236_s20  ;;  %260 = vst [vmem:[#allocation2 + $0x20] sm:$0xff] (!%p3516_p4), %v4163_v0  ;;  %262 = vst [vmem:[#allocation2 + $0x30] sm:$0xff] (!%p3516_p4), %v4163_v0 }
  0x11   : > { %s4211_s25 = scalar_lea.vmem %s5836_s0, %s3737_s21  ;;  %s3739_s26 = smul.u32 1000, %s236_s20  ;;  %264 = vst [vmem:[#allocation2 + $0x40] sm:$0xff] (!%p3516_p4), %v4163_v0  ;;  %266 = vst [vmem:[#allocation2 + $0x50] sm:$0xff] (!%p3516_p4), %v4163_v0 }
  0x12   : > { %s4216_s29 = scalar_lea.vmem %s5837_s1, %s3738_s22  ;;  %268 = vst [vmem:[#allocation2 + $0x60] sm:$0xff] (!%p3516_p4), %v4163_v0  ;;  %270 = vst [vmem:[#allocation2 + $0x70] sm:$0xff] (!%p3516_p4), %v4163_v0 }
  0x13   : > { %s4221_s7 = scalar_lea.vmem %s5838_s2, %s3739_s26  ;;  %272 = vst [vmem:[#allocation2 + $0x80] sm:$0xff] (!%p3516_p4), %v4163_v0  ;;  %274 = vst [vmem:[#allocation2 + $0x90] sm:$0xff] (!%p3516_p4), %v4163_v0 }
  0x14   : > { %276 = vst [vmem:[#allocation2 + $0xa0] sm:$0xff] (!%p3516_p4), %v4163_v0  ;;  %278 = vst [vmem:[#allocation2 + $0xb0] sm:$0xff] (!%p3516_p4), %v4163_v0 }
  0x15   : > { %280 = vst [vmem:[#allocation2 + $0xc0] sm:$0xff] %v4163_v0  ;;  %282 = vst [vmem:[#allocation2 + $0xd0] sm:$0xff] %v4163_v0 }
  0x16   : > { %284 = vst [vmem:[#allocation2 + $0xe0] sm:$0xff] %v4163_v0  ;;  %286 = vst [vmem:[#allocation2 + $0xf0] sm:$0xff] %v4163_v0 }
  0x17   : > { %288 = vst [vmem:[#allocation2 + $0x100] sm:$0xff] %v4163_v0  ;;  %290 = vst [vmem:[#allocation2 + $0x110] sm:$0xff] %v4163_v0 }
  0x18   : > { %292 = vst [vmem:[#allocation2 + $0x120] sm:$0xff] %v4163_v0  ;;  %294 = vst [vmem:[#allocation2 + $0x130] sm:$0xff] %v4163_v0 }
  0x19   : > { %296 = vst [vmem:[#allocation2 + $0x140] sm:$0xff] %v4163_v0  ;;  %298 = vst [vmem:[#allocation2 + $0x150] sm:$0xff] %v4163_v0 }
  0x1a   : > { %300 = vst [vmem:[#allocation2 + $0x160] sm:$0xff] %v4163_v0  ;;  %302 = vst [vmem:[#allocation2 + $0x170] sm:$0xff] %v4163_v0 }
  0x1b   : > { %304 = vst [vmem:[#allocation2 + $0x180] sm:$0xff] %v4163_v0  ;;  %257 = vst.msk [vmem:[#allocation2 + $0x8] sm:$0xff] %vm256_vm0, %v4163_v0 }
  0x1c   : > { %259 = vst.msk [vmem:[#allocation2 + $0x18] sm:$0xff] %vm256_vm0, %v4163_v0  ;;  %261 = vst.msk [vmem:[#allocation2 + $0x28] sm:$0xff] %vm256_vm0, %v4163_v0 }
  0x1d   : > { %263 = vst.msk [vmem:[#allocation2 + $0x38] sm:$0xff] %vm256_vm0, %v4163_v0  ;;  %265 = vst.msk [vmem:[#allocation2 + $0x48] sm:$0xff] %vm256_vm0, %v4163_v0 }
  0x1e   : > { %267 = vst.msk [vmem:[#allocation2 + $0x58] sm:$0xff] %vm256_vm0, %v4163_v0  ;;  %269 = vst.msk [vmem:[#allocation2 + $0x68] sm:$0xff] %vm256_vm0, %v4163_v0 }
  0x1f   : > { %271 = vst.msk [vmem:[#allocation2 + $0x78] sm:$0xff] %vm256_vm0, %v4163_v0  ;;  %273 = vst.msk [vmem:[#allocation2 + $0x88] sm:$0xff] %vm256_vm0, %v4163_v0 }
  0x20   : > { %275 = vst.msk [vmem:[#allocation2 + $0x98] sm:$0xff] %vm256_vm0, %v4163_v0  ;;  %277 = vst.msk [vmem:[#allocation2 + $0xa8] sm:$0xff] %vm256_vm0, %v4163_v0 }
  0x21   : > { %279 = vst.msk [vmem:[#allocation2 + $0xb8] sm:$0xff] %vm256_vm0, %v4163_v0  ;;  %281 = vst.msk [vmem:[#allocation2 + $0xc8] sm:$0xff] %vm256_vm0, %v4163_v0 }
  0x22   : > { %283 = vst.msk [vmem:[#allocation2 + $0xd8] sm:$0xff] %vm256_vm0, %v4163_v0  ;;  %285 = vst.msk [vmem:[#allocation2 + $0xe8] sm:$0xff] %vm256_vm0, %v4163_v0 }
  0x23   : > { %287 = vst.msk [vmem:[#allocation2 + $0xf8] sm:$0xff] %vm256_vm0, %v4163_v0  ;;  %289 = vst.msk [vmem:[#allocation2 + $0x108] sm:$0xff] %vm256_vm0, %v4163_v0 }
  0x24   : > { %291 = vst.msk [vmem:[#allocation2 + $0x118] sm:$0xff] %vm256_vm0, %v4163_v0  ;;  %293 = vst.msk [vmem:[#allocation2 + $0x128] sm:$0xff] %vm256_vm0, %v4163_v0 }
  0x25   : > { %295 = vst.msk [vmem:[#allocation2 + $0x138] sm:$0xff] %vm256_vm0, %v4163_v0  ;;  %297 = vst.msk [vmem:[#allocation2 + $0x148] sm:$0xff] %vm256_vm0, %v4163_v0 }
  0x26   : > { %299 = vst.msk [vmem:[#allocation2 + $0x158] sm:$0xff] %vm256_vm0, %v4163_v0  ;;  %301 = vst.msk [vmem:[#allocation2 + $0x168] sm:$0xff] %vm256_vm0, %v4163_v0 }
  0x27   : > { %303 = vst.msk [vmem:[#allocation2 + $0x178] sm:$0xff] %vm256_vm0, %v4163_v0  ;;  %305 = vst.msk [vmem:[#allocation2 + $0x188] sm:$0xff] %vm256_vm0, %v4163_v0 }
  0x28 PF: > { %v340_v1 = vld [vmem:[%s4216_s29 + $0x110] sm:$0xff]  ;;  %v338_v2 = vld [vmem:[%s4216_s29 + $0x100] sm:$0xff]  ;;  %v341_v3 = vld [vmem:[%s4216_s29 + $0x118] sm:$0xff]  ;;  %v4164_v4 = vmov 0   ;;  %vm1862_vm1 = vcmask 1043456   ;;  %vm1822_vm2 = vcmask 719872  }
  0x29   : > { %3752 = vset.pattern.permute.xlu1 %v4164_v4  ;;  %3751 = vset.pattern.permute.xlu0 %v4164_v4  ;;  %v3551_v5 = vmul.f32 -1.442695, %v340_v1  ;;  %v3549_v6 = vmul.f32 -1.442695, %v338_v2  ;;  %v3552_v7 = vmul.f32 -1.442695, %v341_v3 }
  0x2a   : > { %v339_v8 = vld [vmem:[%s4216_s29 + $0x108] sm:$0xff]  ;;  %v306_v10 = vld [vmem:[%s4216_s29] sm:$0xff]  ;;  %v309_v16 = vld [vmem:[%s4216_s29 + $0x18] sm:$0xff]  ;;  %vm2403_vm3 = vcmask 556032   ;;  %p3606_p5 = scmp.ne.s32.totalorder %s4202_s19, 1 }
  0x2b   : > { %v307_v9 = vld [vmem:[%s4216_s29 + $0x8] sm:$0xff]  ;;  %3753 = vpow2.f32 %v3551_v5  ;;  %v3550_v11 = vmul.f32 -1.442695, %v339_v8  ;;  %v3517_v13 = vmul.f32 -1.442695, %v306_v10  ;;  %v342_v15 = vld [vmem:[%s4216_s29 + $0x120] sm:$0xff] }
  0x2c   : > { %v3518_v12 = vmul.f32 -1.442695, %v307_v9  ;;  %3755 = vpow2.f32 %v3549_v6  ;;  %v343_v14 = vld [vmem:[%s4216_s29 + $0x128] sm:$0xff]  ;;  %v3553_v18 = vmul.f32 -1.442695, %v342_v15  ;;  %v308_v19 = vld [vmem:[%s4216_s29 + $0x10] sm:$0xff] }
  0x2d   : > { %3757 = vpow2.f32 %v3552_v7  ;;  %v3554_v17 = vmul.f32 -1.442695, %v343_v14  ;;  %v345_v20 = vld [vmem:[%s4216_s29 + $0x138] sm:$0xff]  ;;  %v3520_v21 = vmul.f32 -1.442695, %v309_v16  ;;  %v344_v22 = vld [vmem:[%s4216_s29 + $0x130] sm:$0xff] }
  0x2e   : > { %3759 = vpow2.f32 %v3550_v11  ;;  %v3519_v23 = vmul.f32 -1.442695, %v308_v19  ;;  %v311_v24 = vld [vmem:[%s4216_s29 + $0x28] sm:$0xff]  ;;  %v3556_v25 = vmul.f32 -1.442695, %v345_v20  ;;  %v310_v47 = vld [vmem:[%s4216_s29 + $0x20] sm:$0xff] }
  0x2f   : > { %3761 = vpow2.f32 %v3518_v12  ;;  %v3555_v26 = vmul.f32 -1.442695, %v344_v22  ;;  %v3522_v27 = vmul.f32 -1.442695, %v311_v24  ;;  %v347_v50 = vld [vmem:[%s4216_s29 + $0x148] sm:$0xff]  ;;  %v346_v53 = vld [vmem:[%s4216_s29 + $0x140] sm:$0xff] }
  0x30   : > { %3763 = vpow2.f32 %v3517_v13  ;;  %v3521_v56 = vmul.f32 -1.442695, %v310_v47  ;;  %v313_v57 = vld [vmem:[%s4216_s29 + $0x38] sm:$0xff]  ;;  %v3558_v60 = vmul.f32 -1.442695, %v347_v50  ;;  %v312_v61 = vld [vmem:[%s4216_s29 + $0x30] sm:$0xff] }
  0x31   : > { %3765 = vpow2.f32 %v3554_v17  ;;  %v3557_v63 = vmul.f32 -1.442695, %v346_v53  ;;  %v349_v0 = vld [vmem:[%s4216_s29 + $0x158] sm:$0xff]  ;;  %v3524_v2 = vmul.f32 -1.442695, %v313_v57  ;;  %v348_v3 = vld [vmem:[%s4216_s29 + $0x150] sm:$0xff] }
  0x32   : > { %3767 = vpow2.f32 %v3553_v18  ;;  %v3523_v6 = vmul.f32 -1.442695, %v312_v61  ;;  %v315_v7 = vld [vmem:[%s4216_s29 + $0x48] sm:$0xff]  ;;  %v3560_v9 = vmul.f32 -1.442695, %v349_v0  ;;  %v314_v10 = vld [vmem:[%s4216_s29 + $0x40] sm:$0xff] }
  0x33   : > { %3769 = vpow2.f32 %v3520_v21  ;;  %v3559_v12 = vmul.f32 -1.442695, %v348_v3  ;;  %v351_v13 = vld [vmem:[%s4216_s29 + $0x168] sm:$0xff]  ;;  %v3526_v15 = vmul.f32 -1.442695, %v315_v7  ;;  %v350_v16 = vld [vmem:[%s4216_s29 + $0x160] sm:$0xff] }
  0x34   : > { %3771 = vpow2.f32 %v3519_v23  ;;  %v3525_v18 = vmul.f32 -1.442695, %v314_v10  ;;  %v317_v19 = vld [vmem:[%s4216_s29 + $0x58] sm:$0xff]  ;;  %v3562_v21 = vmul.f32 -1.442695, %v351_v13  ;;  %v316_v22 = vld [vmem:[%s4216_s29 + $0x50] sm:$0xff] }
  0x35   : > { %v3754_v28 = vpop.eup %3753  ;;  %3773 = vpow2.f32 %v3556_v25  ;;  %v3561_v24 = vmul.f32 -1.442695, %v350_v16 }
  0x36   : > { %v3756_v29 = vpop.eup %3755  ;;  %v640_v30 = vadd.f32 1.0, %v3754_v28  ;;  %3775 = vpow2.f32 %v3555_v26  ;;  %v3528_v26 = vmul.f32 -1.442695, %v317_v19  ;;  %v3527_v28 = vmul.f32 -1.442695, %v316_v22 }
  0x37   : > { %v3758_v31 = vpop.eup %3757  ;;  %v638_v32 = vadd.f32 1.0, %v3756_v29  ;;  %3777 = vpow2.f32 %v3522_v27 }
  0x38   : > { %v3760_v33 = vpop.eup %3759  ;;  %3779 = vrcp.f32 %v640_v30  ;;  %v641_v34 = vadd.f32 1.0, %v3758_v31 }
  0x39   : > { %v3762_v35 = vpop.eup %3761  ;;  %3781 = vrcp.f32 %v638_v32  ;;  %v639_v36 = vadd.f32 1.0, %v3760_v33 }
  0x3a   : > { %v3764_v37 = vpop.eup %3763  ;;  %3783 = vrcp.f32 %v641_v34  ;;  %v607_v38 = vadd.f32 1.0, %v3762_v35 }
  0x3b   : > { %v3766_v39 = vpop.eup %3765  ;;  %3785 = vrcp.f32 %v639_v36  ;;  %v606_v40 = vadd.f32 1.0, %v3764_v37 }
  0x3c   : > { %v3768_v41 = vpop.eup %3767  ;;  %3787 = vrcp.f32 %v607_v38  ;;  %v643_v42 = vadd.f32 1.0, %v3766_v39 }
  0x3d   : > { %v3770_v43 = vpop.eup %3769  ;;  %3789 = vrcp.f32 %v606_v40  ;;  %v642_v44 = vadd.f32 1.0, %v3768_v41 }
  0x3e   : > { %v3772_v45 = vpop.eup %3771  ;;  %3791 = vrcp.f32 %v643_v42  ;;  %v609_v46 = vadd.f32 1.0, %v3770_v43 }
  0x3f   : > { %v3774_v48 = vpop.eup %3773  ;;  %3793 = vrcp.f32 %v642_v44  ;;  %v608_v49 = vadd.f32 1.0, %v3772_v45 }
  0x40   : > { %v3776_v51 = vpop.eup %3775  ;;  %3795 = vrcp.f32 %v609_v46  ;;  %v645_v52 = vadd.f32 1.0, %v3774_v48 }
  0x41   : > { %v3778_v54 = vpop.eup %3777  ;;  %3797 = vrcp.f32 %v608_v49  ;;  %v644_v55 = vadd.f32 1.0, %v3776_v51  ;;  %v353_v49 = vld [vmem:[%s4216_s29 + $0x178] sm:$0xff] }
  0x42   : > { %v3780_v58 = vpop.eup %3779  ;;  %3799 = vrcp.f32 %v645_v52  ;;  %v611_v59 = vadd.f32 1.0, %v3778_v54  ;;  %v352_v52 = vld [vmem:[%s4216_s29 + $0x170] sm:$0xff] }
  0x43   : > { %v3782_v62 = vpop.eup %3781  ;;  %1153 = vperm.xlu1 %3752, %v3780_v58   ;;  %3801 = vrcp.f32 %v644_v55  ;;  %v319_v55 = vld [vmem:[%s4216_s29 + $0x68] sm:$0xff]  ;;  %v3564_v58 = vmul.f32 -1.442695, %v353_v49 }
  0x44   : > { %v3784_v1 = vpop.eup %3783  ;;  %1143 = vperm.xlu0 %3751, %v3782_v62   ;;  %3803 = vrcp.f32 %v611_v59  ;;  %v318_v59 = vld [vmem:[%s4216_s29 + $0x60] sm:$0xff]  ;;  %v3563_v62 = vmul.f32 -1.442695, %v352_v52 }
  0x45   : > { %v3786_v5 = vpop.eup %3785  ;;  %3805 = vpow2.f32 %v3521_v56 }
  0x46   : > { %v3788_v8 = vpop.eup %3787  ;;  %3807 = vpow2.f32 %v3558_v60 }
  0x47   : > { %v3790_v11 = vpop.eup %3789  ;;  %1158 = vperm.xlu1 %3752, %v3784_v1   ;;  %3809 = vpow2.f32 %v3557_v63  ;;  %v355_v63 = vld [vmem:[%s4216_s29 + $0x188] sm:$0xff]  ;;  %v3530_v1 = vmul.f32 -1.442695, %v319_v55 }
  0x48   : > { %v3792_v14 = vpop.eup %3791  ;;  %1148 = vperm.xlu0 %3751, %v3786_v5   ;;  %3811 = vpow2.f32 %v3524_v2  ;;  %v354_v2 = vld [vmem:[%s4216_s29 + $0x180] sm:$0xff]  ;;  %v3529_v5 = vmul.f32 -1.442695, %v318_v59 }
  0x49   : > { %v3794_v17 = vpop.eup %3793  ;;  %3813 = vpow2.f32 %v3523_v6  ;;  %v321_v6 = vld [vmem:[%s4216_s29 + $0x78] sm:$0xff] }
  0x4a   : > { %v3796_v20 = vpop.eup %3795  ;;  %3815 = vpow2.f32 %v3560_v9  ;;  %v320_v9 = vld [vmem:[%s4216_s29 + $0x70] sm:$0xff] }
  0x4b   : > { %v3798_v23 = vpop.eup %3797  ;;  %988 = vperm.xlu1 %3752, %v3788_v8   ;;  %3817 = vpow2.f32 %v3559_v12  ;;  %v3566_v8 = vmul.f32 -1.442695, %v355_v63  ;;  %v357_v12 = vld [vmem:[%s4216_s29 + $0x198] sm:$0xff] }
  0x4c   : > { %v3800_v25 = vpop.eup %3799  ;;  %983 = vperm.xlu0 %3751, %v3790_v11   ;;  %3819 = vpow2.f32 %v3526_v15  ;;  %v3565_v11 = vmul.f32 -1.442695, %v354_v2  ;;  %v356_v15 = vld [vmem:[%s4216_s29 + $0x190] sm:$0xff] }
  0x4d   : > { %v3802_v27 = vpop.eup %3801  ;;  %3821 = vpow2.f32 %v3525_v18  ;;  %v323_v18 = vld [vmem:[%s4216_s29 + $0x88] sm:$0xff] }
  0x4e   : > { %v3804_v29 = vpop.eup %3803  ;;  %3823 = vpow2.f32 %v3562_v21  ;;  %v322_v21 = vld [vmem:[%s4216_s29 + $0x80] sm:$0xff] }
  0x4f   : > { %v3806_v30 = vpop.eup %3805  ;;  %1168 = vperm.xlu1 %3752, %v3792_v14   ;;  %3825 = vpow2.f32 %v3561_v24  ;;  %v3532_v14 = vmul.f32 -1.442695, %v321_v6  ;;  %v359_v24 = vld [vmem:[%s4216_s29 + $0x1a8] sm:$0xff] }
  0x50   : > { %v3808_v31 = vpop.eup %3807  ;;  %1163 = vperm.xlu0 %3751, %v3794_v17   ;;  %v610_v32 = vadd.f32 1.0, %v3806_v30  ;;  %3827 = vpow2.f32 %v3528_v26  ;;  %v3531_v17 = vmul.f32 -1.442695, %v320_v9  ;;  %v3534_v26 = vmul.f32 -1.442695, %v323_v18 }
  0x51   : > { %v3810_v33 = vpop.eup %3809  ;;  %v647_v34 = vadd.f32 1.0, %v3808_v31  ;;  %3829 = vpow2.f32 %v3527_v28  ;;  %v3533_v28 = vmul.f32 -1.442695, %v322_v21  ;;  %v3570_v30 = vmul.f32 -1.442695, %v359_v24 }
  0x52   : > { %v3812_v35 = vpop.eup %3811  ;;  %3831 = vrcp.f32 %v610_v32  ;;  %v646_v36 = vadd.f32 1.0, %v3810_v33 }
  0x53   : > { %v3814_v37 = vpop.eup %3813  ;;  %998 = vperm.xlu1 %3752, %v3796_v20   ;;  %3833 = vrcp.f32 %v647_v34  ;;  %v613_v38 = vadd.f32 1.0, %v3812_v35  ;;  %v3568_v20 = vmul.f32 -1.442695, %v357_v12 }
  0x54   : > { %v3816_v39 = vpop.eup %3815  ;;  %993 = vperm.xlu0 %3751, %v3798_v23   ;;  %3835 = vrcp.f32 %v646_v36  ;;  %v612_v40 = vadd.f32 1.0, %v3814_v37  ;;  %v3567_v23 = vmul.f32 -1.442695, %v356_v15 }
  0x55   : > { %v3818_v41 = vpop.eup %3817  ;;  %3837 = vrcp.f32 %v613_v38  ;;  %v649_v42 = vadd.f32 1.0, %v3816_v39 }
  0x56   : > { %v3820_v43 = vpop.eup %3819  ;;  %3839 = vrcp.f32 %v612_v40  ;;  %v648_v44 = vadd.f32 1.0, %v3818_v41 }
  0x57   : > { %v3822_v45 = vpop.eup %3821  ;;  %1178 = vperm.xlu1 %3752, %v3800_v25   ;;  %3841 = vrcp.f32 %v649_v42  ;;  %v615_v46 = vadd.f32 1.0, %v3820_v43 }
  0x58   : > { %v3824_v47 = vpop.eup %3823  ;;  %1173 = vperm.xlu0 %3751, %v3802_v27   ;;  %3843 = vrcp.f32 %v648_v44  ;;  %v614_v48 = vadd.f32 1.0, %v3822_v45 }
  0x59   : > { %v3826_v50 = vpop.eup %3825  ;;  %3845 = vrcp.f32 %v615_v46  ;;  %v651_v51 = vadd.f32 1.0, %v3824_v47 }
  0x5a   : > { %v3828_v53 = vpop.eup %3827  ;;  %3847 = vrcp.f32 %v614_v48  ;;  %v650_v54 = vadd.f32 1.0, %v3826_v50 }
  0x5b   : > { %v3830_v56 = vpop.eup %3829  ;;  %1008 = vperm.xlu1 %3752, %v3804_v29   ;;  %3849 = vrcp.f32 %v651_v51  ;;  %v617_v57 = vadd.f32 1.0, %v3828_v53  ;;  %v358_v51 = vld [vmem:[%s4216_s29 + $0x1a0] sm:$0xff] }
  0x5c   : > { %v3832_v60 = vpop.eup %3831  ;;  %3851 = vrcp.f32 %v650_v54  ;;  %v616_v61 = vadd.f32 1.0, %v3830_v56  ;;  %v325_v54 = vld [vmem:[%s4216_s29 + $0x98] sm:$0xff] }
  0x5d   : > { %v3834_v0 = vpop.eup %3833  ;;  %1003 = vperm.xlu0 %3751, %v3832_v60   ;;  %3853 = vrcp.f32 %v617_v57  ;;  %v324_v57 = vld [vmem:[%s4216_s29 + $0x90] sm:$0xff]  ;;  %v3569_v60 = vmul.f32 -1.442695, %v358_v51 }
  0x5e   : > { %v3836_v3 = vpop.eup %3835  ;;  %3855 = vrcp.f32 %v616_v61  ;;  %v361_v61 = vld [vmem:[%s4216_s29 + $0x1b8] sm:$0xff] }
  0x5f   : > { %v3838_v7 = vpop.eup %3837  ;;  %1188 = vperm.xlu1 %3752, %v3834_v0   ;;  %3857 = vpow2.f32 %v3564_v58  ;;  %v3536_v0 = vmul.f32 -1.442695, %v325_v54 }
  0x60   : > { %v3840_v10 = vpop.eup %3839  ;;  %3859 = vpow2.f32 %v3563_v62 }
  0x61   : > { %v3842_v13 = vpop.eup %3841  ;;  %1183 = vperm.xlu0 %3751, %v3836_v3   ;;  %3861 = vpow2.f32 %v3530_v1  ;;  %v360_v1 = vld [vmem:[%s4216_s29 + $0x1b0] sm:$0xff]  ;;  %v3535_v3 = vmul.f32 -1.442695, %v324_v57 }
  0x62   : > { %v3844_v16 = vpop.eup %3843  ;;  %3863 = vpow2.f32 %v3529_v5  ;;  %v327_v5 = vld [vmem:[%s4216_s29 + $0xa8] sm:$0xff] }
  0x63   : > { %v3846_v19 = vpop.eup %3845  ;;  %1018 = vperm.xlu1 %3752, %v3838_v7   ;;  %3865 = vpow2.f32 %v3566_v8  ;;  %v3572_v7 = vmul.f32 -1.442695, %v361_v61  ;;  %v326_v8 = vld [vmem:[%s4216_s29 + $0xa0] sm:$0xff] }
  0x64   : > { %v3848_v22 = vpop.eup %3847  ;;  %3867 = vpow2.f32 %v3565_v11  ;;  %v363_v11 = vld [vmem:[%s4216_s29 + $0x1c8] sm:$0xff] }
  0x65   : > { %v3850_v25 = vpop.eup %3849  ;;  %1013 = vperm.xlu0 %3751, %v3840_v10   ;;  %3869 = vpow2.f32 %v3532_v14  ;;  %v3571_v10 = vmul.f32 -1.442695, %v360_v1  ;;  %v362_v14 = vld [vmem:[%s4216_s29 + $0x1c0] sm:$0xff] }
  0x66   : > { %v3852_v27 = vpop.eup %3851  ;;  %3871 = vpow2.f32 %v3531_v17  ;;  %v329_v17 = vld [vmem:[%s4216_s29 + $0xb8] sm:$0xff] }
  0x67   : > { %v3854_v29 = vpop.eup %3853  ;;  %1198 = vperm.xlu1 %3752, %v3842_v13   ;;  %3873 = vpow2.f32 %v3568_v20  ;;  %v3538_v13 = vmul.f32 -1.442695, %v327_v5  ;;  %v328_v20 = vld [vmem:[%s4216_s29 + $0xb0] sm:$0xff] }
  0x68   : > { %v3856_v31 = vpop.eup %3855  ;;  %3875 = vpow2.f32 %v3567_v23  ;;  %v365_v23 = vld [vmem:[%s4216_s29 + $0x1d8] sm:$0xff] }
  0x69   : > { %v3858_v32 = vpop.eup %3857  ;;  %1193 = vperm.xlu0 %3751, %v3844_v16   ;;  %3877 = vpow2.f32 %v3534_v26  ;;  %v3537_v16 = vmul.f32 -1.442695, %v326_v8  ;;  %v364_v26 = vld [vmem:[%s4216_s29 + $0x1d0] sm:$0xff] }
  0x6a   : > { %v3860_v33 = vpop.eup %3859  ;;  %v653_v34 = vadd.f32 1.0, %v3858_v32  ;;  %3879 = vpow2.f32 %v3533_v28  ;;  %v3539_v28 = vmul.f32 -1.442695, %v328_v20  ;;  %v3575_v32 = vmul.f32 -1.442695, %v364_v26 }
  0x6b   : > { %v3862_v35 = vpop.eup %3861  ;;  %1028 = vperm.xlu1 %3752, %v3846_v19   ;;  %v652_v36 = vadd.f32 1.0, %v3860_v33  ;;  %3881 = vpow2.f32 %v3570_v30  ;;  %v3574_v19 = vmul.f32 -1.442695, %v363_v11  ;;  %v3576_v30 = vmul.f32 -1.442695, %v365_v23 }
  0x6c   : > { %v3864_v37 = vpop.eup %3863  ;;  %3883 = vrcp.f32 %v653_v34  ;;  %v619_v38 = vadd.f32 1.0, %v3862_v35 }
  0x6d   : > { %v3866_v39 = vpop.eup %3865  ;;  %1023 = vperm.xlu0 %3751, %v3848_v22   ;;  %3885 = vrcp.f32 %v652_v36  ;;  %v618_v40 = vadd.f32 1.0, %v3864_v37  ;;  %v3573_v22 = vmul.f32 -1.442695, %v362_v14 }
  0x6e   : > { %v3868_v41 = vpop.eup %3867  ;;  %3887 = vrcp.f32 %v619_v38  ;;  %v655_v42 = vadd.f32 1.0, %v3866_v39 }
  0x6f   : > { %v3870_v43 = vpop.eup %3869  ;;  %1208 = vperm.xlu1 %3752, %v3850_v25   ;;  %3889 = vrcp.f32 %v618_v40  ;;  %v654_v44 = vadd.f32 1.0, %v3868_v41  ;;  %v3540_v25 = vmul.f32 -1.442695, %v329_v17 }
  0x70   : > { %v3872_v45 = vpop.eup %3871  ;;  %3891 = vrcp.f32 %v655_v42  ;;  %v621_v46 = vadd.f32 1.0, %v3870_v43 }
  0x71   : > { %v3874_v47 = vpop.eup %3873  ;;  %1203 = vperm.xlu0 %3751, %v3852_v27   ;;  %3893 = vrcp.f32 %v654_v44  ;;  %v620_v48 = vadd.f32 1.0, %v3872_v45 }
  0x72   : > { %v3876_v49 = vpop.eup %3875  ;;  %3895 = vrcp.f32 %v621_v46  ;;  %v657_v50 = vadd.f32 1.0, %v3874_v47 }
  0x73   : > { %v3878_v52 = vpop.eup %3877  ;;  %1038 = vperm.xlu1 %3752, %v3854_v29   ;;  %3897 = vrcp.f32 %v620_v48  ;;  %v656_v53 = vadd.f32 1.0, %v3876_v49 }
  0x74   : > { %v3880_v55 = vpop.eup %3879  ;;  %3899 = vrcp.f32 %v657_v50  ;;  %v623_v56 = vadd.f32 1.0, %v3878_v52 }
  0x75   : > { %v3882_v58 = vpop.eup %3881  ;;  %1033 = vperm.xlu0 %3751, %v3856_v31   ;;  %3901 = vrcp.f32 %v656_v53  ;;  %v622_v59 = vadd.f32 1.0, %v3880_v55  ;;  %v331_v53 = vld [vmem:[%s4216_s29 + $0xc8] sm:$0xff] }
  0x76   : > { %v3884_v62 = vpop.eup %3883  ;;  %3903 = vrcp.f32 %v623_v56  ;;  %v659_v63 = vadd.f32 1.0, %v3882_v58  ;;  %v330_v56 = vld [vmem:[%s4216_s29 + $0xc0] sm:$0xff] }
  0x77   : > { %v3886_v2 = vpop.eup %3885  ;;  %1218 = vperm.xlu1 %3752, %v3884_v62   ;;  %3905 = vrcp.f32 %v622_v59  ;;  %v367_v59 = vld [vmem:[%s4216_s29 + $0x1e8] sm:$0xff]  ;;  %v3542_v62 = vmul.f32 -1.442695, %v331_v53 }
  0x78   : > { %v3888_v6 = vpop.eup %3887  ;;  %3907 = vrcp.f32 %v659_v63  ;;  %v366_v63 = vld [vmem:[%s4216_s29 + $0x1e0] sm:$0xff] }
  0x79   : > { %v3890_v9 = vpop.eup %3889  ;;  %1213 = vperm.xlu0 %3751, %v3886_v2   ;;  %3909 = vpow2.f32 %v3569_v60  ;;  %v3541_v2 = vmul.f32 -1.442695, %v330_v56 }
  0x7a   : > { %v3892_v12 = vpop.eup %3891  ;;  %3911 = vpow2.f32 %v3536_v0 }
  0x7b   : > { %v3894_v15 = vpop.eup %3893  ;;  %1048 = vperm.xlu1 %3752, %v3888_v6   ;;  %3913 = vpow2.f32 %v3535_v3  ;;  %v333_v3 = vld [vmem:[%s4216_s29 + $0xd8] sm:$0xff]  ;;  %v3578_v6 = vmul.f32 -1.442695, %v367_v59 }
  0x7c   : > { %v3896_v18 = vpop.eup %3895  ;;  %3915 = vpow2.f32 %v3572_v7  ;;  %v332_v7 = vld [vmem:[%s4216_s29 + $0xd0] sm:$0xff] }
  0x7d   : > { %v3898_v21 = vpop.eup %3897  ;;  %1043 = vperm.xlu0 %3751, %v3890_v9   ;;  %3917 = vpow2.f32 %v3571_v10  ;;  %v3577_v9 = vmul.f32 -1.442695, %v366_v63  ;;  %v369_v10 = vld [vmem:[%s4216_s29 + $0x1f8] sm:$0xff] }
  0x7e   : > { %v3900_v24 = vpop.eup %3899  ;;  %3919 = vpow2.f32 %v3538_v13  ;;  %v368_v13 = vld [vmem:[%s4216_s29 + $0x1f0] sm:$0xff] }
  0x7f   : > { %v3902_v27 = vpop.eup %3901  ;;  %1228 = vperm.xlu1 %3752, %v3892_v12   ;;  %3921 = vpow2.f32 %v3537_v16  ;;  %v3544_v12 = vmul.f32 -1.442695, %v333_v3  ;;  %v335_v16 = vld [vmem:[%s4216_s29 + $0xe8] sm:$0xff]  ;;  %v374_v3 = vld [vmem:[%s4216_s29 + $0x220] sm:$0xff] }
  0x80   : > { %v3904_v29 = vpop.eup %3903  ;;  %3923 = vpow2.f32 %v3574_v19  ;;  %v334_v19 = vld [vmem:[%s4216_s29 + $0xe0] sm:$0xff] }
  0x81   : > { %v3906_v31 = vpop.eup %3905  ;;  %1223 = vperm.xlu0 %3751, %v3894_v15   ;;  %3925 = vpow2.f32 %v3573_v22  ;;  %v3543_v15 = vmul.f32 -1.442695, %v332_v7  ;;  %v337_v22 = vld [vmem:[%s4216_s29 + $0xf8] sm:$0xff] }
  0x82   : > { %v3908_v33 = vpop.eup %3907  ;;  %3927 = vpow2.f32 %v3540_v25  ;;  %v336_v25 = vld [vmem:[%s4216_s29 + $0xf0] sm:$0xff]  ;;  %v377_v7 = vld [vmem:[%s4216_s29 + $0x238] sm:$0xff] }
  0x83   : > { %v3910_v34 = vpop.eup %3909  ;;  %1058 = vperm.xlu1 %3752, %v3896_v18   ;;  %3929 = vpow2.f32 %v3539_v28  ;;  %v3580_v18 = vmul.f32 -1.442695, %v369_v10  ;;  %v376_v10 = vld [vmem:[%s4216_s29 + $0x230] sm:$0xff] }
  0x84   : > { %v3912_v35 = vpop.eup %3911  ;;  %v658_v36 = vadd.f32 1.0, %v3910_v34  ;;  %3931 = vpow2.f32 %v3576_v30  ;;  %v371_v34 = vld [vmem:[%s4216_s29 + $0x208] sm:$0xff] }
  0x85   : > { %v3914_v37 = vpop.eup %3913  ;;  %1053 = vperm.xlu0 %3751, %v3898_v21   ;;  %v625_v38 = vadd.f32 1.0, %v3912_v35  ;;  %3933 = vpow2.f32 %v3575_v32  ;;  %v3579_v21 = vmul.f32 -1.442695, %v368_v13 }
  0x86   : > { %v3916_v39 = vpop.eup %3915  ;;  %3935 = vrcp.f32 %v658_v36  ;;  %v624_v40 = vadd.f32 1.0, %v3914_v37 }
  0x87   : > { %v3918_v41 = vpop.eup %3917  ;;  %1238 = vperm.xlu1 %3752, %v3900_v24   ;;  %3937 = vrcp.f32 %v625_v38  ;;  %v661_v42 = vadd.f32 1.0, %v3916_v39  ;;  %v3546_v24 = vmul.f32 -1.442695, %v335_v16 }
  0x88   : > { %v3920_v43 = vpop.eup %3919  ;;  %3939 = vrcp.f32 %v624_v40  ;;  %v660_v44 = vadd.f32 1.0, %v3918_v41  ;;  %v3582_v40 = vmul.f32 -1.442695, %v371_v34 }
  0x89   : > { %v3922_v45 = vpop.eup %3921  ;;  %1233 = vperm.xlu0 %3751, %v3902_v27   ;;  %3941 = vrcp.f32 %v661_v42  ;;  %v627_v46 = vadd.f32 1.0, %v3920_v43  ;;  %v3545_v27 = vmul.f32 -1.442695, %v334_v19 }
  0x8a   : > { %v3924_v47 = vpop.eup %3923  ;;  %3943 = vrcp.f32 %v660_v44  ;;  %v626_v48 = vadd.f32 1.0, %v3922_v45 }
  0x8b   : > { %v3926_v49 = vpop.eup %3925  ;;  %1068 = vperm.xlu1 %3752, %v3904_v29   ;;  %3945 = vrcp.f32 %v627_v46  ;;  %v663_v50 = vadd.f32 1.0, %v3924_v47  ;;  %v3548_v29 = vmul.f32 -1.442695, %v337_v22 }
  0x8c   : > { %v3928_v51 = vpop.eup %3927  ;;  %3947 = vrcp.f32 %v626_v48  ;;  %v662_v52 = vadd.f32 1.0, %v3926_v49 }
  0x8d   : > { %v3930_v54 = vpop.eup %3929  ;;  %1063 = vperm.xlu0 %3751, %v3906_v31   ;;  %3949 = vrcp.f32 %v663_v50  ;;  %v629_v55 = vadd.f32 1.0, %v3928_v51  ;;  %v3547_v31 = vmul.f32 -1.442695, %v336_v25  ;;  %v380_v25 = vld [vmem:[%s4216_s29 + $0x250] sm:$0xff] }
  0x8e   : > { %v3932_v57 = vpop.eup %3931  ;;  %3951 = vrcp.f32 %v662_v52  ;;  %v628_v58 = vadd.f32 1.0, %v3930_v54 }
  0x8f   : > { %v3934_v60 = vpop.eup %3933  ;;  %1248 = vperm.xlu1 %3752, %v3908_v33   ;;  %3953 = vrcp.f32 %v629_v55  ;;  %v665_v61 = vadd.f32 1.0, %v3932_v57  ;;  %v370_v55 = vld [vmem:[%s4216_s29 + $0x200] sm:$0xff] }
  0x90   : > { %v3936_v0 = vpop.eup %3935  ;;  %3955 = vrcp.f32 %v628_v58  ;;  %v664_v1 = vadd.f32 1.0, %v3934_v60  ;;  %v373_v58 = vld [vmem:[%s4216_s29 + $0x218] sm:$0xff]  ;;  %v3581_v63 = vmul.f32 -1.442695, %v370_v55 }
  0x91   : > { %v3938_v5 = vpop.eup %3937  ;;  %1243 = vperm.xlu0 %3751, %v3936_v0   ;;  %3957 = vrcp.f32 %v665_v61  ;;  %v372_v61 = vld [vmem:[%s4216_s29 + $0x210] sm:$0xff]  ;;  %v375_v0 = vld [vmem:[%s4216_s29 + $0x228] sm:$0xff] }
  0x92   : > { %v3940_v8 = vpop.eup %3939  ;;  %3959 = vrcp.f32 %v664_v1 }
  0x93   : > { %v3942_v11 = vpop.eup %3941  ;;  %1078 = vperm.xlu1 %3752, %v3938_v5   ;;  %3961 = vpow2.f32 %v3542_v62 }
  0x94   : > { %v3944_v14 = vpop.eup %3943  ;;  %3963 = vpow2.f32 %v3541_v2  ;;  %v3584_v2 = vmul.f32 -1.442695, %v373_v58  ;;  %v896_v58 = vld [vmem:[%s4211_s25 + $0x208] sm:$0xff] }
  0x95   : > { %v3946_v17 = vpop.eup %3945  ;;  %1073 = vperm.xlu0 %3751, %v3940_v8   ;;  %3965 = vpow2.f32 %v3578_v6  ;;  %v3583_v6 = vmul.f32 -1.442695, %v372_v61 }
  0x96   : > { %v3948_v20 = vpop.eup %3947  ;;  %3967 = vpow2.f32 %v3577_v9  ;;  %v3586_v9 = vmul.f32 -1.442695, %v375_v0  ;;  %v1588_v0 = vld [vmem:[%s4221_s7 + $0x30] sm:$0xff] }
  0x97   : > { %v3950_v23 = vpop.eup %3949  ;;  %1258 = vperm.xlu1 %3752, %v3942_v11   ;;  %3969 = vpow2.f32 %v3544_v12  ;;  %v3585_v12 = vmul.f32 -1.442695, %v374_v3 }
  0x98   : > { %v3952_v26 = vpop.eup %3951  ;;  %3971 = vpow2.f32 %v3543_v15  ;;  %v379_v15 = vld [vmem:[%s4216_s29 + $0x248] sm:$0xff] }
  0x99   : > { %v3954_v28 = vpop.eup %3953  ;;  %1253 = vperm.xlu0 %3751, %v3944_v14   ;;  %3973 = vpow2.f32 %v3580_v18  ;;  %v3588_v14 = vmul.f32 -1.442695, %v377_v7  ;;  %v378_v18 = vld [vmem:[%s4216_s29 + $0x240] sm:$0xff]  ;;  %v3590_v22 = vmul.f32 -1.442695, %v379_v15  ;;  %v834_v15 = vld [vmem:[%s4211_s25 + $0x18] sm:$0xff] }
  0x9a   : > { %v3956_v30 = vpop.eup %3955  ;;  %3975 = vpow2.f32 %v3579_v21 }
  0x9b   : > { %v3958_v32 = vpop.eup %3957  ;;  %1088 = vperm.xlu1 %3752, %v3946_v17   ;;  %3977 = vpow2.f32 %v3546_v24  ;;  %v3587_v17 = vmul.f32 -1.442695, %v376_v10  ;;  %v3589_v24 = vmul.f32 -1.442695, %v378_v18  ;;  %v832_v18 = vld [vmem:[%s4211_s25 + $0x8] sm:$0xff] }
  0x9c   : > { %v3960_v33 = vpop.eup %3959  ;;  %3979 = vpow2.f32 %v3545_v27 }
  0x9d   : > { %v3962_v35 = vpop.eup %3961  ;;  %1083 = vperm.xlu0 %3751, %v3948_v20   ;;  %3981 = vpow2.f32 %v3548_v29  ;;  %v3591_v29 = vmul.f32 -1.442695, %v380_v25 }
  0x9e   : > { %v3964_v36 = vpop.eup %3963  ;;  %v631_v37 = vadd.f32 1.0, %v3962_v35  ;;  %3983 = vpow2.f32 %v3547_v31 }
  0x9f   : > { %v3966_v38 = vpop.eup %3965  ;;  %1268 = vperm.xlu1 %3752, %v3950_v23   ;;  %v630_v39 = vadd.f32 1.0, %v3964_v36 }
  0xa0   : > { %v3968_v41 = vpop.eup %3967  ;;  %3985 = vrcp.f32 %v631_v37  ;;  %v667_v42 = vadd.f32 1.0, %v3966_v38 }
  0xa1   : > { %v3970_v43 = vpop.eup %3969  ;;  %1263 = vperm.xlu0 %3751, %v3952_v26   ;;  %3987 = vrcp.f32 %v630_v39  ;;  %v666_v44 = vadd.f32 1.0, %v3968_v41 }
  0xa2   : > { %v3972_v45 = vpop.eup %3971  ;;  %3989 = vrcp.f32 %v667_v42  ;;  %v633_v46 = vadd.f32 1.0, %v3970_v43  ;;  %v1585_v43 = vld [vmem:[%s4221_s7 + $0x18] sm:$0xff] }
  0xa3   : > { %v3974_v47 = vpop.eup %3973  ;;  %1098 = vperm.xlu1 %3752, %v3954_v28   ;;  %v632_v48 = vadd.f32 1.0, %v3972_v45  ;;  %3991 = vpow2.f32 %v3582_v40 }
  0xa4   : > { %v3976_v49 = vpop.eup %3975  ;;  %3993 = vrcp.f32 %v666_v44  ;;  %v669_v50 = vadd.f32 1.0, %v3974_v47  ;;  %v1590_v44 = vld [vmem:[%s4221_s7 + $0x40] sm:$0xff] }
  0xa5   : > { %v3978_v51 = vpop.eup %3977  ;;  %1093 = vperm.xlu0 %3751, %v3956_v30   ;;  %3995 = vrcp.f32 %v633_v46  ;;  %v668_v52 = vadd.f32 1.0, %v3976_v49  ;;  %v1710_v47 = vpack.c.bf16 %v1590_v44, %v1585_v43 }
  0xa6   : > { %v3980_v53 = vpop.eup %3979  ;;  %3997 = vrcp.f32 %v632_v48  ;;  %v635_v54 = vadd.f32 1.0, %v3978_v51 }
  0xa7   : > { %v3982_v56 = vpop.eup %3981  ;;  %1278 = vperm.xlu1 %3752, %v3958_v32   ;;  %3999 = vrcp.f32 %v669_v50  ;;  %v634_v57 = vadd.f32 1.0, %v3980_v53  ;;  %2062 = vmatprep.mubr.bf16.mxu0 %v1710_v47 }
  0xa8   : > { %v3984_v59 = vpop.eup %3983  ;;  %4001 = vrcp.f32 %v668_v52  ;;  %v637_v60 = vadd.f32 1.0, %v3982_v56 }
  0xa9   : > { %1273 = vperm.xlu0 %3751, %v3960_v33   ;;  %4003 = vrcp.f32 %v635_v54  ;;  %v636_v62 = vadd.f32 1.0, %v3984_v59  ;;  %v895_v54 = vld [vmem:[%s4211_s25 + $0x200] sm:$0xff]  ;;  %v902_v59 = vld [vmem:[%s4211_s25 + $0x238] sm:$0xff] }
  0xaa   : > { %v3986_v1 = vpop.eup %3985  ;;  %4005 = vrcp.f32 %v634_v57 }
  0xab   : > { %v3988_v5 = vpop.eup %3987  ;;  %1108 = vperm.xlu1 %3752, %v3986_v1   ;;  %4007 = vrcp.f32 %v637_v60  ;;  %v897_v60 = vld [vmem:[%s4211_s25 + $0x210] sm:$0xff] }
  0xac   : > { %v3990_v8 = vpop.eup %3989  ;;  %4009 = vrcp.f32 %v636_v62  ;;  %v898_v62 = vld [vmem:[%s4211_s25 + $0x218] sm:$0xff] }
  0xad   : > { %v3992_v11 = vpop.eup %3991  ;;  %1103 = vperm.xlu0 %3751, %v3988_v5   ;;  %4011 = vpow2.f32 %v3581_v63  ;;  %v1583_v63 = vld [vmem:[%s4221_s7 + $0x8] sm:$0xff] }
  0xae   : > { %v3994_v13 = vpop.eup %3993  ;;  %4013 = vpow2.f32 %v3584_v2  ;;  %v671_v20 = vadd.f32 1.0, %v3992_v11  ;;  %v1708_v3 = vpack.c.bf16 %v1588_v0, %v1583_v63  ;;  %v900_v5 = vld [vmem:[%s4211_s25 + $0x228] sm:$0xff]  ;;  %v910_v63 = vld [vmem:[%s4211_s25 + $0x278] sm:$0xff] }
  0xaf   : > { %v3996_v16 = vpop.eup %3995  ;;  %1288 = vperm.xlu1 %3752, %v3990_v8   ;;  %4015 = vpow2.f32 %v3583_v6 }
  0xb0   : > { %v3998_v19 = vpop.eup %3997  ;;  %4017 = vpow2.f32 %v3586_v9  ;;  %1901 = vmatprep.mubr.bf16.mxu1 %v1708_v3 }
  0xb1   : > { %v4000_v21 = vpop.eup %3999  ;;  %1283 = vperm.xlu0 %3751, %v3994_v13   ;;  %4019 = vpow2.f32 %v3585_v12 }
  0xb2   : > { %v4002_v23 = vpop.eup %4001  ;;  %4021 = vpow2.f32 %v3588_v14  ;;  %v833_v14 = vld [vmem:[%s4211_s25 + $0x10] sm:$0xff] }
  0xb3   : > { %v4004_v26 = vpop.eup %4003  ;;  %1118 = vperm.xlu1 %3752, %v3996_v16   ;;  %4023 = vpow2.f32 %v3587_v17  ;;  %v901_v16 = vld [vmem:[%s4211_s25 + $0x230] sm:$0xff]  ;;  %v831_v17 = vld [vmem:[%s4211_s25] sm:$0xff] }
  0xb4   : > { %v4006_v27 = vpop.eup %4005  ;;  %4025 = vrcp.f32 %v671_v20 }
  0xb5   : > { %v4008_v28 = vpop.eup %4007  ;;  %1113 = vperm.xlu0 %3751, %v3998_v19   ;;  %4027 = vpow2.f32 %v3590_v22 }
  0xb6   : > { %v4010_v30 = vpop.eup %4009  ;;  %4029 = vpow2.f32 %v3589_v24  ;;  %v899_v24 = vld [vmem:[%s4211_s25 + $0x220] sm:$0xff] }
  0xb7   : > { %v4012_v31 = vpop.eup %4011  ;;  %1298 = vperm.xlu1 %3752, %v4000_v21   ;;  %4031 = vpow2.f32 %v3591_v29 }
  0xb8   : > { %v4014_v32 = vpop.eup %4013  ;;  %v670_v33 = vadd.f32 1.0, %v4012_v31 }
  0xb9   : > { %v4016_v34 = vpop.eup %4015  ;;  %1293 = vperm.xlu0 %3751, %v4002_v23   ;;  %v673_v35 = vadd.f32 1.0, %v4014_v32 }
  0xba   : > { %v4018_v36 = vpop.eup %4017  ;;  %4033 = vrcp.f32 %v670_v33  ;;  %v672_v37 = vadd.f32 1.0, %v4016_v34  ;;  %v905_v33 = vld [vmem:[%s4211_s25 + $0x250] sm:$0xff]  ;;  %v906_v34 = vld [vmem:[%s4211_s25 + $0x258] sm:$0xff] }
  0xbb   : > { %v4020_v38 = vpop.eup %4019  ;;  %1128 = vperm.xlu1 %3752, %v4004_v26   ;;  %4035 = vrcp.f32 %v673_v35  ;;  %v675_v39 = vadd.f32 1.0, %v4018_v36  ;;  %v903_v35 = vld [vmem:[%s4211_s25 + $0x240] sm:$0xff]  ;;  %v904_v36 = vld [vmem:[%s4211_s25 + $0x248] sm:$0xff] }
  0xbc   : > { %v4022_v40 = vpop.eup %4021  ;;  %4037 = vrcp.f32 %v672_v37  ;;  %v674_v41 = vadd.f32 1.0, %v4020_v38 }
  0xbd   : > { %v4024_v42 = vpop.eup %4023  ;;  %1123 = vperm.xlu0 %3751, %v4006_v27   ;;  %4039 = vrcp.f32 %v675_v39  ;;  %v677_v46 = vadd.f32 1.0, %v4022_v40 }
  0xbe   : > { %v4026_v45 = vpop.eup %4025  ;;  %4041 = vrcp.f32 %v674_v41  ;;  %v676_v50 = vadd.f32 1.0, %v4024_v42 }
  0xbf   : > { %v4028_v48 = vpop.eup %4027  ;;  %1138 = vperm.xlu1 %3752, %v4008_v28   ;;  %4043 = vrcp.f32 %v677_v46 }
  0xc0   : > { %v4030_v49 = vpop.eup %4029  ;;  %v679_v52 = vadd.f32 1.0, %v4028_v48  ;;  %4045 = vrcp.f32 %v676_v50  ;;  %v838_v50 = vld [vmem:[%s4211_s25 + $0x38] sm:$0xff] }
  0xc1   : > { %1133 = vperm.xlu0 %3751, %v4010_v30   ;;  %v4032_v53 = vpop.eup %4031  ;;  %v678_v56 = vadd.f32 1.0, %v4030_v49  ;;  %v837_v49 = vld [vmem:[%s4211_s25 + $0x30] sm:$0xff] }
  0xc2   : > { %v4328_v51 = vpop.permute.xlu1 %1153  ;;  %4047 = vrcp.f32 %v679_v52  ;;  %v680_v8 = vadd.f32 1.0, %v4032_v53  ;;  %v835_v52 = vld [vmem:[%s4211_s25 + $0x20] sm:$0xff]  ;;  %v836_v53 = vld [vmem:[%s4211_s25 + $0x28] sm:$0xff] }
  0xc3   : > { %v1144_v55 = vpop.permute.xlu0 %1143  ;;  %1308 = vperm.xlu1 %3752, %v4026_v45   ;;  %4049 = vrcp.f32 %v678_v56  ;;  %v1425_v20 = vmul.f32 %v4328_v51, %v900_v5  ;;  %v1424_v38 = vmul.f32 %v4328_v51, %v899_v24  ;;  %v913_v24 = vld [vmem:[%s4211_s25 + $0x290] sm:$0xff] }
  0xc4   : > { %v4034_v57 = vpop.eup %4033  ;;  %v1420_v6 = vmul.f32 %v1144_v55, %v895_v54  ;;  %v1421_v10 = vmul.f32 %v1144_v55, %v896_v58  ;;  %4051 = vrcp.f32 %v680_v8 }
  0xc5   : > { %v4036_v61 = vpop.eup %4035  ;;  %1303 = vperm.xlu0 %3751, %v4034_v57  }
  0xc6   : > { %v4038_v1 = vpop.eup %4037  ;;  %v1159_v2 = vpop.permute.xlu1 %1158 }
  0xc7   : > { %v1149_v7 = vpop.permute.xlu0 %1148  ;;  %1318 = vperm.xlu1 %3752, %v4036_v61   ;;  %v4040_v9 = vpop.eup %4039  ;;  %v1427_v11 = vmul.f32 %v1159_v2, %v902_v59  ;;  %v1426_v29 = vmul.f32 %v1159_v2, %v901_v16  ;;  %v908_v2 = vld [vmem:[%s4211_s25 + $0x268] sm:$0xff] }
  0xc8   : > { %v1422_v12 = vmul.f32 %v1149_v7, %v897_v60  ;;  %v1423_v13 = vmul.f32 %v1149_v7, %v898_v62  ;;  %v4042_v19 = vpop.eup %4041  ;;  %v909_v62 = vld [vmem:[%s4211_s25 + $0x270] sm:$0xff] }
  0xc9   : > { %1313 = vperm.xlu0 %3751, %v4038_v1   ;;  %v4044_v28 = vpop.eup %4043  ;;  %v4349_v30 = vpack.c.bf16 %v1427_v11, %v1425_v20  ;;  %v4359_v46 = vpack.c.bf16 %v1426_v29, %v1424_v38  ;;  %v907_v1 = vld [vmem:[%s4211_s25 + $0x260] sm:$0xff]  ;;  %v846_v38 = vld [vmem:[%s4211_s25 + $0x78] sm:$0xff] }
  0xca   : > { %v989_v21 = vpop.permute.xlu1 %988  ;;  %v4344_v22 = vpack.c.bf16 %v1423_v13, %v1421_v10  ;;  %v4346_v23 = vpack.c.bf16 %v1422_v12, %v1420_v6  ;;  %v4046_v37 = vpop.eup %4045  ;;  %v841_v12 = vld [vmem:[%s4211_s25 + $0x50] sm:$0xff]  ;;  %v842_v13 = vld [vmem:[%s4211_s25 + $0x58] sm:$0xff]  ;;  %v911_v29 = vld [vmem:[%s4211_s25 + $0x280] sm:$0xff] }
  0xcb   : > { %v1358_v25 = vmul.f32 %v989_v21, %v833_v14  ;;  %v1359_v26 = vmul.f32 %v989_v21, %v834_v15  ;;  %v984_v27 = vpop.permute.xlu0 %983  ;;  %1328 = vperm.xlu1 %3752, %v4040_v9  }
  0xcc   : > { %v1356_v31 = vmul.f32 %v984_v27, %v831_v17  ;;  %v1357_v32 = vmul.f32 %v984_v27, %v832_v18  ;;  %2030 = vmatprep.subr.bf16.mxu0 %v4344_v22  ;;  %v4048_v45 = vpop.eup %4047  ;;  %v839_v17 = vld [vmem:[%s4211_s25 + $0x40] sm:$0xff]  ;;  %v840_v18 = vld [vmem:[%s4211_s25 + $0x48] sm:$0xff] }
  0xcd   : > { %1323 = vperm.xlu0 %3751, %v4042_v19   ;;  %2031 = vmatpush1.bf16.msra.mxu0 %v4346_v23  ;;  %v4050_v51 = vpop.eup %4049 }
  0xce   : > { %2032 = vmatprep.subr.bf16.mxu0 %v4349_v30  ;;  %v1169_v39 = vpop.permute.xlu1 %1168  ;;  %v1507_v40 = vpack.c.bf16 %v1359_v26, %v1357_v32  ;;  %v1506_v41 = vpack.c.bf16 %v1358_v25, %v1356_v31  ;;  %v4052_v0 = vpop.eup %4051  ;;  %v914_v25 = vld [vmem:[%s4211_s25 + $0x298] sm:$0xff]  ;;  %v912_v31 = vld [vmem:[%s4211_s25 + $0x288] sm:$0xff] }
  0xcf   : > { %v1430_v42 = vmul.f32 %v1169_v39, %v905_v33  ;;  %v1431_v43 = vmul.f32 %v1169_v39, %v906_v34  ;;  %v1164_v44 = vpop.permute.xlu0 %1163  ;;  %1338 = vperm.xlu1 %3752, %v4044_v28  }
  0xd0   : > { %v1428_v47 = vmul.f32 %v1164_v44, %v903_v35  ;;  %v1429_v48 = vmul.f32 %v1164_v44, %v904_v36  ;;  %1869 = vmatprep.subr.bf16.mxu1 %v1507_v40 }
  0xd1   : > { %1333 = vperm.xlu0 %3751, %v4046_v37   ;;  %1870 = vmatpush1.bf16.msra.mxu1 %v1506_v41  ;;  %v845_v37 = vld [vmem:[%s4211_s25 + $0x70] sm:$0xff] }
  0xd2   : > { %v4365_v54 = vpack.c.bf16 %v1430_v42, %v1428_v47  ;;  %v4367_v55 = vpack.c.bf16 %v1431_v43, %v1429_v48  ;;  %2033 = vmatpush1.bf16.msra.mxu0 %v4359_v46  ;;  %v999_v56 = vpop.permute.xlu1 %998  ;;  %v843_v42 = vld [vmem:[%s4211_s25 + $0x60] sm:$0xff]  ;;  %v844_v43 = vld [vmem:[%s4211_s25 + $0x68] sm:$0xff] }
  0xd3   : > { %v1362_v57 = vmul.f32 %v999_v56, %v837_v49  ;;  %v1363_v58 = vmul.f32 %v999_v56, %v838_v50  ;;  %v994_v59 = vpop.permute.xlu0 %993  ;;  %1348 = vperm.xlu1 %3752, %v4048_v45   ;;  %v917_v50 = vld [vmem:[%s4211_s25 + $0x2b0] sm:$0xff] }
  0xd4   : > { %v1360_v60 = vmul.f32 %v994_v59, %v835_v52  ;;  %v1361_v61 = vmul.f32 %v994_v59, %v836_v53  ;;  %2034 = vmatprep.subr.bf16.mxu0 %v4367_v55 }
  0xd5   : > { %1343 = vperm.xlu0 %3751, %v4050_v51   ;;  %v918_v51 = vld [vmem:[%s4211_s25 + $0x2b8] sm:$0xff] }
  0xd6   : > { %v1508_v3 = vpack.c.bf16 %v1362_v57, %v1360_v60  ;;  %v1509_v5 = vpack.c.bf16 %v1363_v58, %v1361_v61  ;;  %2035 = vmatpush1.bf16.msra.mxu0 %v4365_v54  ;;  %v1179_v6 = vpop.permute.xlu1 %1178  ;;  %v915_v57 = vld [vmem:[%s4211_s25 + $0x2a0] sm:$0xff]  ;;  %v916_v58 = vld [vmem:[%s4211_s25 + $0x2a8] sm:$0xff] }
  0xd7   : > { %v1434_v7 = vmul.f32 %v1179_v6, %v909_v62  ;;  %v1435_v8 = vmul.f32 %v1179_v6, %v910_v63  ;;  %v1174_v9 = vpop.permute.xlu0 %1173  ;;  %v847_v6 = vld [vmem:[%s4211_s25 + $0x80] sm:$0xff] }
  0xd8   : > { %v1432_v10 = vmul.f32 %v1174_v9, %v907_v1  ;;  %v1433_v11 = vmul.f32 %v1174_v9, %v908_v2  ;;  %1871 = vmatprep.subr.bf16.mxu1 %v1509_v5  ;;  %v850_v1 = vld [vmem:[%s4211_s25 + $0x98] sm:$0xff] }
  0xd9   : > { %1353 = vperm.xlu0 %3751, %v4052_v0   ;;  %1872 = vmatpush1.bf16.msra.mxu1 %v1508_v3  ;;  %v849_v0 = vld [vmem:[%s4211_s25 + $0x90] sm:$0xff] }
  0xda   : > { %v4378_v14 = vpack.c.bf16 %v1434_v7, %v1432_v10  ;;  %v4380_v15 = vpack.c.bf16 %v1435_v8, %v1433_v11  ;;  %v1009_v16 = vpop.permute.xlu1 %1008  ;;  %v848_v7 = vld [vmem:[%s4211_s25 + $0x88] sm:$0xff] }
  0xdb   : > { %v1366_v19 = vmul.f32 %v1009_v16, %v841_v12  ;;  %v1367_v20 = vmul.f32 %v1009_v16, %v842_v13  ;;  %v921_v13 = vld [vmem:[%s4211_s25 + $0x2d0] sm:$0xff]  ;;  %v922_v16 = vld [vmem:[%s4211_s25 + $0x2d8] sm:$0xff] }
  0xdc   : > { %v1004_v21 = vpop.permute.xlu0 %1003  ;;  %2036 = vmatprep.subr.bf16.mxu0 %v4380_v15 }
  0xdd   : > { %v1364_v26 = vmul.f32 %v1004_v21, %v839_v17  ;;  %v1365_v27 = vmul.f32 %v1004_v21, %v840_v18  ;;  %2037 = vmatpush1.bf16.msra.mxu0 %v4378_v14  ;;  %v920_v21 = vld [vmem:[%s4211_s25 + $0x2c8] sm:$0xff] }
  0xde   : > { %v1189_v28 = vpop.permute.xlu1 %1188 }
  0xdf   : > { %v1510_v32 = vpack.c.bf16 %v1366_v19, %v1364_v26  ;;  %v1511_v33 = vpack.c.bf16 %v1367_v20, %v1365_v27  ;;  %v1438_v34 = vmul.f32 %v1189_v28, %v913_v24  ;;  %v1439_v35 = vmul.f32 %v1189_v28, %v914_v25  ;;  %v919_v20 = vld [vmem:[%s4211_s25 + $0x2c0] sm:$0xff] }
  0xe0   : > { %v1184_v36 = vpop.permute.xlu0 %1183 }
  0xe1   : > { %v1436_v39 = vmul.f32 %v1184_v36, %v911_v29  ;;  %v1437_v40 = vmul.f32 %v1184_v36, %v912_v31  ;;  %1873 = vmatprep.subr.bf16.mxu1 %v1511_v33  ;;  %v853_v29 = vld [vmem:[%s4211_s25 + $0xb0] sm:$0xff]  ;;  %v854_v31 = vld [vmem:[%s4211_s25 + $0xb8] sm:$0xff]  ;;  %v852_v36 = vld [vmem:[%s4211_s25 + $0xa8] sm:$0xff] }
  0xe2   : > { %1874 = vmatpush1.bf16.msra.mxu1 %v1510_v32  ;;  %v1019_v41 = vpop.permute.xlu1 %1018 }
  0xe3   : > { %v4394_v44 = vpack.c.bf16 %v1438_v34, %v1436_v39  ;;  %v4396_v45 = vpack.c.bf16 %v1439_v35, %v1437_v40  ;;  %v1370_v47 = vmul.f32 %v1019_v41, %v845_v37  ;;  %v1371_v48 = vmul.f32 %v1019_v41, %v846_v38  ;;  %v851_v35 = vld [vmem:[%s4211_s25 + $0xa0] sm:$0xff] }
  0xe4   : > { %v1014_v49 = vpop.permute.xlu0 %1013 }
  0xe5   : > { %v1368_v52 = vmul.f32 %v1014_v49, %v843_v42  ;;  %v1369_v53 = vmul.f32 %v1014_v49, %v844_v43  ;;  %2038 = vmatprep.subr.bf16.mxu0 %v4396_v45  ;;  %v925_v42 = vld [vmem:[%s4211_s25 + $0x2f0] sm:$0xff]  ;;  %v926_v43 = vld [vmem:[%s4211_s25 + $0x2f8] sm:$0xff] }
  0xe6   : > { %2039 = vmatpush1.bf16.msra.mxu0 %v4394_v44  ;;  %v1199_v56 = vpop.permute.xlu1 %1198 }
  0xe7   : > { %v1512_v59 = vpack.c.bf16 %v1370_v47, %v1368_v52  ;;  %v1513_v60 = vpack.c.bf16 %v1371_v48, %v1369_v53  ;;  %v1442_v61 = vmul.f32 %v1199_v56, %v917_v50  ;;  %v1443_v62 = vmul.f32 %v1199_v56, %v918_v51  ;;  %v923_v50 = vld [vmem:[%s4211_s25 + $0x2e0] sm:$0xff]  ;;  %v924_v51 = vld [vmem:[%s4211_s25 + $0x2e8] sm:$0xff] }
  0xe8   : > { %v1194_v63 = vpop.permute.xlu0 %1193 }
  0xe9   : > { %v1440_v2 = vmul.f32 %v1194_v63, %v915_v57  ;;  %v1441_v3 = vmul.f32 %v1194_v63, %v916_v58  ;;  %1875 = vmatprep.subr.bf16.mxu1 %v1513_v60  ;;  %v858_v60 = vld [vmem:[%s4211_s25 + $0xd8] sm:$0xff] }
  0xea   : > { %1876 = vmatpush1.bf16.msra.mxu1 %v1512_v59  ;;  %v1029_v5 = vpop.permute.xlu1 %1028  ;;  %v857_v59 = vld [vmem:[%s4211_s25 + $0xd0] sm:$0xff] }
  0xeb   : > { %v4408_v8 = vpack.c.bf16 %v1442_v61, %v1440_v2  ;;  %v4410_v9 = vpack.c.bf16 %v1443_v62, %v1441_v3  ;;  %v1374_v10 = vmul.f32 %v1029_v5, %v849_v0  ;;  %v1375_v11 = vmul.f32 %v1029_v5, %v850_v1  ;;  %v855_v0 = vld [vmem:[%s4211_s25 + $0xc0] sm:$0xff]  ;;  %v856_v1 = vld [vmem:[%s4211_s25 + $0xc8] sm:$0xff] }
  0xec   : > { %v1024_v12 = vpop.permute.xlu0 %1023 }
  0xed   : > { %v1372_v17 = vmul.f32 %v1024_v12, %v847_v6  ;;  %v1373_v18 = vmul.f32 %v1024_v12, %v848_v7  ;;  %2040 = vmatprep.subr.bf16.mxu0 %v4410_v9 }
  0xee   : > { %2041 = vmatpush1.bf16.msra.mxu0 %v4408_v8  ;;  %v1209_v19 = vpop.permute.xlu1 %1208 }
  0xef   : > { %v1514_v24 = vpack.c.bf16 %v1374_v10, %v1372_v17  ;;  %v1515_v25 = vpack.c.bf16 %v1375_v11, %v1373_v18  ;;  %v1446_v26 = vmul.f32 %v1209_v19, %v921_v13  ;;  %v1447_v27 = vmul.f32 %v1209_v19, %v922_v16  ;;  %v929_v10 = vld [vmem:[%s4211_s25 + $0x310] sm:$0xff]  ;;  %v930_v11 = vld [vmem:[%s4211_s25 + $0x318] sm:$0xff]  ;;  %v927_v17 = vld [vmem:[%s4211_s25 + $0x300] sm:$0xff] }
  0xf0   : > { %v1204_v28 = vpop.permute.xlu0 %1203  ;;  %v928_v18 = vld [vmem:[%s4211_s25 + $0x308] sm:$0xff] }
  0xf1   : > { %v1444_v32 = vmul.f32 %v1204_v28, %v919_v20  ;;  %v1445_v33 = vmul.f32 %v1204_v28, %v920_v21  ;;  %1877 = vmatprep.subr.bf16.mxu1 %v1515_v25 }
  0xf2   : > { %1878 = vmatpush1.bf16.msra.mxu1 %v1514_v24  ;;  %v1039_v34 = vpop.permute.xlu1 %1038 }
  0xf3   : > { %v4422_v37 = vpack.c.bf16 %v1446_v26, %v1444_v32  ;;  %v4424_v38 = vpack.c.bf16 %v1447_v27, %v1445_v33  ;;  %v1378_v39 = vmul.f32 %v1039_v34, %v853_v29  ;;  %v1379_v40 = vmul.f32 %v1039_v34, %v854_v31  ;;  %v861_v26 = vld [vmem:[%s4211_s25 + $0xf0] sm:$0xff]  ;;  %v862_v27 = vld [vmem:[%s4211_s25 + $0xf8] sm:$0xff]  ;;  %v859_v32 = vld [vmem:[%s4211_s25 + $0xe0] sm:$0xff] }
  0xf4   : > { %v1034_v41 = vpop.permute.xlu0 %1033  ;;  %v860_v33 = vld [vmem:[%s4211_s25 + $0xe8] sm:$0xff] }
  0xf5   : > { %v1376_v47 = vmul.f32 %v1034_v41, %v851_v35  ;;  %v1377_v48 = vmul.f32 %v1034_v41, %v852_v36  ;;  %2042 = vmatprep.subr.bf16.mxu0 %v4424_v38  ;;  %v933_v41 = vld [vmem:[%s4211_s25 + $0x330] sm:$0xff] }
  0xf6   : > { %2043 = vmatpush1.bf16.msra.mxu0 %v4422_v37  ;;  %v1219_v49 = vpop.permute.xlu1 %1218 }
  0xf7   : > { %v1516_v52 = vpack.c.bf16 %v1378_v39, %v1376_v47  ;;  %v1517_v53 = vpack.c.bf16 %v1379_v40, %v1377_v48  ;;  %v1450_v56 = vmul.f32 %v1219_v49, %v925_v42  ;;  %v1451_v57 = vmul.f32 %v1219_v49, %v926_v43  ;;  %v934_v42 = vld [vmem:[%s4211_s25 + $0x338] sm:$0xff]  ;;  %v931_v49 = vld [vmem:[%s4211_s25 + $0x320] sm:$0xff] }
  0xf8   : > { %v1214_v58 = vpop.permute.xlu0 %1213 }
  0xf9   : > { %v1448_v61 = vmul.f32 %v1214_v58, %v923_v50  ;;  %v1449_v62 = vmul.f32 %v1214_v58, %v924_v51  ;;  %1879 = vmatprep.subr.bf16.mxu1 %v1517_v53  ;;  %v932_v50 = vld [vmem:[%s4211_s25 + $0x328] sm:$0xff]  ;;  %v865_v58 = vld [vmem:[%s4211_s25 + $0x110] sm:$0xff] }
  0xfa   : > { %1880 = vmatpush1.bf16.msra.mxu1 %v1516_v52  ;;  %v1049_v63 = vpop.permute.xlu1 %1048 }
  0xfb   : > { %v4436_v2 = vpack.c.bf16 %v1450_v56, %v1448_v61  ;;  %v4438_v3 = vpack.c.bf16 %v1451_v57, %v1449_v62  ;;  %v1382_v5 = vmul.f32 %v1049_v63, %v857_v59  ;;  %v1383_v6 = vmul.f32 %v1049_v63, %v858_v60  ;;  %v866_v59 = vld [vmem:[%s4211_s25 + $0x118] sm:$0xff]  ;;  %v863_v63 = vld [vmem:[%s4211_s25 + $0x100] sm:$0xff] }
  0xfc   : > { %v1044_v7 = vpop.permute.xlu0 %1043 }
  0xfd   : > { %v1380_v12 = vmul.f32 %v1044_v7, %v855_v0  ;;  %v1381_v13 = vmul.f32 %v1044_v7, %v856_v1  ;;  %2044 = vmatprep.subr.bf16.mxu0 %v4438_v3  ;;  %v864_v0 = vld [vmem:[%s4211_s25 + $0x108] sm:$0xff] }
  0xfe   : > { %2045 = vmatpush1.bf16.msra.mxu0 %v4436_v2  ;;  %v1229_v16 = vpop.permute.xlu1 %1228 }
  0xff   : > { %v1518_v19 = vpack.c.bf16 %v1382_v5, %v1380_v12  ;;  %v1519_v20 = vpack.c.bf16 %v1383_v6, %v1381_v13  ;;  %v1454_v21 = vmul.f32 %v1229_v16, %v929_v10  ;;  %v1455_v24 = vmul.f32 %v1229_v16, %v930_v11  ;;  %v937_v11 = vld [vmem:[%s4211_s25 + $0x350] sm:$0xff]  ;;  %v938_v12 = vld [vmem:[%s4211_s25 + $0x358] sm:$0xff] }
 0x100   : > { %v1224_v25 = vpop.permute.xlu0 %1223 }
 0x101   : > { %v1452_v28 = vmul.f32 %v1224_v25, %v927_v17  ;;  %v1453_v29 = vmul.f32 %v1224_v25, %v928_v18  ;;  %1881 = vmatprep.subr.bf16.mxu1 %v1519_v20  ;;  %v935_v18 = vld [vmem:[%s4211_s25 + $0x340] sm:$0xff] }
 0x102   : > { %1882 = vmatpush1.bf16.msra.mxu1 %v1518_v19  ;;  %v1059_v31 = vpop.permute.xlu1 %1058  ;;  %v936_v19 = vld [vmem:[%s4211_s25 + $0x348] sm:$0xff] }
 0x103   : > { %v4450_v34 = vpack.c.bf16 %v1454_v21, %v1452_v28  ;;  %v4452_v35 = vpack.c.bf16 %v1455_v24, %v1453_v29  ;;  %v1386_v36 = vmul.f32 %v1059_v31, %v861_v26  ;;  %v1387_v39 = vmul.f32 %v1059_v31, %v862_v27  ;;  %v869_v27 = vld [vmem:[%s4211_s25 + $0x130] sm:$0xff]  ;;  %v870_v28 = vld [vmem:[%s4211_s25 + $0x138] sm:$0xff] }
 0x104   : > { %v1054_v40 = vpop.permute.xlu0 %1053 }
 0x105   : > { %v1384_v43 = vmul.f32 %v1054_v40, %v859_v32  ;;  %v1385_v47 = vmul.f32 %v1054_v40, %v860_v33  ;;  %2046 = vmatprep.subr.bf16.mxu0 %v4452_v35  ;;  %v867_v33 = vld [vmem:[%s4211_s25 + $0x120] sm:$0xff] }
 0x106   : > { %2047 = vmatpush1.bf16.msra.mxu0 %v4450_v34  ;;  %v1239_v48 = vpop.permute.xlu1 %1238 }
 0x107   : > { %v1520_v51 = vpack.c.bf16 %v1386_v36, %v1384_v43  ;;  %v1521_v52 = vpack.c.bf16 %v1387_v39, %v1385_v47  ;;  %v1458_v53 = vmul.f32 %v1239_v48, %v933_v41  ;;  %v1459_v56 = vmul.f32 %v1239_v48, %v934_v42  ;;  %v868_v36 = vld [vmem:[%s4211_s25 + $0x128] sm:$0xff]  ;;  %v941_v47 = vld [vmem:[%s4211_s25 + $0x370] sm:$0xff]  ;;  %v942_v48 = vld [vmem:[%s4211_s25 + $0x378] sm:$0xff] }
 0x108   : > { %v1234_v57 = vpop.permute.xlu0 %1233 }
 0x109   : > { %v1456_v60 = vmul.f32 %v1234_v57, %v931_v49  ;;  %v1457_v61 = vmul.f32 %v1234_v57, %v932_v50  ;;  %1883 = vmatprep.subr.bf16.mxu1 %v1521_v52  ;;  %v939_v52 = vld [vmem:[%s4211_s25 + $0x360] sm:$0xff] }
 0x10a   : > { %1884 = vmatpush1.bf16.msra.mxu1 %v1520_v51  ;;  %v1069_v62 = vpop.permute.xlu1 %1068 }
 0x10b   : > { %v4464_v1 = vpack.c.bf16 %v1458_v53, %v1456_v60  ;;  %v4466_v5 = vpack.c.bf16 %v1459_v56, %v1457_v61  ;;  %v1390_v6 = vmul.f32 %v1069_v62, %v865_v58  ;;  %v1391_v7 = vmul.f32 %v1069_v62, %v866_v59  ;;  %v940_v53 = vld [vmem:[%s4211_s25 + $0x368] sm:$0xff]  ;;  %v873_v61 = vld [vmem:[%s4211_s25 + $0x150] sm:$0xff]  ;;  %v874_v62 = vld [vmem:[%s4211_s25 + $0x158] sm:$0xff] }
 0x10c   : > { %v1064_v10 = vpop.permute.xlu0 %1063 }
 0x10d   : > { %v1388_v13 = vmul.f32 %v1064_v10, %v863_v63  ;;  %v1389_v16 = vmul.f32 %v1064_v10, %v864_v0  ;;  %2048 = vmatprep.subr.bf16.mxu0 %v4466_v5  ;;  %v872_v10 = vld [vmem:[%s4211_s25 + $0x148] sm:$0xff] }
 0x10e   : > { %2049 = vmatpush1.bf16.msra.mxu0 %v4464_v1  ;;  %v1249_v17 = vpop.permute.xlu1 %1248 }
 0x10f   : > { %v1522_v20 = vpack.c.bf16 %v1390_v6, %v1388_v13  ;;  %v1523_v21 = vpack.c.bf16 %v1391_v7, %v1389_v16  ;;  %v1462_v24 = vmul.f32 %v1249_v17, %v937_v11  ;;  %v1463_v25 = vmul.f32 %v1249_v17, %v938_v12  ;;  %v871_v7 = vld [vmem:[%s4211_s25 + $0x140] sm:$0xff] }
 0x110   : > { %v1244_v26 = vpop.permute.xlu0 %1243 }
 0x111   : > { %v1460_v29 = vmul.f32 %v1244_v26, %v935_v18  ;;  %v1461_v31 = vmul.f32 %v1244_v26, %v936_v19  ;;  %1885 = vmatprep.subr.bf16.mxu1 %v1523_v21  ;;  %v945_v18 = vld [vmem:[%s4211_s25 + $0x390] sm:$0xff]  ;;  %v946_v19 = vld [vmem:[%s4211_s25 + $0x398] sm:$0xff]  ;;  %v944_v26 = vld [vmem:[%s4211_s25 + $0x388] sm:$0xff] }
 0x112   : > { %1886 = vmatpush1.bf16.msra.mxu1 %v1522_v20  ;;  %v1079_v32 = vpop.permute.xlu1 %1078 }
 0x113   : > { %v4478_v39 = vpack.c.bf16 %v1462_v24, %v1460_v29  ;;  %v4480_v40 = vpack.c.bf16 %v1463_v25, %v1461_v31  ;;  %v1394_v41 = vmul.f32 %v1079_v32, %v869_v27  ;;  %v1395_v42 = vmul.f32 %v1079_v32, %v870_v28  ;;  %v943_v25 = vld [vmem:[%s4211_s25 + $0x380] sm:$0xff] }
 0x114   : > { %v1074_v43 = vpop.permute.xlu0 %1073 }
 0x115   : > { %v1392_v49 = vmul.f32 %v1074_v43, %v867_v33  ;;  %v1393_v50 = vmul.f32 %v1074_v43, %v868_v36  ;;  %2050 = vmatprep.subr.bf16.mxu0 %v4480_v40  ;;  %v877_v33 = vld [vmem:[%s4211_s25 + $0x170] sm:$0xff]  ;;  %v878_v36 = vld [vmem:[%s4211_s25 + $0x178] sm:$0xff] }
 0x116   : > { %2051 = vmatpush1.bf16.msra.mxu0 %v4478_v39  ;;  %v1259_v51 = vpop.permute.xlu1 %1258 }
 0x117   : > { %v1524_v56 = vpack.c.bf16 %v1394_v41, %v1392_v49  ;;  %v1525_v57 = vpack.c.bf16 %v1395_v42, %v1393_v50  ;;  %v1466_v58 = vmul.f32 %v1259_v51, %v941_v47  ;;  %v1467_v59 = vmul.f32 %v1259_v51, %v942_v48  ;;  %v875_v47 = vld [vmem:[%s4211_s25 + $0x160] sm:$0xff]  ;;  %v876_v48 = vld [vmem:[%s4211_s25 + $0x168] sm:$0xff] }
 0x118   : > { %v1254_v60 = vpop.permute.xlu0 %1253 }
 0x119   : > { %v1464_v63 = vmul.f32 %v1254_v60, %v939_v52  ;;  %v1465_v0 = vmul.f32 %v1254_v60, %v940_v53  ;;  %1887 = vmatprep.subr.bf16.mxu1 %v1525_v57  ;;  %v950_v57 = vld [vmem:[%s4211_s25 + $0x3b8] sm:$0xff] }
 0x11a   : > { %1888 = vmatpush1.bf16.msra.mxu1 %v1524_v56  ;;  %v1089_v6 = vpop.permute.xlu1 %1088  ;;  %v949_v56 = vld [vmem:[%s4211_s25 + $0x3b0] sm:$0xff] }
 0x11b   : > { %v4492_v11 = vpack.c.bf16 %v1466_v58, %v1464_v63  ;;  %v4494_v12 = vpack.c.bf16 %v1467_v59, %v1465_v0  ;;  %v1398_v13 = vmul.f32 %v1089_v6, %v873_v61  ;;  %v1399_v16 = vmul.f32 %v1089_v6, %v874_v62  ;;  %v947_v61 = vld [vmem:[%s4211_s25 + $0x3a0] sm:$0xff]  ;;  %v948_v62 = vld [vmem:[%s4211_s25 + $0x3a8] sm:$0xff] }
 0x11c   : > { %v1084_v17 = vpop.permute.xlu0 %1083 }
 0x11d   : > { %v1396_v20 = vmul.f32 %v1084_v17, %v871_v7  ;;  %v1397_v21 = vmul.f32 %v1084_v17, %v872_v10  ;;  %2052 = vmatprep.subr.bf16.mxu0 %v4494_v12 }
 0x11e   : > { %2053 = vmatpush1.bf16.msra.mxu0 %v4492_v11  ;;  %v1269_v24 = vpop.permute.xlu1 %1268 }
 0x11f   : > { %v1526_v27 = vpack.c.bf16 %v1398_v13, %v1396_v20  ;;  %v1527_v28 = vpack.c.bf16 %v1399_v16, %v1397_v21  ;;  %v1470_v29 = vmul.f32 %v1269_v24, %v945_v18  ;;  %v1471_v31 = vmul.f32 %v1269_v24, %v946_v19  ;;  %v881_v13 = vld [vmem:[%s4211_s25 + $0x190] sm:$0xff]  ;;  %v882_v16 = vld [vmem:[%s4211_s25 + $0x198] sm:$0xff]  ;;  %v879_v20 = vld [vmem:[%s4211_s25 + $0x180] sm:$0xff] }
 0x120   : > { %v1264_v32 = vpop.permute.xlu0 %1263  ;;  %v880_v21 = vld [vmem:[%s4211_s25 + $0x188] sm:$0xff] }
 0x121   : > { %v1468_v41 = vmul.f32 %v1264_v32, %v943_v25  ;;  %v1469_v42 = vmul.f32 %v1264_v32, %v944_v26  ;;  %1889 = vmatprep.subr.bf16.mxu1 %v1527_v28 }
 0x122   : > { %1890 = vmatpush1.bf16.msra.mxu1 %v1526_v27  ;;  %v1099_v43 = vpop.permute.xlu1 %1098 }
 0x123   : > { %v4506_v49 = vpack.c.bf16 %v1470_v29, %v1468_v41  ;;  %v4508_v50 = vpack.c.bf16 %v1471_v31, %v1469_v42  ;;  %v1402_v51 = vmul.f32 %v1099_v43, %v877_v33  ;;  %v1403_v52 = vmul.f32 %v1099_v43, %v878_v36  ;;  %v953_v29 = vld [vmem:[%s4211_s25 + $0x3d0] sm:$0xff]  ;;  %v954_v31 = vld [vmem:[%s4211_s25 + $0x3d8] sm:$0xff]  ;;  %v951_v41 = vld [vmem:[%s4211_s25 + $0x3c0] sm:$0xff] }
 0x124   : > { %v1094_v53 = vpop.permute.xlu0 %1093  ;;  %v952_v42 = vld [vmem:[%s4211_s25 + $0x3c8] sm:$0xff] }
 0x125   : > { %v1400_v58 = vmul.f32 %v1094_v53, %v875_v47  ;;  %v1401_v59 = vmul.f32 %v1094_v53, %v876_v48  ;;  %2054 = vmatprep.subr.bf16.mxu0 %v4508_v50  ;;  %v885_v53 = vld [vmem:[%s4211_s25 + $0x1b0] sm:$0xff] }
 0x126   : > { %2055 = vmatpush1.bf16.msra.mxu0 %v4506_v49  ;;  %v1279_v60 = vpop.permute.xlu1 %1278 }
 0x127   : > { %v1528_v63 = vpack.c.bf16 %v1402_v51, %v1400_v58  ;;  %v1529_v0 = vpack.c.bf16 %v1403_v52, %v1401_v59  ;;  %v1474_v6 = vmul.f32 %v1279_v60, %v949_v56  ;;  %v1475_v7 = vmul.f32 %v1279_v60, %v950_v57  ;;  %v886_v56 = vld [vmem:[%s4211_s25 + $0x1b8] sm:$0xff]  ;;  %v883_v60 = vld [vmem:[%s4211_s25 + $0x1a0] sm:$0xff] }
 0x128   : > { %v1274_v10 = vpop.permute.xlu0 %1273 }
 0x129   : > { %v1472_v17 = vmul.f32 %v1274_v10, %v947_v61  ;;  %v1473_v18 = vmul.f32 %v1274_v10, %v948_v62  ;;  %1891 = vmatprep.subr.bf16.mxu1 %v1529_v0  ;;  %v884_v61 = vld [vmem:[%s4211_s25 + $0x1a8] sm:$0xff]  ;;  %v957_v10 = vld [vmem:[%s4211_s25 + $0x3f0] sm:$0xff] }
 0x12a   : > { %1892 = vmatpush1.bf16.msra.mxu1 %v1528_v63  ;;  %v1109_v19 = vpop.permute.xlu1 %1108 }
 0x12b   : > { %v4520_v24 = vpack.c.bf16 %v1474_v6, %v1472_v17  ;;  %v4522_v25 = vpack.c.bf16 %v1475_v7, %v1473_v18  ;;  %v1406_v26 = vmul.f32 %v1109_v19, %v881_v13  ;;  %v1407_v27 = vmul.f32 %v1109_v19, %v882_v16  ;;  %v958_v13 = vld [vmem:[%s4211_s25 + $0x3f8] sm:$0xff]  ;;  %v955_v19 = vld [vmem:[%s4211_s25 + $0x3e0] sm:$0xff] }
 0x12c   : > { %v1104_v28 = vpop.permute.xlu0 %1103 }
 0x12d   : > { %v1404_v32 = vmul.f32 %v1104_v28, %v879_v20  ;;  %v1405_v33 = vmul.f32 %v1104_v28, %v880_v21  ;;  %2056 = vmatprep.subr.bf16.mxu0 %v4522_v25  ;;  %v956_v20 = vld [vmem:[%s4211_s25 + $0x3e8] sm:$0xff] }
 0x12e   : > { %2057 = vmatpush1.bf16.msra.mxu0 %v4520_v24  ;;  %v1289_v36 = vpop.permute.xlu1 %1288 }
 0x12f   : > { %v1530_v43 = vpack.c.bf16 %v1406_v26, %v1404_v32  ;;  %v1531_v47 = vpack.c.bf16 %v1407_v27, %v1405_v33  ;;  %v1478_v48 = vmul.f32 %v1289_v36, %v953_v29  ;;  %v1479_v51 = vmul.f32 %v1289_v36, %v954_v31  ;;  %v889_v31 = vld [vmem:[%s4211_s25 + $0x1d0] sm:$0xff]  ;;  %v890_v32 = vld [vmem:[%s4211_s25 + $0x1d8] sm:$0xff] }
 0x130   : > { %v1284_v52 = vpop.permute.xlu0 %1283 }
 0x131   : > { %v1476_v57 = vmul.f32 %v1284_v52, %v951_v41  ;;  %v1477_v58 = vmul.f32 %v1284_v52, %v952_v42  ;;  %1893 = vmatprep.subr.bf16.mxu1 %v1531_v47  ;;  %v887_v41 = vld [vmem:[%s4211_s25 + $0x1c0] sm:$0xff]  ;;  %v1584_v47 = vld [vmem:[%s4221_s7 + $0x10] sm:$0xff] }
 0x132   : > { %1894 = vmatpush1.bf16.msra.mxu1 %v1530_v43  ;;  %v1119_v59 = vpop.permute.xlu1 %1118  ;;  %v888_v43 = vld [vmem:[%s4211_s25 + $0x1c8] sm:$0xff] }
 0x133   : > { %v4534_v62 = vpack.c.bf16 %v1478_v48, %v1476_v57  ;;  %v4536_v63 = vpack.c.bf16 %v1479_v51, %v1477_v58  ;;  %v1410_v0 = vmul.f32 %v1119_v59, %v885_v53  ;;  %v1411_v6 = vmul.f32 %v1119_v59, %v886_v56  ;;  %v1589_v48 = vld [vmem:[%s4221_s7 + $0x38] sm:$0xff]  ;;  %v1595_v57 = vld [vmem:[%s4221_s7 + $0x68] sm:$0xff]  ;;  %v1600_v58 = vld [vmem:[%s4221_s7 + $0x90] sm:$0xff] }
 0x134   : > { %v1114_v7 = vpop.permute.xlu0 %1113 }
 0x135   : > { %v1408_v16 = vmul.f32 %v1114_v7, %v883_v60  ;;  %v1409_v17 = vmul.f32 %v1114_v7, %v884_v61  ;;  %2058 = vmatprep.subr.bf16.mxu0 %v4536_v63  ;;  %v893_v60 = vld [vmem:[%s4211_s25 + $0x1f0] sm:$0xff]  ;;  %v894_v61 = vld [vmem:[%s4211_s25 + $0x1f8] sm:$0xff]  ;;  %v1709_v7 = vpack.c.bf16 %v1589_v48, %v1584_v47  ;;  %v1599_v47 = vld [vmem:[%s4221_s7 + $0x88] sm:$0xff] }
 0x136   : > { %2059 = vmatpush1.bf16.msra.mxu0 %v4534_v62  ;;  %v1299_v18 = vpop.permute.xlu1 %1298 }
 0x137   : > { %v1532_v21 = vpack.c.bf16 %v1410_v0, %v1408_v16  ;;  %v1533_v26 = vpack.c.bf16 %v1411_v6, %v1409_v17  ;;  %v1482_v27 = vmul.f32 %v1299_v18, %v957_v10  ;;  %v1483_v28 = vmul.f32 %v1299_v18, %v958_v13  ;;  %v891_v13 = vld [vmem:[%s4211_s25 + $0x1e0] sm:$0xff]  ;;  %v892_v16 = vld [vmem:[%s4211_s25 + $0x1e8] sm:$0xff] }
 0x138   : > { %v1294_v29 = vpop.permute.xlu0 %1293  ;;  %v1715_v17 = vpack.c.bf16 %v1600_v58, %v1595_v57 }
 0x139   : > { %v1480_v33 = vmul.f32 %v1294_v29, %v955_v19  ;;  %v1481_v36 = vmul.f32 %v1294_v29, %v956_v20  ;;  %1895 = vmatprep.subr.bf16.mxu1 %v1533_v26 }
 0x13a   : > { %1896 = vmatpush1.bf16.msra.mxu1 %v1532_v21  ;;  %v1129_v42 = vpop.permute.xlu1 %1128 }
 0x13b   : > { %v4550_v51 = vpack.c.bf16 %v1482_v27, %v1480_v33  ;;  %v4552_v52 = vpack.c.bf16 %v1483_v28, %v1481_v36  ;;  %v1414_v53 = vmul.f32 %v1129_v42, %v889_v31  ;;  %v1415_v56 = vmul.f32 %v1129_v42, %v890_v32  ;;  %v961_v27 = vld [vmem:[%s4211_s25 + $0x410] sm:$0xff]  ;;  %v962_v28 = vld [vmem:[%s4211_s25 + $0x418] sm:$0xff]  ;;  %v959_v32 = vld [vmem:[%s4211_s25 + $0x400] sm:$0xff] }
 0x13c   : > { %v1124_v59 = vpop.permute.xlu0 %1123  ;;  %v960_v33 = vld [vmem:[%s4211_s25 + $0x408] sm:$0xff]  ;;  %v1582_v36 = vld [vmem:[%s4221_s7] sm:$0xff] }
 0x13d   : > { %v1412_v0 = vmul.f32 %v1124_v59, %v887_v41  ;;  %v1413_v6 = vmul.f32 %v1124_v59, %v888_v43  ;;  %2060 = vmatprep.subr.bf16.mxu0 %v4552_v52  ;;  %v1587_v42 = vld [vmem:[%s4221_s7 + $0x28] sm:$0xff]  ;;  %v1594_v43 = vld [vmem:[%s4221_s7 + $0x60] sm:$0xff]  ;;  %v965_v59 = vld [vmem:[%s4211_s25 + $0x430] sm:$0xff] }
 0x13e   : > { %2061 = vmatpush1.bf16.msra.mxu0 %v4550_v51  ;;  %v1139_v10 = vpop.permute.xlu1 %1138 }
 0x13f   : > { %v1534_v18 = vpack.c.bf16 %v1414_v53, %v1412_v0  ;;  %v1535_v19 = vpack.c.bf16 %v1415_v56, %v1413_v6  ;;  %v1418_v20 = vmul.f32 %v1139_v10, %v893_v60  ;;  %v1419_v21 = vmul.f32 %v1139_v10, %v894_v61  ;;  %v966_v60 = vld [vmem:[%s4211_s25 + $0x438] sm:$0xff] }
 0x140   : > { %v1134_v26 = vpop.permute.xlu0 %1133  ;;  %v1593_v61 = vld [vmem:[%s4221_s7 + $0x58] sm:$0xff]  ;;  %v1714_v10 = vpack.c.bf16 %v1599_v47, %v1594_v43  ;;  %v967_v43 = vld [vmem:[%s4211_s25 + $0x440] sm:$0xff]  ;;  %v968_v47 = vld [vmem:[%s4211_s25 + $0x448] sm:$0xff] }
 0x141   : > { %v1416_v29 = vmul.f32 %v1134_v26, %v891_v13  ;;  %v1417_v31 = vmul.f32 %v1134_v26, %v892_v16  ;;  %1897 = vmatprep.subr.bf16.mxu1 %v1535_v19  ;;  %2063 = vmatmul.mubr.bf16.vlgmr.msra.gmra.mrb[0].mxu0 %v1709_v7  ;;  %v1707_v7 = vpack.c.bf16 %v1587_v42, %v1582_v36  ;;  %v1598_v13 = vld [vmem:[%s4221_s7 + $0x80] sm:$0xff]  ;;  %v1605_v16 = vld [vmem:[%s4221_s7 + $0xb8] sm:$0xff] }
 0x142   : > { %1898 = vmatpush1.bf16.msra.mxu1 %v1534_v18  ;;  %v1309_v41 = vpop.permute.xlu1 %1308  ;;  %2072 = vmatprep.mubr.bf16.mxu0 %v1715_v17  ;;  %v1610_v17 = vld [vmem:[%s4221_s7 + $0xe0] sm:$0xff] }
 0x143   : > { %v1536_v48 = vpack.c.bf16 %v1418_v20, %v1416_v29  ;;  %v1537_v53 = vpack.c.bf16 %v1419_v21, %v1417_v31  ;;  %v1486_v56 = vmul.f32 %v1309_v41, %v961_v27  ;;  %v1487_v57 = vmul.f32 %v1309_v41, %v962_v28  ;;  %v963_v19 = vld [vmem:[%s4211_s25 + $0x420] sm:$0xff]  ;;  %v964_v20 = vld [vmem:[%s4211_s25 + $0x428] sm:$0xff]  ;;  %v969_v31 = vld [vmem:[%s4211_s25 + $0x450] sm:$0xff] }
 0x144   : > { %v1304_v58 = vpop.permute.xlu0 %1303  ;;  %v1720_v36 = vpack.c.bf16 %v1610_v17, %v1605_v16 }
 0x145   : > { %v1484_v0 = vmul.f32 %v1304_v58, %v959_v32  ;;  %v1485_v6 = vmul.f32 %v1304_v58, %v960_v33  ;;  %1899 = vmatprep.subr.bf16.mxu1 %v1537_v53  ;;  %v970_v32 = vld [vmem:[%s4211_s25 + $0x458] sm:$0xff]  ;;  %v1713_v33 = vpack.c.bf16 %v1598_v13, %v1593_v61 }
 0x146   : > { %1900 = vmatpush1.bf16.msra.mxu1 %v1536_v48  ;;  %v1319_v18 = vpop.permute.xlu1 %1318  ;;  %v1592_v48 = vld [vmem:[%s4221_s7 + $0x50] sm:$0xff]  ;;  %v1597_v53 = vld [vmem:[%s4221_s7 + $0x78] sm:$0xff] }
 0x147   : > { %v1570_v21 = vpack.c.bf16 %v1486_v56, %v1484_v0  ;;  %v1571_v26 = vpack.c.bf16 %v1487_v57, %v1485_v6  ;;  %3609 = vmatprep.subr.bf16.mxu1 %v4344_v22  ;;  %v1490_v27 = vmul.f32 %v1319_v18, %v965_v59  ;;  %v1491_v28 = vmul.f32 %v1319_v18, %v966_v60  ;;  %v1604_v56 = vld [vmem:[%s4221_s7 + $0xb0] sm:$0xff]  ;;  %v1609_v57 = vld [vmem:[%s4221_s7 + $0xd8] sm:$0xff] }
 0x148   : > { %v1314_v29 = vpop.permute.xlu0 %1313  ;;  %v973_v6 = vld [vmem:[%s4211_s25 + $0x470] sm:$0xff]  ;;  %v1712_v16 = vpack.c.bf16 %v1597_v53, %v1592_v48  ;;  %v1719_v17 = vpack.c.bf16 %v1609_v57, %v1604_v56  ;;  %v976_v48 = vld [vmem:[%s4211_s25 + $0x488] sm:$0xff]  ;;  %v1614_v56 = vld [vmem:[%s4221_s7 + $0x100] sm:$0xff] }
 0x149   : > { %v1488_v41 = vmul.f32 %v1314_v29, %v963_v19  ;;  %v1489_v42 = vmul.f32 %v1314_v29, %v964_v20  ;;  %1902 = vmatmul.mubr.bf16.vlgmr.msra.gmra.mrb[0].mxu1 %v1707_v7  ;;  %2073 = vmatmul.mubr.bf16.gmra.mrb[4].mxu0 %v1714_v10  ;;  %v1603_v7 = vld [vmem:[%s4221_s7 + $0xa8] sm:$0xff]  ;;  %v1608_v18 = vld [vmem:[%s4221_s7 + $0xd0] sm:$0xff] }
 0x14a   : > { %2191 = vmatprep.subr.bf16.mxu0 %v1571_v26  ;;  %3625 = vmatpush1.bf16.msra.mxu1 %v4346_v23  ;;  %v1329_v22 = vpop.permute.xlu1 %1328  ;;  %v974_v23 = vld [vmem:[%s4211_s25 + $0x478] sm:$0xff]  ;;  %v1620_v19 = vld [vmem:[%s4221_s7 + $0x130] sm:$0xff]  ;;  %v972_v26 = vld [vmem:[%s4211_s25 + $0x468] sm:$0xff] }
 0x14b   : > { %v1572_v58 = vpack.c.bf16 %v1490_v27, %v1488_v41  ;;  %v1573_v59 = vpack.c.bf16 %v1491_v28, %v1489_v42  ;;  %2192 = vmatpush1.bf16.msra.mxu0 %v1570_v21  ;;  %3610 = vmatprep.subr.bf16.mxu1 %v4349_v30  ;;  %v1494_v60 = vmul.f32 %v1329_v22, %v969_v31  ;;  %v1615_v30 = vld [vmem:[%s4221_s7 + $0x108] sm:$0xff]  ;;  %v971_v21 = vld [vmem:[%s4211_s25 + $0x460] sm:$0xff] }
 0x14c   : > { %v1495_v61 = vmul.f32 %v1329_v22, %v970_v32  ;;  %v1324_v0 = vpop.permute.xlu0 %1323  ;;  %1911 = vmatprep.mubr.bf16.mxu1 %v1713_v33  ;;  %2082 = vmatprep.mubr.bf16.mxu0 %v1720_v36  ;;  %v977_v33 = vld [vmem:[%s4211_s25 + $0x490] sm:$0xff]  ;;  %v978_v36 = vld [vmem:[%s4211_s25 + $0x498] sm:$0xff]  ;;  %v1725_v41 = vpack.c.bf16 %v1620_v19, %v1615_v30  ;;  %v1602_v22 = vld [vmem:[%s4221_s7 + $0xa0] sm:$0xff] }
 0x14d   : > { %v1492_v10 = vmul.f32 %v1324_v0, %v967_v43  ;;  %v1493_v13 = vmul.f32 %v1324_v0, %v968_v47  ;;  %2193 = vmatprep.subr.bf16.mxu0 %v1573_v59  ;;  %v975_v47 = vld [vmem:[%s4211_s25 + $0x480] sm:$0xff]  ;;  %v1607_v53 = vld [vmem:[%s4221_s7 + $0xc8] sm:$0xff] }
 0x14e   : > { %3626 = vmatpush1.bf16.msra.mxu1 %v4359_v46  ;;  %v1339_v20 = vpop.permute.xlu1 %1338  ;;  %v1718_v46 = vpack.c.bf16 %v1608_v18, %v1603_v7  ;;  %v1619_v57 = vld [vmem:[%s4221_s7 + $0x128] sm:$0xff]  ;;  %v1717_v7 = vpack.c.bf16 %v1607_v53, %v1602_v22  ;;  %v1622_v22 = vld [vmem:[%s4221_s7 + $0x140] sm:$0xff] }
 0x14f   : > { %v1574_v27 = vpack.c.bf16 %v1494_v60, %v1492_v10  ;;  %v1575_v28 = vpack.c.bf16 %v1495_v61, %v1493_v13  ;;  %2194 = vmatpush1.bf16.msra.mxu0 %v1572_v58  ;;  %3611 = vmatprep.subr.bf16.mxu1 %v4367_v55  ;;  %v1498_v29 = vmul.f32 %v1339_v20, %v973_v6  ;;  %v1618_v13 = vld [vmem:[%s4221_s7 + $0x120] sm:$0xff]  ;;  %v980_v18 = vld [vmem:[%s4211_s25 + $0x4a8] sm:$0xff] }
 0x150   : > { %v1499_v31 = vmul.f32 %v1339_v20, %v974_v23  ;;  %v1334_v32 = vpop.permute.xlu0 %1333  ;;  %v1724_v10 = vpack.c.bf16 %v1619_v57, %v1614_v56  ;;  %v1634_v53 = vld [vmem:[%s4221_s7 + $0x1a0] sm:$0xff]  ;;  %v1639_v56 = vld [vmem:[%s4221_s7 + $0x1c8] sm:$0xff] }
 0x151   : > { %v1496_v42 = vmul.f32 %v1334_v32, %v971_v21  ;;  %v1497_v43 = vmul.f32 %v1334_v32, %v972_v26  ;;  %1912 = vmatmul.mubr.bf16.gmra.mrb[4].mxu1 %v1712_v16  ;;  %2083 = vmatmul.mubr.bf16.gmra.mrb[8].mxu0 %v1719_v17  ;;  %v1625_v16 = vld [vmem:[%s4221_s7 + $0x158] sm:$0xff]  ;;  %v1630_v17 = vld [vmem:[%s4221_s7 + $0x180] sm:$0xff] }
 0x152   : > { %2195 = vmatprep.subr.bf16.mxu0 %v1575_v28  ;;  %3627 = vmatpush1.bf16.msra.mxu1 %v4365_v54  ;;  %v1349_v55 = vpop.permute.xlu1 %1348  ;;  %v1613_v54 = vld [vmem:[%s4221_s7 + $0xf8] sm:$0xff]  ;;  %v1730_v26 = vpack.c.bf16 %v1630_v17, %v1625_v16  ;;  %v1638_v57 = vld [vmem:[%s4221_s7 + $0x1c0] sm:$0xff]  ;;  %v1591_v16 = vld [vmem:[%s4221_s7 + $0x48] sm:$0xff] }
 0x153   : > { %v1576_v58 = vpack.c.bf16 %v1498_v29, %v1496_v42  ;;  %v1577_v59 = vpack.c.bf16 %v1499_v31, %v1497_v43  ;;  %2196 = vmatpush1.bf16.msra.mxu0 %v1574_v27  ;;  %3612 = vmatprep.subr.bf16.mxu1 %v4380_v15  ;;  %v1502_v60 = vmul.f32 %v1349_v55, %v977_v33  ;;  %v979_v15 = vld [vmem:[%s4211_s25 + $0x4a0] sm:$0xff]  ;;  %v1617_v29 = vld [vmem:[%s4221_s7 + $0x118] sm:$0xff]  ;;  %v1624_v31 = vld [vmem:[%s4221_s7 + $0x150] sm:$0xff] }
 0x154   : > { %v1503_v61 = vmul.f32 %v1349_v55, %v978_v36  ;;  %v1344_v0 = vpop.permute.xlu0 %1343  ;;  %1921 = vmatprep.mubr.bf16.mxu1 %v1718_v46  ;;  %2092 = vmatprep.mubr.bf16.mxu0 %v1725_v41  ;;  %v1723_v21 = vpack.c.bf16 %v1618_v13, %v1613_v54  ;;  %v1629_v32 = vld [vmem:[%s4221_s7 + $0x178] sm:$0xff]  ;;  %v1623_v36 = vld [vmem:[%s4221_s7 + $0x148] sm:$0xff]  ;;  %v1628_v46 = vld [vmem:[%s4221_s7 + $0x170] sm:$0xff] }
 0x155   : > { %v1500_v6 = vmul.f32 %v1344_v0, %v975_v47  ;;  %v1501_v23 = vmul.f32 %v1344_v0, %v976_v48  ;;  %2197 = vmatprep.subr.bf16.mxu0 %v1577_v59  ;;  %v1635_v41 = vld [vmem:[%s4221_s7 + $0x1a8] sm:$0xff]  ;;  %v1640_v42 = vld [vmem:[%s4221_s7 + $0x1d0] sm:$0xff]  ;;  %v1729_v47 = vpack.c.bf16 %v1629_v32, %v1624_v31  ;;  %v1637_v0 = vld [vmem:[%s4221_s7 + $0x1b8] sm:$0xff] }
 0x156   : > { %3628 = vmatpush1.bf16.msra.mxu1 %v4378_v14  ;;  %v1612_v14 = vld [vmem:[%s4221_s7 + $0xf0] sm:$0xff]  ;;  %v1735_v48 = vpack.c.bf16 %v1640_v42, %v1635_v41  ;;  %v1627_v55 = vld [vmem:[%s4221_s7 + $0x168] sm:$0xff]  ;;  %v1586_v13 = vld [vmem:[%s4221_s7 + $0x20] sm:$0xff] }
 0x157   : > { %v1578_v30 = vpack.c.bf16 %v1502_v60, %v1500_v6  ;;  %v1579_v19 = vpack.c.bf16 %v1503_v61, %v1501_v23  ;;  %2198 = vmatpush1.bf16.msra.mxu0 %v1576_v58  ;;  %3613 = vmatprep.subr.bf16.mxu1 %v4396_v45  ;;  %v1650_v58 = vld [vmem:[%s4221_s7 + $0x220] sm:$0xff]  ;;  %v1727_v59 = vpack.c.bf16 %v1627_v55, %v1622_v22  ;;  %v1644_v54 = vld [vmem:[%s4221_s7 + $0x1f0] sm:$0xff]  ;;  %v1649_v6 = vld [vmem:[%s4221_s7 + $0x218] sm:$0xff] }
 0x158   : > { %v1354_v20 = vpop.permute.xlu0 %1353  ;;  %v1734_v60 = vpack.c.bf16 %v1639_v56, %v1634_v53  ;;  %v1648_v23 = vld [vmem:[%s4221_s7 + $0x210] sm:$0xff]  ;;  %v1658_v17 = vld [vmem:[%s4221_s7 + $0x260] sm:$0xff] }
 0x159   : > { %v1504_v27 = vmul.f32 %v1354_v20, %v979_v15  ;;  %v1505_v28 = vmul.f32 %v1354_v20, %v980_v18  ;;  %1922 = vmatmul.mubr.bf16.gmra.mrb[8].mxu1 %v1717_v7  ;;  %2093 = vmatmul.mubr.bf16.gmra.mrb[12].mxu0 %v1724_v10  ;;  %v1739_v7 = vpack.c.bf16 %v1649_v6, %v1644_v54  ;;  %v1642_v10 = vld [vmem:[%s4221_s7 + $0x1e0] sm:$0xff]  ;;  %v1657_v18 = vld [vmem:[%s4221_s7 + $0x258] sm:$0xff]  ;;  %v1672_v31 = vld [vmem:[%s4221_s7 + $0x2d0] sm:$0xff] }
 0x15a   : > { %2199 = vmatprep.subr.bf16.mxu0 %v1579_v19  ;;  %3629 = vmatpush1.bf16.msra.mxu1 %v4394_v44  ;;  %v1722_v44 = vpack.c.bf16 %v1617_v29, %v1612_v14  ;;  %v1711_v15 = vpack.c.bf16 %v1591_v16, %v1586_v13  ;;  %v1601_v19 = vld [vmem:[%s4221_s7 + $0x98] sm:$0xff]  ;;  %v1616_v32 = vld [vmem:[%s4221_s7 + $0x110] sm:$0xff]  ;;  %v1682_v42 = vld [vmem:[%s4221_s7 + $0x320] sm:$0xff] }
 0x15b   : > { %v1580_v45 = vpack.c.bf16 %v1504_v27, %v1504_v27  ;;  %v1581_v33 = vpack.c.bf16 %v1505_v28, %v1505_v28  ;;  %2200 = vmatpush1.bf16.msra.mxu0 %v1578_v30  ;;  %3614 = vmatprep.subr.bf16.mxu1 %v4410_v9  ;;  %v1728_v9 = vpack.c.bf16 %v1628_v46, %v1623_v36  ;;  %v1596_v30 = vld [vmem:[%s4221_s7 + $0x70] sm:$0xff]  ;;  %v1606_v27 = vld [vmem:[%s4221_s7 + $0xc0] sm:$0xff]  ;;  %v1611_v28 = vld [vmem:[%s4221_s7 + $0xe8] sm:$0xff] }
 0x15c   : > { %1931 = vmatprep.mubr.bf16.mxu1 %v1723_v21  ;;  %2102 = vmatprep.mubr.bf16.mxu0 %v1730_v26  ;;  %v1716_v21 = vpack.c.bf16 %v1601_v19, %v1596_v30  ;;  %v1662_v26 = vld [vmem:[%s4221_s7 + $0x280] sm:$0xff]  ;;  %v1721_v29 = vpack.c.bf16 %v1611_v28, %v1606_v27  ;;  %v1688_v36 = vld [vmem:[%s4221_s7 + $0x350] sm:$0xff]  ;;  %v1655_v54 = vld [vmem:[%s4221_s7 + $0x248] sm:$0xff] }
 0x15d   : > { %v1864_v43 = vsel %vm1862_vm1, %v1580_v45, 0  ;;  %3592 = vmatprep.subr.msk.bf16.mxu0 %vm1862_vm1, %v1581_v33  ;;  %v1621_v45 = vld [vmem:[%s4221_s7 + $0x138] sm:$0xff]  ;;  %v1683_v33 = vld [vmem:[%s4221_s7 + $0x328] sm:$0xff]  ;;  %v1692_v56 = vld [vmem:[%s4221_s7 + $0x370] sm:$0xff] }
 0x15e   : > { %3630 = vmatpush1.bf16.msra.mxu1 %v4408_v8  ;;  %v1633_v8 = vld [vmem:[%s4221_s7 + $0x198] sm:$0xff]  ;;  %v1726_v46 = vpack.c.bf16 %v1621_v45, %v1616_v32  ;;  %v1758_v41 = vpack.c.bf16 %v1688_v36, %v1683_v33  ;;  %v1660_v6 = vld [vmem:[%s4221_s7 + $0x270] sm:$0xff]  ;;  %v1670_v16 = vld [vmem:[%s4221_s7 + $0x2c0] sm:$0xff] }
 0x15f   : > { %2202 = vmatpush1.bf16.msra.mxu0 %v1864_v43  ;;  %3615 = vmatprep.subr.bf16.mxu1 %v4424_v38  ;;  %v1645_v38 = vld [vmem:[%s4221_s7 + $0x1f8] sm:$0xff]  ;;  %v1687_v43 = vld [vmem:[%s4221_s7 + $0x348] sm:$0xff]  ;;  %v1680_v19 = vld [vmem:[%s4221_s7 + $0x310] sm:$0xff] }
 0x160   : > { %v1740_v61 = vpack.c.bf16 %v1650_v58, %v1645_v38  ;;  %v1757_v22 = vpack.c.bf16 %v1687_v43, %v1682_v42  ;;  %v1641_v38 = vld [vmem:[%s4221_s7 + $0x1d8] sm:$0xff]  ;;  %v1703_v58 = vld [vmem:[%s4221_s7 + $0x3c8] sm:$0xff]  ;;  %v1690_v28 = vld [vmem:[%s4221_s7 + $0x360] sm:$0xff] }
 0x161   : > { %1932 = vmatmul.mubr.bf16.gmra.mrb[12].mxu1 %v1722_v44  ;;  %2103 = vmatmul.mubr.bf16.gmra.mrb[16].mxu0 %v1729_v47  ;;  %v1626_v44 = vld [vmem:[%s4221_s7 + $0x160] sm:$0xff]  ;;  %v1631_v47 = vld [vmem:[%s4221_s7 + $0x188] sm:$0xff]  ;;  %v1665_v13 = vld [vmem:[%s4221_s7 + $0x298] sm:$0xff] }
 0x162   : > { %3631 = vmatpush1.bf16.msra.mxu1 %v4422_v37  ;;  %1941 = vmatprep.mubr.bf16.mxu1 %v1728_v9  ;;  %v1733_v37 = vpack.c.bf16 %v1638_v57, %v1633_v8  ;;  %v1693_v9 = vld [vmem:[%s4221_s7 + $0x378] sm:$0xff]  ;;  %v1731_v55 = vpack.c.bf16 %v1631_v47, %v1626_v44  ;;  %v1636_v57 = vld [vmem:[%s4221_s7 + $0x1b0] sm:$0xff]  ;;  %v1675_v30 = vld [vmem:[%s4221_s7 + $0x2e8] sm:$0xff] }
 0x163   : > { %3616 = vmatprep.subr.bf16.mxu1 %v4438_v3  ;;  %2112 = vmatprep.mubr.bf16.mxu0 %v1735_v48  ;;  %v1632_v3 = vld [vmem:[%s4221_s7 + $0x190] sm:$0xff]  ;;  %v1698_v48 = vld [vmem:[%s4221_s7 + $0x3a0] sm:$0xff]  ;;  %v1697_v8 = vld [vmem:[%s4221_s7 + $0x398] sm:$0xff] }
 0x164   : > { %v1763_v53 = vpack.c.bf16 %v1698_v48, %v1693_v9  ;;  %v1685_v27 = vld [vmem:[%s4221_s7 + $0x338] sm:$0xff]  ;;  %v1695_v32 = vld [vmem:[%s4221_s7 + $0x388] sm:$0xff]  ;;  %v1700_v45 = vld [vmem:[%s4221_s7 + $0x3b0] sm:$0xff] }
 0x165   : > { %v1696_v42 = vld [vmem:[%s4221_s7 + $0x390] sm:$0xff]  ;;  %v1701_v43 = vld [vmem:[%s4221_s7 + $0x3b8] sm:$0xff] }
 0x166   : > { %3632 = vmatpush1.bf16.msra.mxu1 %v4436_v2  ;;  %v1643_v2 = vld [vmem:[%s4221_s7 + $0x1e8] sm:$0xff]  ;;  %v1705_v44 = vld [vmem:[%s4221_s7 + $0x3d8] sm:$0xff]  ;;  %v1766_v9 = vpack.c.bf16 %v1701_v43, %v1696_v42 }
 0x167   : > { %3617 = vmatprep.subr.bf16.mxu1 %v4452_v35  ;;  %v1732_v35 = vpack.c.bf16 %v1637_v0, %v1632_v3  ;;  %v1646_v3 = vld [vmem:[%s4221_s7 + $0x200] sm:$0xff]  ;;  %v1651_v0 = vld [vmem:[%s4221_s7 + $0x228] sm:$0xff]  ;;  %v1770_v48 = vpack.c.bf16 %v1705_v44, %v1705_v44  ;;  %v1779_v42 = vld [vmem:[#allocation2 + $0x38] sm:$0xff] }
 0x169   : > { %1942 = vmatmul.mubr.bf16.gmra.mrb[16].mxu1 %v1727_v59  ;;  %2113 = vmatmul.mubr.bf16.gmra.mrb[20].mxu0 %v1734_v60  ;;  %v1762_v59 = vpack.c.bf16 %v1697_v8, %v1692_v56  ;;  %v1736_v60 = vpack.c.bf16 %v1641_v38, %v1636_v57 }
 0x16a   : > { %3633 = vmatpush1.bf16.msra.mxu1 %v4450_v34  ;;  %1951 = vmatprep.mubr.bf16.mxu1 %v1733_v37  ;;  %v1738_v34 = vpack.c.bf16 %v1648_v23, %v1643_v2  ;;  %v1768_v37 = vpack.c.bf16 %v1703_v58, %v1703_v58  ;;  %v1741_v23 = vpack.c.bf16 %v1651_v0, %v1646_v3 }
 0x16b   : > { %3618 = vmatprep.subr.bf16.mxu1 %v4466_v5  ;;  %2122 = vmatprep.mubr.bf16.mxu0 %v1740_v61  ;;  %v1647_v5 = vld [vmem:[%s4221_s7 + $0x208] sm:$0xff]  ;;  %v1702_v61 = vld [vmem:[%s4221_s7 + $0x3c0] sm:$0xff] }
 0x16c   : > { %v1767_v2 = vpack.c.bf16 %v1702_v61, %v1702_v61 }
 0x16e   : > { %3634 = vmatpush1.bf16.msra.mxu1 %v4464_v1  ;;  %v1653_v1 = vld [vmem:[%s4221_s7 + $0x238] sm:$0xff] }
 0x16f   : > { %3619 = vmatprep.subr.bf16.mxu1 %v4480_v40  ;;  %v1737_v40 = vpack.c.bf16 %v1647_v5, %v1642_v10  ;;  %v1656_v10 = vld [vmem:[%s4221_s7 + $0x250] sm:$0xff]  ;;  %v1661_v5 = vld [vmem:[%s4221_s7 + $0x278] sm:$0xff] }
 0x171   : > { %1952 = vmatmul.mubr.bf16.gmra.mrb[20].mxu1 %v1732_v35  ;;  %2123 = vmatmul.mubr.bf16.gmra.mrb[24].mxu0 %v1739_v7  ;;  %v1745_v35 = vpack.c.bf16 %v1660_v6, %v1655_v54  ;;  %v1654_v7 = vld [vmem:[%s4221_s7 + $0x240] sm:$0xff] }
 0x172   : > { %3635 = vmatpush1.bf16.msra.mxu1 %v4478_v39  ;;  %1961 = vmatprep.mubr.bf16.mxu1 %v1738_v34  ;;  %v1743_v39 = vpack.c.bf16 %v1658_v17, %v1653_v1  ;;  %v1659_v34 = vld [vmem:[%s4221_s7 + $0x268] sm:$0xff]  ;;  %v1746_v17 = vpack.c.bf16 %v1661_v5, %v1656_v10 }
 0x173   : > { %3620 = vmatprep.subr.bf16.mxu1 %v4494_v12  ;;  %2223 = vmatprep.mubr.bf16.mxu0 %v4164_v4  ;;  %v1652_v12 = vld [vmem:[%s4221_s7 + $0x230] sm:$0xff]  ;;  %v1744_v1 = vpack.c.bf16 %v1659_v34, %v1654_v7 }
 0x174   : > { %v1742_v20 = vpack.c.bf16 %v1657_v18, %v1652_v12  ;;  %v1666_v12 = vld [vmem:[%s4221_s7 + $0x2a0] sm:$0xff]  ;;  %v1671_v18 = vld [vmem:[%s4221_s7 + $0x2c8] sm:$0xff] }
 0x176   : > { %3636 = vmatpush1.bf16.msra.mxu1 %v4492_v11  ;;  %v1663_v11 = vld [vmem:[%s4221_s7 + $0x288] sm:$0xff] }
 0x177   : > { %3621 = vmatprep.subr.bf16.mxu1 %v4508_v50  ;;  %v1668_v50 = vld [vmem:[%s4221_s7 + $0x2b0] sm:$0xff] }
 0x179   : > { %1962 = vmatmul.mubr.bf16.gmra.mrb[24].mxu1 %v1737_v40  ;;  %3593 = vmatmul.mubr.msk.bf16.vlgmr.msra.gmra.mrb[0].mxu0 %vm1822_vm2, %v1711_v15  ;;  %v1750_v40 = vpack.c.bf16 %v1670_v16, %v1665_v13  ;;  %v1664_v15 = vld [vmem:[%s4221_s7 + $0x290] sm:$0xff] }
 0x17a   : > { %3637 = vmatpush1.bf16.msra.mxu1 %v4506_v49  ;;  %1971 = vmatprep.mubr.bf16.mxu1 %v1743_v39  ;;  %v1748_v49 = vpack.c.bf16 %v1668_v50, %v1663_v11  ;;  %v1669_v39 = vld [vmem:[%s4221_s7 + $0x2b8] sm:$0xff]  ;;  %v1751_v50 = vpack.c.bf16 %v1671_v18, %v1666_v12  ;;  %v1773_v18 = vld [vmem:[#allocation2 + $0x8] sm:$0xff] }
 0x17b   : > { %3622 = vmatprep.subr.bf16.mxu1 %v4522_v25  ;;  %2233 = vmatprep.mubr.bf16.mxu0 %v4164_v4  ;;  %v1667_v25 = vld [vmem:[%s4221_s7 + $0x2a8] sm:$0xff]  ;;  %v1749_v11 = vpack.c.bf16 %v1669_v39, %v1664_v15 }
 0x17c   : > { %v1747_v14 = vpack.c.bf16 %v1667_v25, %v1662_v26  ;;  %v1676_v26 = vld [vmem:[%s4221_s7 + $0x2f0] sm:$0xff]  ;;  %v1681_v25 = vld [vmem:[%s4221_s7 + $0x318] sm:$0xff] }
 0x17e   : > { %3638 = vmatpush1.bf16.msra.mxu1 %v4520_v24  ;;  %v1673_v24 = vld [vmem:[%s4221_s7 + $0x2d8] sm:$0xff] }
 0x17f   : > { %3623 = vmatprep.subr.bf16.mxu1 %v4536_v63  ;;  %v1678_v63 = vld [vmem:[%s4221_s7 + $0x300] sm:$0xff] }
 0x181   : > { %1972 = vmatmul.mubr.bf16.gmra.mrb[28].mxu1 %v1742_v20  ;;  %3594 = vmatmul.mubr.msk.bf16.gmra.mrb[4].mxu0 %vm1822_vm2, %v1716_v21  ;;  %v1755_v20 = vpack.c.bf16 %v1680_v19, %v1675_v30  ;;  %v1674_v21 = vld [vmem:[%s4221_s7 + $0x2e0] sm:$0xff] }
 0x182   : > { %3639 = vmatpush1.bf16.msra.mxu1 %v4534_v62  ;;  %1981 = vmatprep.mubr.bf16.mxu1 %v1748_v49  ;;  %v1753_v62 = vpack.c.bf16 %v1678_v63, %v1673_v24  ;;  %v1679_v49 = vld [vmem:[%s4221_s7 + $0x308] sm:$0xff]  ;;  %v1756_v63 = vpack.c.bf16 %v1681_v25, %v1676_v26  ;;  %v1775_v25 = vld [vmem:[#allocation2 + $0x18] sm:$0xff] }
 0x183   : > { %3624 = vmatprep.subr.bf16.mxu1 %v4552_v52  ;;  %2243 = vmatprep.mubr.bf16.mxu0 %v4164_v4  ;;  %v1677_v52 = vld [vmem:[%s4221_s7 + $0x2f8] sm:$0xff]  ;;  %v1754_v24 = vpack.c.bf16 %v1679_v49, %v1674_v21 }
 0x186   : > { %3640 = vmatpush1.bf16.msra.mxu1 %v4550_v51  ;;  %v1752_v51 = vpack.c.bf16 %v1677_v52, %v1672_v31  ;;  %v1686_v31 = vld [vmem:[%s4221_s7 + $0x340] sm:$0xff]  ;;  %v1691_v52 = vld [vmem:[%s4221_s7 + $0x368] sm:$0xff] }
 0x187   : > { %v1761_v36 = vpack.c.bf16 %v1691_v52, %v1686_v31 }
 0x189   : > { %1982 = vmatmul.mubr.bf16.gmra.mrb[32].mxu1 %v1747_v14  ;;  %3595 = vmatmul.mubr.msk.bf16.gmra.mrb[8].mxu0 %vm1822_vm2, %v1721_v29  ;;  %v1760_v14 = vpack.c.bf16 %v1690_v28, %v1685_v27  ;;  %v1684_v29 = vld [vmem:[%s4221_s7 + $0x330] sm:$0xff] }
 0x18a   : > { %1991 = vmatprep.mubr.bf16.mxu1 %v1753_v62  ;;  %2253 = vmatprep.mubr.bf16.mxu0 %v4164_v4  ;;  %v1689_v62 = vld [vmem:[%s4221_s7 + $0x358] sm:$0xff] }
 0x18b   : > { %v1759_v33 = vpack.c.bf16 %v1689_v62, %v1684_v29  ;;  %v1776_v62 = vld [vmem:[#allocation2 + $0x20] sm:$0xff] }
 0x191   : > { %1992 = vmatmul.mubr.bf16.gmra.mrb[36].mxu1 %v1752_v51  ;;  %3596 = vmatmul.mubr.msk.bf16.gmra.mrb[12].mxu0 %vm1822_vm2, %v1726_v46  ;;  %v1765_v51 = vpack.c.bf16 %v1700_v45, %v1695_v32  ;;  %v1694_v46 = vld [vmem:[%s4221_s7 + $0x380] sm:$0xff]  ;;  %v1777_v32 = vld [vmem:[#allocation2 + $0x28] sm:$0xff] }
 0x192   : > { %2001 = vmatprep.mubr.bf16.mxu1 %v1758_v41  ;;  %2263 = vmatprep.mubr.bf16.mxu0 %v4164_v4  ;;  %v1699_v41 = vld [vmem:[%s4221_s7 + $0x3a8] sm:$0xff] }
 0x193   : > { %v1764_v47 = vpack.c.bf16 %v1699_v41, %v1694_v46 }
 0x199   : > { %2002 = vmatmul.mubr.bf16.gmra.mrb[40].mxu1 %v1757_v22  ;;  %3597 = vmatmul.mubr.msk.bf16.gmra.mrb[16].mxu0 %vm1822_vm2, %v1731_v55  ;;  %v1704_v22 = vld [vmem:[%s4221_s7 + $0x3d0] sm:$0xff]  ;;  %v1706_v55 = vld [vmem:[%s4221_s7 + $0x3e0] sm:$0xff] }
 0x19a   : > { %2011 = vmatprep.mubr.bf16.mxu1 %v1763_v53  ;;  %2273 = vmatprep.mubr.bf16.mxu0 %v4164_v4  ;;  %v1769_v53 = vpack.c.bf16 %v1704_v22, %v1704_v22  ;;  %v1771_v56 = vpack.c.bf16 %v1706_v55, %v1706_v55  ;;  %v1780_v22 = vld [vmem:[#allocation2 + $0x40] sm:$0xff] }
 0x1a1   : > { %2012 = vmatmul.mubr.bf16.gmra.mrb[44].mxu1 %v1762_v59  ;;  %3598 = vmatmul.mubr.msk.bf16.gmra.mrb[20].mxu0 %vm1822_vm2, %v1736_v60 }
 0x1a2   : > { %2021 = vmatprep.mubr.bf16.mxu1 %v1768_v37  ;;  %2283 = vmatprep.mubr.bf16.mxu0 %v4164_v4 }
 0x1a9   : > { %2022 = vmatmul.mubr.bf16.gmra.mrb[48].mxu1 %v1767_v2  ;;  %3599 = vmatmul.mubr.msk.bf16.gmra.mrb[24].mxu0 %vm1822_vm2, %v1741_v23 }
 0x1aa   : > { %2132 = vmatprep.mubr.bf16.mxu1 %v1745_v35  ;;  %2293 = vmatprep.mubr.bf16.mxu0 %v4164_v4 }
 0x1b1   : > { %2133 = vmatmul.mubr.bf16.vlgmr.msra.gmra.mrb[28].mxu1 %v1744_v1  ;;  %3600 = vmatmul.mubr.msk.bf16.gmra.mrb[28].mxu0 %vm1822_vm2, %v1746_v17 }
 0x1b2   : > { %2142 = vmatprep.mubr.bf16.mxu1 %v1750_v40  ;;  %2303 = vmatprep.mubr.bf16.mxu0 %v4164_v4  ;;  %v1772_v40 = vld [vmem:[#allocation2] sm:$0xff] }
 0x1b9   : > { %2143 = vmatmul.mubr.bf16.gmra.mrb[32].mxu1 %v1749_v11  ;;  %3601 = vmatmul.mubr.msk.bf16.gmra.mrb[32].mxu0 %vm1822_vm2, %v1751_v50  ;;  %v1774_v50 = vld [vmem:[#allocation2 + $0x10] sm:$0xff] }
 0x1ba   : > { %2152 = vmatprep.mubr.bf16.mxu1 %v1755_v20  ;;  %2313 = vmatprep.mubr.bf16.mxu0 %v4164_v4 }
 0x1c1   : > { %2153 = vmatmul.mubr.bf16.gmra.mrb[36].mxu1 %v1754_v24  ;;  %3602 = vmatmul.mubr.msk.bf16.gmra.mrb[36].mxu0 %vm1822_vm2, %v1756_v63 }
 0x1c2   : > { %2162 = vmatprep.mubr.bf16.mxu1 %v1760_v14  ;;  %2323 = vmatprep.mubr.bf16.mxu0 %v4164_v4 }
 0x1c9   : > { %2163 = vmatmul.mubr.bf16.gmra.mrb[40].mxu1 %v1759_v33  ;;  %3603 = vmatmul.mubr.msk.bf16.gmra.mrb[40].mxu0 %vm1822_vm2, %v1761_v36  ;;  %v1778_v36 = vld [vmem:[#allocation2 + $0x30] sm:$0xff] }
 0x1ca   : > { %2172 = vmatprep.mubr.bf16.mxu1 %v1765_v51  ;;  %2333 = vmatprep.mubr.bf16.mxu0 %v4164_v4 }
 0x1d1   : > { %2173 = vmatmul.mubr.bf16.gmra.mrb[44].mxu1 %v1764_v47  ;;  %3604 = vmatmul.mubr.msk.bf16.gmra.mrb[44].mxu0 %vm1822_vm2, %v1766_v9 }
 0x1d2   : > { %2182 = vmatprep.mubr.bf16.mxu1 %v1770_v48  ;;  %2343 = vmatprep.mubr.bf16.mxu0 %v4164_v4 }
 0x1d9   : > { %2183 = vmatmul.mubr.bf16.gmra.mrb[52].mxu1 %v1769_v53  ;;  %3605 = vmatmul.mubr.msk.bf16.gmra.mrb[48].mxu0 %vm1822_vm2, %v1771_v56  ;;  %v1781_v56 = vld [vmem:[#allocation2 + $0x48] sm:$0xff] }
 0x21c   : > { %v1903_v8 = vpop.f32.mrb[0].mxu1 }
 0x21d   : > { %v1905_v57 = vpop.f32.mrb[1].mxu1 }
 0x21e   : > { %v1907_v38 = vpop.f32.mrb[2].mxu1 }
 0x21f   : > { %v1909_v58 = vpop.f32.mrb[3].mxu1 }
 0x224   : > { %v1913_v59 = vpop.f32.mrb[4].mxu1 }
 0x225   : > { %v1915_v60 = vpop.f32.mrb[5].mxu1 }
 0x226   : > { %v1917_v37 = vpop.f32.mrb[6].mxu1 }
 0x227   : > { %v1919_v61 = vpop.f32.mrb[7].mxu1 }
 0x22c   : > { %v4761_v3 = vpop.f32.mrb[8].mxu1 }
 0x22d   : > { %v4763_v0 = vpop.f32.mrb[9].mxu1 }
 0x22e   : > { %v4765_v54 = vpop.f32.mrb[10].mxu1 }
 0x22f   : > { %v4767_v4 = vpop.f32.mrb[11].mxu1 }
 0x234   : > { %v4769_v6 = vpop.f32.mrb[12].mxu1 }
 0x235   : > { %v4771_v2 = vpop.f32.mrb[13].mxu1 }
 0x236   : > { %v4773_v23 = vpop.f32.mrb[14].mxu1 }
 0x237   : > { %v4775_v35 = vpop.f32.mrb[15].mxu1 }
 0x23c   : > { %v4777_v7 = vpop.f32.mrb[16].mxu1 }
 0x23d   : > { %v4779_v34 = vpop.f32.mrb[17].mxu1 }
 0x23e   : > { %v4781_v10 = vpop.f32.mrb[18].mxu1 }
 0x23f   : > { %v4783_v5 = vpop.f32.mrb[19].mxu1 }
 0x244   : > { %v4785_v13 = vpop.f32.mrb[20].mxu1 }
 0x245   : > { %v4787_v16 = vpop.f32.mrb[21].mxu1 }
 0x246   : > { %v4789_v1 = vpop.f32.mrb[22].mxu1 }
 0x247   : > { %v4791_v17 = vpop.f32.mrb[23].mxu1 }
 0x24c   : > { %v2225_v15 = vpop.f32.mrb[0].mxu0  ;;  %v4793_v39 = vpop.f32.mrb[24].mxu1 }
 0x24d   : > { %v3641_v12 = vadd.f32 %v2225_v15, %v1903_v8  ;;  %v2227_v30 = vpop.f32.mrb[1].mxu0  ;;  %v4795_v19 = vpop.f32.mrb[25].mxu1 }
 0x24e   : > { %v3642_v11 = vadd.f32 %v2227_v30, %v1905_v57  ;;  %v2229_v20 = vpop.f32.mrb[2].mxu0  ;;  %v4797_v21 = vpop.f32.mrb[26].mxu1 }
 0x24f   : > { %v2352_v49 = vadd.f32 %v3641_v12, %v1772_v40  ;;  %v3643_v26 = vadd.f32 %v2229_v20, %v1907_v38  ;;  %v2231_v27 = vpop.f32.mrb[3].mxu0  ;;  %v4799_v28 = vpop.f32.mrb[27].mxu1  ;;  %v1782_v38 = vld [vmem:[#allocation2 + $0x50] sm:$0xff] }
 0x250   : > { %v2353_v24 = vadd.f32 %v3642_v11, %v1773_v18  ;;  %v3644_v63 = vadd.f32 %v2231_v27, %v1909_v58  ;;  %v1785_v11 = vld [vmem:[#allocation2 + $0x68] sm:$0xff]  ;;  %v1786_v20 = vld [vmem:[#allocation2 + $0x70] sm:$0xff] }
 0x251   : > { %2402 = vst [vmem:[#allocation2] sm:$0xff] %v2352_v49  ;;  %v2354_v14 = vadd.f32 %v3643_v26, %v1774_v50 }
 0x252   : > { %2404 = vst.msk [vmem:[#allocation2 + $0x8] sm:$0xff] %vm2403_vm3, %v2353_v24  ;;  %v2355_v29 = vadd.f32 %v3644_v63, %v1775_v25  ;;  %v1787_v25 = vld [vmem:[#allocation2 + $0x78] sm:$0xff] }
 0x253   : > { %2405 = vst [vmem:[#allocation2 + $0x10] sm:$0xff] %v2354_v14 }
 0x254   : > { %2406 = vst.msk [vmem:[#allocation2 + $0x18] sm:$0xff] %vm2403_vm3, %v2355_v29  ;;  %v2235_v31 = vpop.f32.mrb[4].mxu0 }
 0x255   : > { %v3645_v52 = vadd.f32 %v2235_v31, %v1913_v59  ;;  %v2237_v45 = vpop.f32.mrb[5].mxu0  ;;  %v1789_v31 = vld [vmem:[#allocation2 + $0x88] sm:$0xff] }
 0x256   : > { %v3646_v33 = vadd.f32 %v2237_v45, %v1915_v60  ;;  %v2239_v51 = vpop.f32.mrb[6].mxu0 }
 0x257   : > { %v2356_v46 = vadd.f32 %v3645_v52, %v1776_v62  ;;  %v3647_v41 = vadd.f32 %v2239_v51, %v1917_v37  ;;  %v2241_v43 = vpop.f32.mrb[7].mxu0  ;;  %v1783_v37 = vld [vmem:[#allocation2 + $0x58] sm:$0xff] }
 0x258   : > { %v2357_v44 = vadd.f32 %v3646_v33, %v1777_v32  ;;  %v3648_v47 = vadd.f32 %v2241_v43, %v1919_v61  ;;  %v1790_v32 = vld [vmem:[#allocation2 + $0x90] sm:$0xff] }
 0x259   : > { %2407 = vst [vmem:[#allocation2 + $0x20] sm:$0xff] %v2356_v46  ;;  %v2358_v9 = vadd.f32 %v3647_v41, %v1778_v36  ;;  %v1791_v36 = vld [vmem:[#allocation2 + $0x98] sm:$0xff] }
 0x25a   : > { %2408 = vst.msk [vmem:[#allocation2 + $0x28] sm:$0xff] %vm2403_vm3, %v2357_v44  ;;  %v2359_v48 = vadd.f32 %v3648_v47, %v1779_v42  ;;  %v1793_v47 = vld [vmem:[#allocation2 + $0xa8] sm:$0xff] }
 0x25b   : > { %2409 = vst [vmem:[#allocation2 + $0x30] sm:$0xff] %v2358_v9 }
 0x25c   : > { %2410 = vst.msk [vmem:[#allocation2 + $0x38] sm:$0xff] %vm2403_vm3, %v2359_v48  ;;  %v2245_v55 = vpop.f32.mrb[8].mxu0  ;;  %v1794_v48 = vld [vmem:[#allocation2 + $0xb0] sm:$0xff] }
 0x25d   : > { %v3649_v53 = vadd.f32 %v2245_v55, %v4761_v3  ;;  %v2247_v8 = vpop.f32.mrb[9].mxu0  ;;  %v1784_v3 = vld [vmem:[#allocation2 + $0x60] sm:$0xff] }
 0x25e   : > { %v3650_v57 = vadd.f32 %v2247_v8, %v4763_v0  ;;  %v2249_v58 = vpop.f32.mrb[10].mxu0 }
 0x25f   : > { %v2360_v59 = vadd.f32 %v3649_v53, %v1780_v22  ;;  %v3651_v60 = vadd.f32 %v2249_v58, %v4765_v54  ;;  %v2251_v61 = vpop.f32.mrb[11].mxu0  ;;  %v1795_v53 = vld [vmem:[#allocation2 + $0xb8] sm:$0xff] }
 0x260   : > { %v2361_v40 = vadd.f32 %v3650_v57, %v1781_v56  ;;  %v3652_v15 = vadd.f32 %v2251_v61, %v4767_v4 }
 0x261   : > { %2411 = vst [vmem:[#allocation2 + $0x40] sm:$0xff] %v2360_v59  ;;  %v2362_v12 = vadd.f32 %v3651_v60, %v1782_v38 }
 0x262   : > { %2412 = vst.msk [vmem:[#allocation2 + $0x48] sm:$0xff] %vm2403_vm3, %v2361_v40  ;;  %v2363_v18 = vadd.f32 %v3652_v15, %v1783_v37  ;;  %v1798_v40 = vld [vmem:[#allocation2 + $0xd0] sm:$0xff] }
 0x263   : > { %2413 = vst [vmem:[#allocation2 + $0x50] sm:$0xff] %v2362_v12 }
 0x264   : > { %2414 = vst.msk [vmem:[#allocation2 + $0x58] sm:$0xff] %vm2403_vm3, %v2363_v18  ;;  %v2255_v0 = vpop.f32.mrb[12].mxu0 }
 0x265   : > { %v3653_v30 = vadd.f32 %v2255_v0, %v4769_v6  ;;  %v2257_v50 = vpop.f32.mrb[13].mxu0  ;;  %v1788_v6 = vld [vmem:[#allocation2 + $0x80] sm:$0xff]  ;;  %v1799_v0 = vld [vmem:[#allocation2 + $0xd8] sm:$0xff] }
 0x266   : > { %v3654_v54 = vadd.f32 %v2257_v50, %v4771_v2  ;;  %v2259_v49 = vpop.f32.mrb[14].mxu0 }
 0x267   : > { %v2364_v26 = vadd.f32 %v3653_v30, %v1784_v3  ;;  %v3655_v4 = vadd.f32 %v2259_v49, %v4773_v23  ;;  %v2261_v27 = vpop.f32.mrb[15].mxu0  ;;  %v1800_v49 = vld [vmem:[#allocation2 + $0xe0] sm:$0xff] }
 0x268   : > { %v2365_v24 = vadd.f32 %v3654_v54, %v1785_v11  ;;  %v3656_v63 = vadd.f32 %v2261_v27, %v4775_v35 }
 0x269   : > { %2415 = vst [vmem:[#allocation2 + $0x60] sm:$0xff] %v2364_v26  ;;  %v2366_v14 = vadd.f32 %v3655_v4, %v1786_v20 }
 0x26a   : > { %2416 = vst.msk [vmem:[#allocation2 + $0x68] sm:$0xff] %vm2403_vm3, %v2365_v24  ;;  %v2367_v29 = vadd.f32 %v3656_v63, %v1787_v25 }
 0x26b   : > { %2417 = vst [vmem:[#allocation2 + $0x70] sm:$0xff] %v2366_v14  ;;  %v1802_v14 = vld [vmem:[#allocation2 + $0xf0] sm:$0xff] }
 0x26c   : > { %2418 = vst.msk [vmem:[#allocation2 + $0x78] sm:$0xff] %vm2403_vm3, %v2367_v29  ;;  %v2265_v2 = vpop.f32.mrb[16].mxu0 }
 0x26d   : > { %v3657_v62 = vadd.f32 %v2265_v2, %v4777_v7  ;;  %v2267_v52 = vpop.f32.mrb[17].mxu0  ;;  %v1792_v7 = vld [vmem:[#allocation2 + $0xa0] sm:$0xff] }
 0x26e   : > { %v3658_v23 = vadd.f32 %v2267_v52, %v4779_v34  ;;  %v2269_v45 = vpop.f32.mrb[18].mxu0 }
 0x26f   : > { %v2368_v33 = vadd.f32 %v3657_v62, %v1788_v6  ;;  %v3659_v35 = vadd.f32 %v2269_v45, %v4781_v10  ;;  %v2271_v51 = vpop.f32.mrb[19].mxu0  ;;  %v1803_v62 = vld [vmem:[#allocation2 + $0xf8] sm:$0xff] }
 0x270   : > { %v2369_v46 = vadd.f32 %v3658_v23, %v1789_v31  ;;  %v3660_v41 = vadd.f32 %v2271_v51, %v4783_v5 }
 0x271   : > { %2419 = vst [vmem:[#allocation2 + $0x80] sm:$0xff] %v2368_v33  ;;  %v2370_v42 = vadd.f32 %v3659_v35, %v1790_v32  ;;  %v1804_v35 = vld [vmem:[#allocation2 + $0x100] sm:$0xff] }
 0x272   : > { %2420 = vst.msk [vmem:[#allocation2 + $0x88] sm:$0xff] %vm2403_vm3, %v2369_v46  ;;  %v2371_v43 = vadd.f32 %v3660_v41, %v1791_v36  ;;  %v1805_v41 = vld [vmem:[#allocation2 + $0x108] sm:$0xff] }
 0x273   : > { %2421 = vst [vmem:[#allocation2 + $0x90] sm:$0xff] %v2370_v42 }
 0x274   : > { %2422 = vst.msk [vmem:[#allocation2 + $0x98] sm:$0xff] %vm2403_vm3, %v2371_v43  ;;  %v2275_v34 = vpop.f32.mrb[20].mxu0 }
 0x275   : > { %v3661_v44 = vadd.f32 %v2275_v34, %v4785_v13  ;;  %v2277_v9 = vpop.f32.mrb[21].mxu0  ;;  %v1796_v13 = vld [vmem:[#allocation2 + $0xc0] sm:$0xff]  ;;  %v1806_v34 = vld [vmem:[#allocation2 + $0x110] sm:$0xff] }
 0x276   : > { %v3662_v10 = vadd.f32 %v2277_v9, %v4787_v16  ;;  %v2279_v22 = vpop.f32.mrb[22].mxu0 }
 0x277   : > { %v2372_v55 = vadd.f32 %v3661_v44, %v1792_v7  ;;  %v3663_v5 = vadd.f32 %v2279_v22, %v4789_v1  ;;  %v2281_v56 = vpop.f32.mrb[23].mxu0  ;;  %v1797_v1 = vld [vmem:[#allocation2 + $0xc8] sm:$0xff] }
 0x278   : > { %v2373_v8 = vadd.f32 %v3662_v10, %v1793_v47  ;;  %v3664_v57 = vadd.f32 %v2281_v56, %v4791_v17 }
 0x279   : > { %2423 = vst [vmem:[#allocation2 + $0xa0] sm:$0xff] %v2372_v55  ;;  %v2374_v38 = vadd.f32 %v3663_v5, %v1794_v48  ;;  %v1807_v48 = vld [vmem:[#allocation2 + $0x118] sm:$0xff] }
 0x27a   : > { %2424 = vst.msk [vmem:[#allocation2 + $0xa8] sm:$0xff] %vm2403_vm3, %v2373_v8  ;;  %v2375_v58 = vadd.f32 %v3664_v57, %v1795_v53  ;;  %v1808_v57 = vld [vmem:[#allocation2 + $0x120] sm:$0xff] }
 0x27b   : > { %2425 = vst [vmem:[#allocation2 + $0xb0] sm:$0xff] %v2374_v38 }
 0x27c   : > { %2426 = vst.msk [vmem:[#allocation2 + $0xb8] sm:$0xff] %vm2403_vm3, %v2375_v58  ;;  %v2285_v16 = vpop.f32.mrb[24].mxu0  ;;  %v4829_v59 = vpop.f32.mrb[48].mxu1 }
 0x27d   : > { %v3665_v60 = vadd.f32 %v2285_v16, %v4793_v39  ;;  %v2287_v37 = vpop.f32.mrb[25].mxu0  ;;  %v4832_v61 = vpop.f32.mrb[49].mxu1  ;;  %v1809_v16 = vld [vmem:[#allocation2 + $0x128] sm:$0xff] }
 0x27e   : > { %v3666_v17 = vadd.f32 %v2287_v37, %v4795_v19  ;;  %v2289_v15 = vpop.f32.mrb[26].mxu0  ;;  %v2027_v12 = vpop.f32.mrb[50].mxu1 }
 0x27f   : > { %v2376_v18 = vadd.f32 %v3665_v60, %v1796_v13  ;;  %v3667_v3 = vadd.f32 %v2289_v15, %v4797_v21  ;;  %v2291_v30 = vpop.f32.mrb[27].mxu0  ;;  %v2028_v11 = vpop.f32.mrb[51].mxu1  ;;  %v1801_v21 = vld [vmem:[#allocation2 + $0xe8] sm:$0xff] }
 0x280   : > { %v2377_v50 = vadd.f32 %v3666_v17, %v1797_v1  ;;  %v3668_v54 = vadd.f32 %v2291_v30, %v4799_v28  ;;  %v1810_v17 = vld [vmem:[#allocation2 + $0x130] sm:$0xff] }
 0x281   : > { %2427 = vst [vmem:[#allocation2 + $0xc0] sm:$0xff] %v2376_v18  ;;  %v2378_v39 = vadd.f32 %v3667_v3, %v1798_v40  ;;  %v1811_v3 = vld [vmem:[#allocation2 + $0x138] sm:$0xff] }
 0x282   : > { %2428 = vst.msk [vmem:[#allocation2 + $0xc8] sm:$0xff] %vm2403_vm3, %v2377_v50  ;;  %v2379_v20 = vadd.f32 %v3668_v54, %v1799_v0 }
 0x283   : > { %2429 = vst [vmem:[#allocation2 + $0xd0] sm:$0xff] %v2378_v39 }
 0x284   : > { %2430 = vst.msk [vmem:[#allocation2 + $0xd8] sm:$0xff] %vm2403_vm3, %v2379_v20  ;;  %v2134_v19 = vpop.f32.mrb[28].mxu1  ;;  %v2295_v26 = vpop.f32.mrb[28].mxu0  ;;  %v1812_v20 = vld [vmem:[#allocation2 + $0x140] sm:$0xff] }
 0x285   : > { %v3669_v4 = vadd.f32 %v2295_v26, %v2134_v19  ;;  %v2136_v25 = vpop.f32.mrb[29].mxu1  ;;  %v2297_v27 = vpop.f32.mrb[29].mxu0 }
 0x286   : > { %v3670_v24 = vadd.f32 %v2297_v27, %v2136_v25  ;;  %v2138_v63 = vpop.f32.mrb[30].mxu1  ;;  %v2299_v29 = vpop.f32.mrb[30].mxu0 }
 0x287   : > { %v2380_v28 = vadd.f32 %v3669_v4, %v1800_v49  ;;  %v3671_v6 = vadd.f32 %v2299_v29, %v2138_v63  ;;  %v2140_v2 = vpop.f32.mrb[31].mxu1  ;;  %v2301_v31 = vpop.f32.mrb[31].mxu0  ;;  %v1813_v4 = vld [vmem:[#allocation2 + $0x148] sm:$0xff] }
 0x288   : > { %v2381_v52 = vadd.f32 %v3670_v24, %v1801_v21  ;;  %v3672_v23 = vadd.f32 %v2301_v31, %v2140_v2  ;;  %v1814_v24 = vld [vmem:[#allocation2 + $0x150] sm:$0xff] }
 0x289   : > { %2431 = vst [vmem:[#allocation2 + $0xe0] sm:$0xff] %v2380_v28  ;;  %v2382_v32 = vadd.f32 %v3671_v6, %v1802_v14  ;;  %v1815_v6 = vld [vmem:[#allocation2 + $0x158] sm:$0xff] }
 0x28a   : > { %2432 = vst.msk [vmem:[#allocation2 + $0xe8] sm:$0xff] %vm2403_vm3, %v2381_v52  ;;  %v2383_v45 = vadd.f32 %v3672_v23, %v1803_v62 }
 0x28b   : > { %2433 = vst [vmem:[#allocation2 + $0xf0] sm:$0xff] %v2382_v32 }
 0x28c   : > { %2434 = vst.msk [vmem:[#allocation2 + $0xf8] sm:$0xff] %vm2403_vm3, %v2383_v45  ;;  %v2144_v33 = vpop.f32.mrb[32].mxu1  ;;  %v2305_v36 = vpop.f32.mrb[32].mxu0  ;;  %v1816_v45 = vld [vmem:[#allocation2 + $0x160] sm:$0xff] }
 0x28d   : > { %v3673_v51 = vadd.f32 %v2305_v36, %v2144_v33  ;;  %v2146_v46 = vpop.f32.mrb[33].mxu1  ;;  %v2307_v42 = vpop.f32.mrb[33].mxu0 }
 0x28e   : > { %v3674_v43 = vadd.f32 %v2307_v42, %v2146_v46  ;;  %v2148_v7 = vpop.f32.mrb[34].mxu1  ;;  %v2309_v44 = vpop.f32.mrb[34].mxu0 }
 0x28f   : > { %v2384_v47 = vadd.f32 %v3673_v51, %v1804_v35  ;;  %v3675_v9 = vadd.f32 %v2309_v44, %v2148_v7  ;;  %v2150_v10 = vpop.f32.mrb[35].mxu1  ;;  %v2311_v22 = vpop.f32.mrb[35].mxu0  ;;  %v1817_v51 = vld [vmem:[#allocation2 + $0x168] sm:$0xff] }
 0x290   : > { %v2385_v55 = vadd.f32 %v3674_v43, %v1805_v41  ;;  %v3676_v5 = vadd.f32 %v2311_v22, %v2150_v10  ;;  %v1818_v43 = vld [vmem:[#allocation2 + $0x170] sm:$0xff] }
 0x291   : > { %2435 = vst [vmem:[#allocation2 + $0x100] sm:$0xff] %v2384_v47  ;;  %v2386_v53 = vadd.f32 %v3675_v9, %v1806_v34  ;;  %v1819_v9 = vld [vmem:[#allocation2 + $0x178] sm:$0xff] }
 0x292   : > { %2436 = vst.msk [vmem:[#allocation2 + $0x108] sm:$0xff] %vm2403_vm3, %v2385_v55  ;;  %v2387_v56 = vadd.f32 %v3676_v5, %v1807_v48 }
 0x293   : > { %2437 = vst [vmem:[#allocation2 + $0x110] sm:$0xff] %v2386_v53 }
 0x294   : > { %2438 = vst.msk [vmem:[#allocation2 + $0x118] sm:$0xff] %vm2403_vm3, %v2387_v56  ;;  %v2154_v8 = vpop.f32.mrb[36].mxu1  ;;  %v2315_v38 = vpop.f32.mrb[36].mxu0 }
 0x295   : > { %v3677_v58 = vadd.f32 %v2315_v38, %v2154_v8  ;;  %v2156_v13 = vpop.f32.mrb[37].mxu1  ;;  %v2317_v60 = vpop.f32.mrb[37].mxu0 }
 0x296   : > { %v3678_v1 = vadd.f32 %v2317_v60, %v2156_v13  ;;  %v2158_v37 = vpop.f32.mrb[38].mxu1  ;;  %v2319_v40 = vpop.f32.mrb[38].mxu0  ;;  %v1820_v13 = vld [vmem:[#allocation2 + $0x180] sm:$0xff] }
 0x297   : > { %v2388_v15 = vadd.f32 %v3677_v58, %v1808_v57  ;;  %v3679_v12 = vadd.f32 %v2319_v40, %v2158_v37  ;;  %v2160_v18 = vpop.f32.mrb[39].mxu1  ;;  %v2321_v0 = vpop.f32.mrb[39].mxu0  ;;  %v1821_v37 = vld [vmem:[#allocation2 + $0x188] sm:$0xff] }
 0x298   : > { %v2389_v30 = vadd.f32 %v3678_v1, %v1809_v16  ;;  %v3680_v11 = vadd.f32 %v2321_v0, %v2160_v18 }
 0x299   : > { %2439 = vst [vmem:[#allocation2 + $0x120] sm:$0xff] %v2388_v15  ;;  %v2390_v50 = vadd.f32 %v3679_v12, %v1810_v17 }
 0x29a   : > { %2440 = vst.msk [vmem:[#allocation2 + $0x128] sm:$0xff] %vm2403_vm3, %v2389_v30  ;;  %v2391_v54 = vadd.f32 %v3680_v11, %v1811_v3  ;;  %v4855_v3 = vld [vmem:[#allocation2 + $0x28] sm:$0xff] (!%p3606_p5)  ;;  %v4863_v11 = vld [vmem:[#allocation2 + $0x30] sm:$0xff] (!%p3606_p5) }
 0x29b   : > { %2441 = vst [vmem:[#allocation2 + $0x130] sm:$0xff] %v2390_v50  ;;  %v2515_v0 = vsel (!%p3606_p5), %vm2403_vm3, %v4855_v3, 0.0  ;;  %v4861_v30 = vld [vmem:[#allocation2 + $0x8] sm:$0xff] (!%p3606_p5)  ;;  %v4865_v50 = vld [vmem:[#allocation2 + $0x38] sm:$0xff] (!%p3606_p5) }
 0x29c   : > { %2442 = vst.msk [vmem:[#allocation2 + $0x138] sm:$0xff] %vm2403_vm3, %v2391_v54  ;;  %v2164_v39 = vpop.f32.mrb[40].mxu1  ;;  %v2325_v19 = vpop.f32.mrb[40].mxu0 }
 0x29d   : > { %v3681_v49 = vadd.f32 %v2325_v19, %v2164_v39  ;;  %v2166_v26 = vpop.f32.mrb[41].mxu1  ;;  %v2327_v25 = vpop.f32.mrb[41].mxu0  ;;  %v2507_v39 = vsel (!%p3606_p5), %vm2403_vm3, %v4861_v30, 0.0  ;;  %v4872_v19 = vld [vmem:[#allocation2 + $0x10] sm:$0xff] (!%p3606_p5) }
 0x29e   : > { %v3682_v21 = vadd.f32 %v2327_v25, %v2166_v26  ;;  %v2168_v27 = vpop.f32.mrb[42].mxu1  ;;  %v2329_v63 = vpop.f32.mrb[42].mxu0  ;;  %v4879_v25 = vld [vmem:[#allocation2 + $0x58] sm:$0xff] (!%p3606_p5) }
 0x29f   : > { %v2392_v14 = vadd.f32 %v3681_v49, %v1812_v20  ;;  %v3683_v29 = vadd.f32 %v2329_v63, %v2168_v27  ;;  %v2170_v28 = vpop.f32.mrb[43].mxu1  ;;  %v2331_v2 = vpop.f32.mrb[43].mxu0  ;;  %v2519_v20 = vsel (!%p3606_p5), %vm2403_vm3, %v4865_v50, 0.0  ;;  %v4874_v49 = vld [vmem:[#allocation2 + $0x18] sm:$0xff] (!%p3606_p5)  ;;  %v4885_v63 = vld [vmem:[#allocation2 + $0x50] sm:$0xff] (!%p3606_p5) }
 0x2a0   : > { %v2393_v62 = vadd.f32 %v3682_v21, %v1813_v4  ;;  %v3684_v31 = vadd.f32 %v2331_v2, %v2170_v28  ;;  %v2511_v4 = vsel (!%p3606_p5), %vm2403_vm3, %v4874_v49, 0.0  ;;  %v4881_v21 = vld [vmem:[#allocation2 + $0x48] sm:$0xff] (!%p3606_p5)  ;;  %v2520_v27 = vadd.f32 (!%p3606_p5), %v2519_v20, %v4863_v11 }
 0x2a1   : > { %2443 = vst [vmem:[#allocation2 + $0x140] sm:$0xff] %v2392_v14  ;;  %v2394_v52 = vadd.f32 %v3683_v29, %v1814_v24  ;;  %v2512_v24 = vadd.f32 (!%p3606_p5), %v2511_v4, %v4872_v19  ;;  %v2527_v14 = vsel (!%p3606_p5), %vm2403_vm3, %v4879_v25, 0.0  ;;  %v4889_v29 = vld [vmem:[#allocation2 + $0x40] sm:$0xff] (!%p3606_p5)  ;;  %v2523_v28 = vsel (!%p3606_p5), %vm2403_vm3, %v4881_v21, 0.0  ;;  %v4895_v2 = vld [vmem:[#allocation2 + $0x68] sm:$0xff] (!%p3606_p5) }
 0x2a2   : > { %2444 = vst.msk [vmem:[#allocation2 + $0x148] sm:$0xff] %vm2403_vm3, %v2393_v62  ;;  %v2395_v23 = vadd.f32 %v3684_v31, %v1815_v6  ;;  %v4893_v6 = vld [vmem:[#allocation2 + $0x78] sm:$0xff] (!%p3606_p5)  ;;  %v2528_v62 = vadd.f32 (!%p3606_p5), %v2527_v14, %v4885_v63  ;;  %v2524_v31 = vadd.f32 (!%p3606_p5), %v2523_v28, %v4889_v29 }
 0x2a3   : > { %2445 = vst [vmem:[#allocation2 + $0x150] sm:$0xff] %v2394_v52  ;;  %v4899_v52 = vld [vmem:[#allocation2 + $0x70] sm:$0xff] (!%p3606_p5) }
 0x2a4   : > { %2446 = vst.msk [vmem:[#allocation2 + $0x158] sm:$0xff] %vm2403_vm3, %v2395_v23  ;;  %v2174_v32 = vpop.f32.mrb[44].mxu1  ;;  %v2335_v33 = vpop.f32.mrb[44].mxu0  ;;  %v2535_v23 = vsel (!%p3606_p5), %vm2403_vm3, %v4893_v6, 0.0 }
 0x2a5   : > { %v3685_v35 = vadd.f32 %v2335_v33, %v2174_v32  ;;  %v2176_v36 = vpop.f32.mrb[45].mxu1  ;;  %v2337_v46 = vpop.f32.mrb[45].mxu0  ;;  %v4903_v32 = vld [vmem:[#allocation2 + $0x60] sm:$0xff] (!%p3606_p5)  ;;  %v4907_v33 = vld [vmem:[#allocation2 + $0x98] sm:$0xff] (!%p3606_p5) }
 0x2a6   : > { %v3686_v41 = vadd.f32 %v2337_v46, %v2176_v36  ;;  %v2178_v42 = vpop.f32.mrb[46].mxu1  ;;  %v2339_v7 = vpop.f32.mrb[46].mxu0  ;;  %v2536_v36 = vadd.f32 (!%p3606_p5), %v2535_v23, %v4899_v52  ;;  %v4913_v46 = vld [vmem:[#allocation2 + $0x90] sm:$0xff] (!%p3606_p5)  ;;  %v4987_v23 = vld [vmem:[#allocation2 + $0x120] sm:$0xff] (!%p3606_p5) }
 0x2a7   : > { %v2396_v34 = vadd.f32 %v3685_v35, %v1816_v45  ;;  %v3687_v44 = vadd.f32 %v2339_v7, %v2178_v42  ;;  %v2180_v47 = vpop.f32.mrb[47].mxu1  ;;  %v2341_v10 = vpop.f32.mrb[47].mxu0  ;;  %v2531_v45 = vsel (!%p3606_p5), %vm2403_vm3, %v4895_v2, 0.0  ;;  %v4909_v35 = vld [vmem:[#allocation2 + $0x88] sm:$0xff] (!%p3606_p5)  ;;  %v4917_v42 = vld [vmem:[#allocation2 + $0x80] sm:$0xff] (!%p3606_p5)  ;;  %v4921_v7 = vld [vmem:[#allocation2 + $0xb8] sm:$0xff] (!%p3606_p5) }
 0x2a8   : > { %v2397_v48 = vadd.f32 %v3686_v41, %v1817_v51  ;;  %v3688_v22 = vadd.f32 %v2341_v10, %v2180_v47  ;;  %v2532_v51 = vadd.f32 (!%p3606_p5), %v2531_v45, %v4903_v32  ;;  %v2543_v41 = vsel (!%p3606_p5), %vm2403_vm3, %v4907_v33, 0.0 }
 0x2a9   : > { %2447 = vst [vmem:[#allocation2 + $0x160] sm:$0xff] %v2396_v34  ;;  %v2398_v55 = vadd.f32 %v3687_v44, %v1818_v43  ;;  %v2539_v43 = vsel (!%p3606_p5), %vm2403_vm3, %v4909_v35, 0.0  ;;  %v4923_v34 = vld [vmem:[#allocation2 + $0xa8] sm:$0xff] (!%p3606_p5)  ;;  %v2544_v44 = vadd.f32 (!%p3606_p5), %v2543_v41, %v4913_v46  ;;  %v2551_v10 = vsel (!%p3606_p5), %vm2403_vm3, %v4921_v7, 0.0 }
 0x2aa   : > { %2448 = vst.msk [vmem:[#allocation2 + $0x168] sm:$0xff] %vm2403_vm3, %v2397_v48  ;;  %v2399_v5 = vadd.f32 %v3688_v22, %v1819_v9  ;;  %v2540_v47 = vadd.f32 (!%p3606_p5), %v2539_v43, %v4917_v42  ;;  %v4927_v9 = vld [vmem:[#allocation2 + $0xb0] sm:$0xff] (!%p3606_p5)  ;;  %v4931_v48 = vld [vmem:[#allocation2 + $0xa0] sm:$0xff] (!%p3606_p5)  ;;  %v2547_v22 = vsel (!%p3606_p5), %vm2403_vm3, %v4923_v34, 0.0 }
 0x2ab   : > { %2449 = vst [vmem:[#allocation2 + $0x170] sm:$0xff] %v2398_v55  ;;  %v4935_v55 = vld [vmem:[#allocation2 + $0xd8] sm:$0xff] (!%p3606_p5) }
 0x2ac   : > { %2450 = vst.msk [vmem:[#allocation2 + $0x178] sm:$0xff] %vm2403_vm3, %v2399_v5  ;;  %v2184_v53 = vpop.f32.mrb[52].mxu1  ;;  %v2345_v56 = vpop.f32.mrb[48].mxu0  ;;  %v4937_v5 = vld [vmem:[#allocation2 + $0xc8] sm:$0xff] (!%p3606_p5) }
 0x2ad   : > { %v2185_v8 = vadd.f32 %v2184_v53, %v4829_v59  ;;  %v2186_v57 = vpop.f32.mrb[53].mxu1  ;;  %v2347_v38 = vpop.f32.mrb[49].mxu0  ;;  %v4853_v59 = vld [vmem:[#allocation2 + $0x20] sm:$0xff] (!%p3606_p5)  ;;  %v2552_v53 = vadd.f32 (!%p3606_p5), %v2551_v10, %v4927_v9 }
 0x2ae   : > { %v2187_v58 = vadd.f32 %v2186_v57, %v4832_v61  ;;  %v2188_v16 = vpop.f32.mrb[54].mxu1  ;;  %v2349_v60 = vpop.f32.mrb[50].mxu0  ;;  %2456 = sbr.rel (%p3606_p5) target bundleno = 1143 (0x477), region = 48  ;;  %v4857_v61 = vld [vmem:[#allocation2] sm:$0xff] (!%p3606_p5)  ;;  %v2516_v54 = vadd.f32 (!%p3606_p5), %v2515_v0, %v4853_v59  ;;  %v2559_v57 = vsel (!%p3606_p5), %vm2403_vm3, %v4935_v55, 0.0 }
 0x2af   : > { %v2346_v1 = vadd.f32 %v2345_v56, %v2185_v8  ;;  %v2189_v17 = vpop.f32.mrb[55].mxu1  ;;  %v2350_v40 = vpop.f32.mrb[51].mxu0  ;;  %v2508_v26 = vadd.f32 (!%p3606_p5), %v2507_v39, %v4857_v61  ;;  %v2548_v56 = vadd.f32 (!%p3606_p5), %v2547_v22, %v4931_v48  ;;  %v4941_v8 = vld [vmem:[#allocation2 + $0xd0] sm:$0xff] (!%p3606_p5)  ;;  %v4951_v16 = vld [vmem:[#allocation2 + $0xe8] sm:$0xff] (!%p3606_p5)  ;;  %v5001_v10 = vld [vmem:[#allocation2 + $0x140] sm:$0xff] (!%p3606_p5) }
 0x2b0   : > { %v2348_v15 = vadd.f32 %v2347_v38, %v2187_v58  ;;  %2517 = vadd.xlane.f32.xlu1 (!%p3606_p5), %v2516_v54  ;;  %v4945_v38 = vld [vmem:[#allocation2 + $0xc0] sm:$0xff] (!%p3606_p5)  ;;  %v2555_v58 = vsel (!%p3606_p5), %vm2403_vm3, %v4937_v5, 0.0  ;;  %v2560_v60 = vadd.f32 (!%p3606_p5), %v2559_v57, %v4941_v8  ;;  %v4969_v39 = vld [vmem:[#allocation2 + $0x110] sm:$0xff] (!%p3606_p5) }
 0x2b1   : > { %v2400_v12 = vadd.f32 %v2346_v1, %v1820_v13  ;;  %2509 = vadd.xlane.f32.xlu0 (!%p3606_p5), %v2508_v26  ;;  %v4949_v13 = vld [vmem:[#allocation2 + $0xf8] sm:$0xff] (!%p3606_p5)  ;;  %v2556_v1 = vadd.f32 (!%p3606_p5), %v2555_v58, %v4945_v38  ;;  %v4959_v40 = vld [vmem:[#allocation2 + $0xe0] sm:$0xff] (!%p3606_p5) }
 0x2b2   : > { %v2401_v18 = vadd.f32 %v2348_v15, %v1821_v37  ;;  %v4955_v37 = vld [vmem:[#allocation2 + $0xf0] sm:$0xff] (!%p3606_p5)  ;;  %v2567_v17 = vsel (!%p3606_p5), %vm2403_vm3, %v4949_v13, 0.0  ;;  %v2563_v15 = vsel (!%p3606_p5), %vm2403_vm3, %v4951_v16, 0.0  ;;  %v4973_v26 = vld [vmem:[#allocation2 + $0x100] sm:$0xff] (!%p3606_p5) }
 0x2b3   : > { %2451 = vst [vmem:[#allocation2 + $0x180] sm:$0xff] %v2400_v12  ;;  %v4963_v12 = vld [vmem:[#allocation2 + $0x118] sm:$0xff] (!%p3606_p5)  ;;  %v2568_v0 = vadd.f32 (!%p3606_p5), %v2567_v17, %v4955_v37  ;;  %v2564_v54 = vadd.f32 (!%p3606_p5), %v2563_v15, %v4959_v40  ;;  %v2608_v17 = vmul.f32 (!%p3606_p5), %v4861_v30, %v4861_v30  ;;  %v5017_v15 = vld [vmem:[#allocation2 + $0x160] sm:$0xff] (!%p3606_p5)  ;;  %v2612_v30 = vmul.f32 (!%p3606_p5), %v4855_v3, %v4855_v3 }
 0x2b4   : > { %2452 = vst.msk [vmem:[#allocation2 + $0x188] sm:$0xff] %vm2403_vm3, %v2401_v18  ;;  %2521 = vadd.xlane.f32.xlu1 (!%p3606_p5), %v2520_v27  ;;  %v4965_v18 = vld [vmem:[#allocation2 + $0x108] sm:$0xff] (!%p3606_p5)  ;;  %v2575_v20 = vsel (!%p3606_p5), %vm2403_vm3, %v4963_v12, 0.0  ;;  %v4977_v27 = vld [vmem:[#allocation2 + $0x138] sm:$0xff] (!%p3606_p5)  ;;  %v2609_v3 = vmul.f32 (!%p3606_p5), %v4872_v19, %v4872_v19  ;;  %v2613_v19 = vmul.f32 (!%p3606_p5), %v4863_v11, %v4863_v11  ;;  %v2617_v11 = vmul.f32 (!%p3606_p5), %v4885_v63, %v4885_v63 }
 0x2b5   : > { %2513 = vadd.xlane.f32.xlu0 %v2512_v24  ;;  %v2571_v4 = vsel %vm2403_vm3, %v4965_v18, 0.0  ;;  %v4979_v24 = vld [vmem:[#allocation2 + $0x128] sm:$0xff]  ;;  %v2576_v14 = vadd.f32 %v2575_v20, %v4969_v39  ;;  %v2621_v63 = vmul.f32 %v4899_v52, %v4899_v52  ;;  %v2625_v52 = vmul.f32 %v4913_v46, %v4913_v46 }
 0x2b6   : > { %v2572_v28 = vadd.f32 %v2571_v4, %v4973_v26  ;;  %v2579_v45 = vsel %vm2403_vm3, %v4979_v24, 0.0  ;;  %v2607_v4 = vmul.f32 %v4857_v61, %v4857_v61  ;;  %v2611_v61 = vmul.f32 %v4853_v59, %v4853_v59 }
 0x2b7   : > { %v2580_v43 = vadd.f32 %v2579_v45, %v4987_v23  ;;  %v2615_v59 = vmul.f32 %v4889_v29, %v4889_v29  ;;  %v2619_v29 = vmul.f32 %v4903_v32, %v4903_v32  ;;  %v2623_v32 = vmul.f32 %v4917_v42, %v4917_v42 }
 0x2b8   : > { %2529 = vadd.xlane.f32.xlu1 %v2528_v62  ;;  %v4983_v62 = vld [vmem:[#allocation2 + $0x130] sm:$0xff]  ;;  %v2627_v42 = vmul.f32 %v4931_v48, %v4931_v48  ;;  %v2631_v48 = vmul.f32 %v4945_v38, %v4945_v38  ;;  %v2629_v46 = vmul.f32 %v4927_v9, %v4927_v9  ;;  %v2635_v38 = vmul.f32 %v4959_v40, %v4959_v40 }
 0x2b9   : > { %2525 = vadd.xlane.f32.xlu0 %v2524_v31  ;;  %v2583_v31 = vsel %vm2403_vm3, %v4977_v27, 0.0  ;;  %v2633_v9 = vmul.f32 %v4941_v8, %v4941_v8  ;;  %v2639_v40 = vmul.f32 %v4973_v26, %v4973_v26  ;;  %v2637_v8 = vmul.f32 %v4955_v37, %v4955_v37 }
 0x2ba   : > { %v2584_v41 = vadd.f32 %v2583_v31, %v4983_v62  ;;  %v5030_v31 = vld [vmem:[#allocation2 + $0x180] sm:$0xff]  ;;  %v2643_v26 = vmul.f32 %v4987_v23, %v4987_v23  ;;  %v2641_v37 = vmul.f32 %v4969_v39, %v4969_v39  ;;  %v2647_v23 = vmul.f32 %v5001_v10, %v5001_v10 }
 0x2bb   : > { %v2645_v39 = vmul.f32 %v4983_v62, %v4983_v62 }
 0x2bc   : > { %2537 = vadd.xlane.f32.xlu1 %v2536_v36  ;;  %v4991_v36 = vld [vmem:[#allocation2 + $0x158] sm:$0xff] }
 0x2bd   : > { %2533 = vadd.xlane.f32.xlu0 %v2532_v51  ;;  %v4993_v51 = vld [vmem:[#allocation2 + $0x148] sm:$0xff] }
 0x2be   : > { %v2587_v22 = vsel %vm2403_vm3, %v4993_v51, 0.0 }
 0x2bf   : > { %v2588_v58 = vadd.f32 %v2587_v22, %v5001_v10  ;;  %v2665_v22 = vsel %vm2403_vm3, %v2612_v30, 0.0 }
 0x2c0   : > { %2545 = vadd.xlane.f32.xlu1 %v2544_v44  ;;  %v4997_v44 = vld [vmem:[#allocation2 + $0x150] sm:$0xff] }
 0x2c1   : > { %2541 = vadd.xlane.f32.xlu0 %v2540_v47  ;;  %v2591_v47 = vsel %vm2403_vm3, %v4991_v36, 0.0 }
 0x2c2   : > { %v2592_v57 = vadd.f32 %v2591_v47, %v4997_v44 }
 0x2c4   : > { %2553 = vadd.xlane.f32.xlu1 %v2552_v53  ;;  %v5005_v53 = vld [vmem:[#allocation2 + $0x178] sm:$0xff] }
 0x2c5   : > { %2549 = vadd.xlane.f32.xlu0 %v2548_v56  ;;  %v5007_v56 = vld [vmem:[#allocation2 + $0x168] sm:$0xff] }
 0x2c8   : > { %2561 = vadd.xlane.f32.xlu1 %v2560_v60  ;;  %v5011_v60 = vld [vmem:[#allocation2 + $0x170] sm:$0xff] }
 0x2c9   : > { %2557 = vadd.xlane.f32.xlu0 %v2556_v1  ;;  %v2599_v1 = vsel %vm2403_vm3, %v5005_v53, 0.0 }
 0x2ca   : > { %v2600_v20 = vadd.f32 %v2599_v1, %v5011_v60  ;;  %v2666_v1 = vadd.f32 %v2665_v22, %v2611_v61 }
 0x2cc   : > { %2569 = vadd.xlane.f32.xlu1 %v2568_v0  ;;  %v2595_v0 = vsel %vm2403_vm3, %v5007_v56, 0.0 }
 0x2cd   : > { %2565 = vadd.xlane.f32.xlu0 %v2564_v54  ;;  %v5021_v54 = vld [vmem:[#allocation2 + $0x188] sm:$0xff] }
 0x2ce   : > { %v2603_v45 = vsel %vm2403_vm3, %v5021_v54, 0.0 }
 0x2cf   : > { %v2604_v47 = vadd.f32 %v2603_v45, %v5030_v31 }
 0x2d0   : > { %2577 = vadd.xlane.f32.xlu1 %v2576_v14  ;;  %v2596_v14 = vadd.f32 %v2595_v0, %v5017_v15 }
 0x2d1   : > { %2573 = vadd.xlane.f32.xlu0 %v2572_v28  ;;  %v2657_v28 = vsel %vm2403_vm3, %v2608_v17, 0.0 }
 0x2d4   : > { %2585 = vadd.xlane.f32.xlu1 %v2584_v41  ;;  %v2610_v41 = vmul.f32 %v4874_v49, %v4874_v49  ;;  %v2614_v49 = vmul.f32 %v4865_v50, %v4865_v50  ;;  %v2618_v50 = vmul.f32 %v4879_v25, %v4879_v25  ;;  %v2622_v25 = vmul.f32 %v4893_v6, %v4893_v6 }
 0x2d5   : > { %2581 = vadd.xlane.f32.xlu0 %v2580_v43  ;;  %v2658_v43 = vadd.f32 %v2657_v28, %v2607_v4  ;;  %v2626_v6 = vmul.f32 %v4907_v33, %v4907_v33  ;;  %v2630_v33 = vmul.f32 %v4921_v7, %v4921_v7  ;;  %v2634_v7 = vmul.f32 %v4935_v55, %v4935_v55 }
 0x2d6   : > { %v2677_v30 = vsel %vm2403_vm3, %v2618_v50, 0.0  ;;  %v2685_v61 = vsel %vm2403_vm3, %v2622_v25, 0.0  ;;  %v2638_v55 = vmul.f32 %v4949_v13, %v4949_v13  ;;  %v2642_v13 = vmul.f32 %v4963_v12, %v4963_v12 }
 0x2d7   : > { %v2686_v22 = vadd.f32 %v2685_v61, %v2621_v63  ;;  %v2646_v12 = vmul.f32 %v4977_v27, %v4977_v27  ;;  %v2650_v27 = vmul.f32 %v4991_v36, %v4991_v36  ;;  %v2654_v61 = vmul.f32 %v5005_v53, %v5005_v53 }
 0x2d8   : > { %2593 = vadd.xlane.f32.xlu1 %v2592_v57  ;;  %v2616_v57 = vmul.f32 %v4881_v21, %v4881_v21  ;;  %v2620_v21 = vmul.f32 %v4895_v2, %v4895_v2  ;;  %v2624_v2 = vmul.f32 %v4909_v35, %v4909_v35  ;;  %v2628_v35 = vmul.f32 %v4923_v34, %v4923_v34 }
 0x2d9   : > { %2589 = vadd.xlane.f32.xlu0 %v2588_v58  ;;  %v2661_v58 = vsel %vm2403_vm3, %v2610_v41, 0.0  ;;  %v2678_v41 = vadd.f32 %v2677_v30, %v2617_v11  ;;  %v2632_v34 = vmul.f32 %v4937_v5, %v4937_v5  ;;  %v2636_v5 = vmul.f32 %v4951_v16, %v4951_v16 }
 0x2da   : > { %v2662_v17 = vadd.f32 %v2661_v58, %v2609_v3  ;;  %v2673_v0 = vsel %vm2403_vm3, %v2616_v57, 0.0  ;;  %v2681_v28 = vsel %vm2403_vm3, %v2620_v21, 0.0  ;;  %v2697_v3 = vsel %vm2403_vm3, %v2628_v35, 0.0 }
 0x2db   : > { %v2674_v4 = vadd.f32 %v2673_v0, %v2615_v59  ;;  %v2682_v45 = vadd.f32 %v2681_v28, %v2619_v29  ;;  %v2693_v57 = vsel %vm2403_vm3, %v2626_v6, 0.0  ;;  %v2698_v58 = vadd.f32 %v2697_v3, %v2627_v42 }
 0x2dc   : > { %2601 = vadd.xlane.f32.xlu1 %v2600_v20  ;;  %v2669_v20 = vsel %vm2403_vm3, %v2614_v49, 0.0  ;;  %v2694_v49 = vadd.f32 %v2693_v57, %v2625_v52  ;;  %v2701_v59 = vsel %vm2403_vm3, %v2630_v33, 0.0  ;;  %v2640_v16 = vmul.f32 %v4965_v18, %v4965_v18 }
 0x2dd   : > { %2597 = vadd.xlane.f32.xlu0 %v2596_v14  ;;  %v2670_v14 = vadd.f32 %v2669_v20, %v2613_v19  ;;  %v2702_v0 = vadd.f32 %v2701_v59, %v2629_v46  ;;  %v2713_v19 = vsel %vm2403_vm3, %v2636_v5, 0.0  ;;  %v2709_v21 = vsel %vm2403_vm3, %v2634_v7, 0.0 }
 0x2de   : > { %v2714_v20 = vadd.f32 %v2713_v19, %v2635_v38  ;;  %v2710_v50 = vadd.f32 %v2709_v21, %v2633_v9  ;;  %v2644_v18 = vmul.f32 %v4979_v24, %v4979_v24  ;;  %v2717_v29 = vsel %vm2403_vm3, %v2638_v55, 0.0 }
 0x2df   : > { %v2718_v28 = vadd.f32 %v2717_v29, %v2637_v8  ;;  %v2648_v24 = vmul.f32 %v4993_v51, %v4993_v51  ;;  %v2652_v51 = vmul.f32 %v5007_v56, %v5007_v56  ;;  %v2649_v56 = vmul.f32 %v4997_v44, %v4997_v44 }
 0x2e0   : > { %2659 = vadd.xlane.f32.xlu1 %v2658_v43  ;;  %v2689_v43 = vsel %vm2403_vm3, %v2624_v2, 0.0  ;;  %v2729_v11 = vsel %vm2403_vm3, %v2644_v18, 0.0  ;;  %v2725_v2 = vsel %vm2403_vm3, %v2642_v13, 0.0  ;;  %v2656_v35 = vmul.f32 %v5021_v54, %v5021_v54 }
 0x2e1   : > { %2605 = vadd.xlane.f32.xlu0 %v2604_v47  ;;  %v2690_v47 = vadd.f32 %v2689_v43, %v2623_v32  ;;  %v2730_v30 = vadd.f32 %v2729_v11, %v2643_v26  ;;  %v2726_v25 = vadd.f32 %v2725_v2, %v2641_v37  ;;  %v2733_v32 = vsel %vm2403_vm3, %v2646_v12, 0.0 }
 0x2e2   : > { %v2651_v43 = vmul.f32 %v5017_v15, %v5017_v15  ;;  %v2734_v63 = vadd.f32 %v2733_v32, %v2645_v39  ;;  %v2745_v62 = vsel %vm2403_vm3, %v2652_v51, 0.0  ;;  %v2741_v36 = vsel %vm2403_vm3, %v2650_v27, 0.0 }
 0x2e3   : > { %v2655_v15 = vmul.f32 %v5030_v31, %v5030_v31  ;;  %v2753_v42 = vsel %vm2403_vm3, %v2656_v35, 0.0  ;;  %v2653_v44 = vmul.f32 %v5011_v60, %v5011_v60 }
 0x2e4   : > { %2667 = vadd.xlane.f32.xlu1 %v2666_v1  ;;  %v2705_v1 = vsel %vm2403_vm3, %v2632_v34, 0.0  ;;  %v2746_v6 = vadd.f32 %v2745_v62, %v2651_v43 }
 0x2e5   : > { %2663 = vadd.xlane.f32.xlu0 %v2662_v17  ;;  %v2706_v17 = vadd.f32 %v2705_v1, %v2631_v48  ;;  %v2754_v54 = vadd.f32 %v2753_v42, %v2655_v15 }
 0x2e8   : > { %2675 = vadd.xlane.f32.xlu1 %v2674_v4  ;;  %v2721_v4 = vsel %vm2403_vm3, %v2640_v16, 0.0 }
 0x2e9   : > { %2671 = vadd.xlane.f32.xlu0 %v2670_v14  ;;  %v2722_v14 = vadd.f32 %v2721_v4, %v2639_v40 }
 0x2ec   : > { %2683 = vadd.xlane.f32.xlu1 %v2682_v45  ;;  %v2737_v45 = vsel %vm2403_vm3, %v2648_v24, 0.0 }
 0x2ed   : > { %2679 = vadd.xlane.f32.xlu0 %v2678_v41  ;;  %v4165_v41 = vmov 0   ;;  %v2738_v10 = vadd.f32 %v2737_v45, %v2647_v23 }
 0x2ee   : > { %4053 = vset.pattern.permute.xlu0 %v4165_v41  ;;  %4054 = vset.pattern.permute.xlu1 %v4165_v41 }
 0x2f0   : > { %2691 = vadd.xlane.f32.xlu1 %v2690_v47  ;;  %v2742_v47 = vadd.f32 %v2741_v36, %v2649_v56 }
 0x2f1   : > { %2687 = vadd.xlane.f32.xlu0 %v2686_v22  ;;  %v2749_v22 = vsel %vm2403_vm3, %v2654_v61, 0.0 }
 0x2f2   : > { %v2750_v3 = vadd.f32 %v2749_v22, %v2653_v44 }
 0x2f4   : > { %2699 = vadd.xlane.f32.xlu1 %v2698_v58 }
 0x2f5   : > { %2695 = vadd.xlane.f32.xlu0 %v2694_v49 }
 0x2f8   : > { %2707 = vadd.xlane.f32.xlu1 %v2706_v17 }
 0x2f9   : > { %2703 = vadd.xlane.f32.xlu0 %v2702_v0 }
 0x2fc   : > { %2715 = vadd.xlane.f32.xlu1 %v2714_v20 }
 0x2fd   : > { %2711 = vadd.xlane.f32.xlu0 %v2710_v50 }
 0x300   : > { %2723 = vadd.xlane.f32.xlu1 %v2722_v14 }
 0x301   : > { %2719 = vadd.xlane.f32.xlu0 %v2718_v28 }
 0x304   : > { %2731 = vadd.xlane.f32.xlu1 %v2730_v30 }
 0x305   : > { %2727 = vadd.xlane.f32.xlu0 %v2726_v25 }
 0x308   : > { %2739 = vadd.xlane.f32.xlu1 %v2738_v10 }
 0x309   : > { %2735 = vadd.xlane.f32.xlu0 %v2734_v63 }
 0x30c   : > { %2747 = vadd.xlane.f32.xlu1 %v2746_v6 }
 0x30d   : > { %2743 = vadd.xlane.f32.xlu0 %v2742_v47 }
 0x310   : > { %2755 = vadd.xlane.f32.xlu1 %v2754_v54 }
 0x311   : > { %2751 = vadd.xlane.f32.xlu0 %v2750_v3 }
 0x33d   : > { %v2518_v53 = vpop.xlane.xlu1 %2517 }
 0x33e   : > { %v2510_v52 = vpop.xlane.xlu0 %2509  ;;  %v5189_v4 = vmul.f32 0.0051020407, %v2518_v53 }
 0x33f   : > { %v5185_v20 = vmul.f32 0.0051020407, %v2510_v52 }
 0x340   : > { %v2809_v28 = vmul.f32 %v5189_v4, %v5189_v4 }
 0x341   : > { %v2522_v34 = vpop.xlane.xlu1 %2521  ;;  %v2807_v8 = vmul.f32 %v5185_v20, %v5185_v20 }
 0x342   : > { %v2514_v57 = vpop.xlane.xlu0 %2513  ;;  %v5201_v12 = vmul.f32 0.0051020407, %v2522_v34 }
 0x343   : > { %v5195_v13 = vmul.f32 0.0051020407, %v2514_v57 }
 0x344   : > { %v2810_v43 = vmul.f32 %v5201_v12, %v5201_v12 }
 0x345   : > { %v2530_v31 = vpop.xlane.xlu1 %2529  ;;  %v2808_v30 = vmul.f32 %v5195_v13, %v5195_v13 }
 0x346   : > { %v2526_v33 = vpop.xlane.xlu0 %2525  ;;  %v5209_v63 = vmul.f32 0.0051020407, %v2530_v31 }
 0x347   : > { %v5199_v11 = vmul.f32 0.0051020407, %v2526_v33 }
 0x348   : > { %v2812_v44 = vmul.f32 %v5209_v63, %v5209_v63 }
 0x349   : > { %v5153_v58 = vpop.xlane.xlu1 %2537  ;;  %v2811_v32 = vmul.f32 %v5199_v11, %v5199_v11 }
 0x34a   : > { %v2534_v48 = vpop.xlane.xlu0 %2533 }
 0x34b   : > { %v5211_v47 = vmul.f32 0.0051020407, %v2534_v48  ;;  %v2882_v48 = vld [vmem:[%s5839_s3] sm:$0xff] }
 0x34d   : > { %v5155_v49 = vpop.xlane.xlu1 %2545  ;;  %v2813_v31 = vmul.f32 %v5211_v47, %v5211_v47 }
 0x34e   : > { %v5157_v60 = vpop.xlane.xlu0 %2541 }
 0x351   : > { %v5159_v1 = vpop.xlane.xlu1 %2553 }
 0x352   : > { %v5161_v46 = vpop.xlane.xlu0 %2549 }
 0x355   : > { %v5163_v5 = vpop.xlane.xlu1 %2561 }
 0x356   : > { %v5165_v59 = vpop.xlane.xlu0 %2557 }
 0x359   : > { %v5167_v7 = vpop.xlane.xlu1 %2569 }
 0x35a   : > { %v5169_v17 = vpop.xlane.xlu0 %2565 }
 0x35d   : > { %v5171_v38 = vpop.xlane.xlu1 %2577 }
 0x35e   : > { %v5173_v0 = vpop.xlane.xlu0 %2573 }
 0x361   : > { %v5175_v19 = vpop.xlane.xlu1 %2585 }
 0x362   : > { %v5177_v9 = vpop.xlane.xlu0 %2581 }
 0x365   : > { %v5179_v16 = vpop.xlane.xlu1 %2593 }
 0x366   : > { %v5181_v21 = vpop.xlane.xlu0 %2589 }
 0x369   : > { %v5183_v55 = vpop.xlane.xlu1 %2601 }
 0x36a   : > { %v5187_v40 = vpop.xlane.xlu0 %2597 }
 0x36d   : > { %v2660_v50 = vpop.xlane.xlu1 %2659 }
 0x36e   : > { %v2782_v18 = vmul.f32 0.0051020407, %v2660_v50  ;;  %v5193_v29 = vpop.xlane.xlu0 %2605  ;;  %v5221_v50 = vmul.f32 0.0051020407, %v5153_v58 }
 0x370   : > { %v2832_v14 = vsub.f32 %v2782_v18, %v2807_v8  ;;  %v5224_v8 = vmul.f32 0.0051020407, %v5155_v49  ;;  %v2814_v58 = vmul.f32 %v5221_v50, %v5221_v50 }
 0x371   : > { %v2668_v26 = vpop.xlane.xlu1 %2667 }
 0x372   : > { %v2857_v37 = vmax.f32 %v2832_v14, 0.0  ;;  %v2784_v24 = vmul.f32 0.0051020407, %v2668_v26  ;;  %v2664_v2 = vpop.xlane.xlu0 %2663  ;;  %v2816_v49 = vmul.f32 %v5224_v8, %v5224_v8 }
 0x373   : > { %v2783_v23 = vmul.f32 0.0051020407, %v2664_v2 }
 0x374   : > { %v2907_v25 = vadd.f32 1e-05, %v2857_v37  ;;  %v2834_v45 = vsub.f32 %v2784_v24, %v2809_v28 }
 0x375   : > { %v2833_v39 = vsub.f32 %v2783_v23, %v2808_v30  ;;  %v2676_v51 = vpop.xlane.xlu1 %2675  ;;  %v5229_v30 = vmul.f32 0.0051020407, %v5157_v60 }
 0x376   : > { %4055 = vrsqrt.f32 %v2907_v25  ;;  %v2859_v27 = vmax.f32 %v2834_v45, 0.0  ;;  %v2786_v41 = vmul.f32 0.0051020407, %v2676_v51  ;;  %v2672_v10 = vpop.xlane.xlu0 %2671  ;;  %v5236_v25 = vmul.f32 0.0051020407, %v5159_v1 }
 0x377   : > { %v2858_v62 = vmax.f32 %v2833_v39, 0.0  ;;  %v2785_v56 = vmul.f32 0.0051020407, %v2672_v10  ;;  %v2883_v39 = vld [vmem:[%s5839_s3 + $0x8] sm:$0xff]  ;;  %v5245_v1 = vmul.f32 0.0051020407, %v5161_v46 }
 0x378   : > { %v2836_v35 = vsub.f32 %v2786_v41, %v2811_v32  ;;  %v2909_v36 = vadd.f32 1e-05, %v2859_v27 }
 0x379   : > { %v2908_v61 = vadd.f32 1e-05, %v2858_v62  ;;  %v2835_v6 = vsub.f32 %v2785_v56, %v2810_v43  ;;  %v2684_v15 = vpop.xlane.xlu1 %2683  ;;  %v2815_v62 = vmul.f32 %v5229_v30, %v5229_v30  ;;  %v5248_v56 = vmul.f32 0.0051020407, %v5163_v5 }
 0x37a   : > { %v2680_v42 = vpop.xlane.xlu0 %2679  ;;  %v2861_v3 = vmax.f32 %v2836_v35, 0.0  ;;  %v2788_v53 = vmul.f32 0.0051020407, %v2684_v15 }
 0x37b   : > { %4057 = vrsqrt.f32 %v2908_v61  ;;  %v2860_v22 = vmax.f32 %v2835_v6, 0.0  ;;  %v2787_v54 = vmul.f32 0.0051020407, %v2680_v42  ;;  %v2818_v6 = vmul.f32 %v5236_v25, %v5236_v25 }
 0x37c   : > { %4059 = vrsqrt.f32 %v2909_v36  ;;  %v2911_v14 = vadd.f32 1e-05, %v2861_v3  ;;  %v2838_v26 = vsub.f32 %v2788_v53, %v2813_v31  ;;  %v5263_v31 = vmul.f32 0.0051020407, %v5165_v59 }
 0x37d   : > { %v2910_v52 = vadd.f32 1e-05, %v2860_v22  ;;  %v2837_v34 = vsub.f32 %v2787_v54, %v2812_v44  ;;  %v2692_v57 = vpop.xlane.xlu1 %2691  ;;  %v2884_v44 = vld [vmem:[%s5839_s3 + $0x10] sm:$0xff] }
 0x37e   : > { %v2688_v33 = vpop.xlane.xlu0 %2687  ;;  %v2863_v51 = vmax.f32 %v2838_v26, 0.0  ;;  %v2790_v60 = vmul.f32 0.0051020407, %v2692_v57  ;;  %v2820_v57 = vmul.f32 %v5248_v56, %v5248_v56 }
 0x37f   : > { %4061 = vrsqrt.f32 %v2910_v52  ;;  %v2862_v28 = vmax.f32 %v2837_v34, 0.0  ;;  %v2789_v37 = vmul.f32 0.0051020407, %v2688_v33  ;;  %v2817_v34 = vmul.f32 %v5245_v1, %v5245_v1 }
 0x380   : > { %v4056_v18 = vpop.eup %4055  ;;  %4063 = vrsqrt.f32 %v2911_v14  ;;  %v2913_v22 = vadd.f32 1e-05, %v2863_v51  ;;  %v2840_v54 = vsub.f32 %v2790_v60, %v2815_v62  ;;  %v5268_v14 = vmul.f32 0.0051020407, %v5167_v7 }
 0x381   : > { %v2700_v24 = vpop.xlane.xlu1 %2699  ;;  %v5226_v2 = vmul.f32 %v4056_v18, %v2882_v48  ;;  %v2912_v27 = vadd.f32 1e-05, %v2862_v28  ;;  %v2839_v41 = vsub.f32 %v2789_v37, %v2814_v58  ;;  %v2885_v37 = vld [vmem:[%s5839_s3 + $0x18] sm:$0xff]  ;;  %v2819_v7 = vmul.f32 %v5263_v31, %v5263_v31 }
 0x382   : > { %v2696_v23 = vpop.xlane.xlu0 %2695  ;;  %v2792_v46 = vmul.f32 0.0051020407, %v2700_v24  ;;  %v2865_v24 = vmax.f32 %v2840_v54, 0.0  ;;  %v5277_v51 = vmul.f32 0.0051020407, %v5169_v17 }
 0x383   : > { %v2791_v45 = vmul.f32 0.0051020407, %v2696_v23  ;;  %3059 = vperm.xlu0 %4053, %v5226_v2   ;;  %4065 = vrsqrt.f32 %v2912_v27  ;;  %v2864_v5 = vmax.f32 %v2839_v41, 0.0  ;;  %v5280_v60 = vmul.f32 0.0051020407, %v5171_v38 }
 0x384   : > { %v2842_v23 = vsub.f32 %v2792_v46, %v2817_v34  ;;  %v5295_v46 = vmul.f32 0.0051020407, %v5173_v0  ;;  %v5303_v34 = vmul.f32 0.0051020407, %v5175_v19  ;;  %v5309_v0 = vmul.f32 0.0051020407, %v5177_v9 }
 0x385   : > { %v4058_v32 = vpop.eup %4057  ;;  %v2841_v10 = vsub.f32 %v2791_v45, %v2816_v49  ;;  %v2708_v43 = vpop.xlane.xlu1 %2707  ;;  %v2914_v59 = vadd.f32 1e-05, %v2864_v5  ;;  %v2824_v54 = vmul.f32 %v5280_v60, %v5280_v60 }
 0x386   : > { %v2704_v35 = vpop.xlane.xlu0 %2703  ;;  %v5250_v36 = vmul.f32 %v4058_v32, %v2883_v39  ;;  %v4060_v61 = vpop.eup %4059  ;;  %v2794_v58 = vmul.f32 0.0051020407, %v2708_v43  ;;  %v2867_v17 = vmax.f32 %v2842_v23, 0.0 }
 0x387   : > { %v2866_v15 = vmax.f32 %v2841_v10, 0.0  ;;  %v2793_v42 = vmul.f32 0.0051020407, %v2704_v35  ;;  %v5265_v48 = vmul.f32 %v4060_v61, %v2884_v44  ;;  %v2822_v10 = vmul.f32 %v5268_v14, %v5268_v14  ;;  %v2886_v35 = vld [vmem:[%s5839_s3 + $0x20] sm:$0xff] }
 0x388   : > { %3064 = vperm.xlu1 %4054, %v5250_v36   ;;  %v2915_v61 = vadd.f32 1e-05, %v2865_v24  ;;  %v2844_v38 = vsub.f32 %v2794_v58, %v2819_v7  ;;  %v2917_v24 = vadd.f32 1e-05, %v2867_v17 }
 0x389   : > { %v2916_v3 = vadd.f32 1e-05, %v2866_v15  ;;  %v2843_v53 = vsub.f32 %v2793_v42, %v2818_v6  ;;  %v2716_v52 = vpop.xlane.xlu1 %2715  ;;  %v4062_v18 = vpop.eup %4061 }
 0x38a   : > { %v2712_v33 = vpop.xlane.xlu0 %2711  ;;  %v5282_v27 = vmul.f32 %v4062_v18, %v2885_v37  ;;  %v4064_v41 = vpop.eup %4063  ;;  %v2796_v6 = vmul.f32 0.0051020407, %v2716_v52  ;;  %v2891_v18 = vld [vmem:[%s5839_s3 + $0x48] sm:$0xff]  ;;  %v2869_v23 = vmax.f32 %v2844_v38, 0.0 }
 0x38b   : > { %4067 = vrsqrt.f32 %v2916_v3  ;;  %v2868_v26 = vmax.f32 %v2843_v53, 0.0  ;;  %v2795_v28 = vmul.f32 0.0051020407, %v2712_v33  ;;  %v5297_v3 = vmul.f32 %v4064_v41, %v2886_v35  ;;  %v2887_v53 = vld [vmem:[%s5839_s3 + $0x28] sm:$0xff] }
 0x38c   : > { %4069 = vrsqrt.f32 %v2913_v22  ;;  %3069 = vperm.xlu1 %4054, %v5265_v48   ;;  %v2821_v22 = vmul.f32 %v5277_v51, %v5277_v51  ;;  %v2825_v35 = vmul.f32 %v5309_v0, %v5309_v0 }
 0x38d   : > { %v2918_v49 = vadd.f32 1e-05, %v2868_v26  ;;  %v2845_v45 = vsub.f32 %v2795_v28, %v2820_v57  ;;  %v2724_v39 = vpop.xlane.xlu1 %2723  ;;  %v4066_v52 = vpop.eup %4065 }
 0x38e   : > { %v2720_v32 = vpop.xlane.xlu0 %2719  ;;  %v2846_v26 = vsub.f32 %v2796_v6, %v2821_v22  ;;  %v2798_v28 = vmul.f32 0.0051020407, %v2724_v39  ;;  %v2826_v39 = vmul.f32 %v5303_v34, %v5303_v34 }
 0x38f   : > { %4071 = vrsqrt.f32 %v2918_v49  ;;  %v2870_v43 = vmax.f32 %v2845_v45, 0.0  ;;  %v2797_v62 = vmul.f32 0.0051020407, %v2720_v32  ;;  %v2823_v49 = vmul.f32 %v5295_v46, %v5295_v46 }
 0x390   : > { %3074 = vperm.xlu1 %4054, %v5282_v27   ;;  %4073 = vrsqrt.f32 %v2914_v59  ;;  %v5315_v45 = vmul.f32 0.0051020407, %v5179_v16  ;;  %v5317_v32 = vmul.f32 %v4066_v52, %v2887_v53  ;;  %v2893_v16 = vld [vmem:[%s5839_s3 + $0x58] sm:$0xff] }
 0x391   : > { %v2920_v15 = vadd.f32 1e-05, %v2870_v43  ;;  %v2847_v42 = vsub.f32 %v2797_v62, %v2822_v10  ;;  %v2732_v44 = vpop.xlane.xlu1 %2731  ;;  %v2888_v62 = vld [vmem:[%s5839_s3 + $0x30] sm:$0xff]  ;;  %v2848_v17 = vsub.f32 %v2798_v28, %v2823_v49 }
 0x392   : > { %v2728_v5 = vpop.xlane.xlu0 %2727  ;;  %v2800_v6 = vmul.f32 0.0051020407, %v2732_v44  ;;  %v2889_v44 = vld [vmem:[%s5839_s3 + $0x38] sm:$0xff] }
 0x393   : > { %4075 = vrsqrt.f32 %v2920_v15  ;;  %v2872_v57 = vmax.f32 %v2847_v42, 0.0  ;;  %v2799_v33 = vmul.f32 0.0051020407, %v2728_v5  ;;  %v2919_v15 = vadd.f32 1e-05, %v2869_v23 }
 0x394   : > { %4077 = vrsqrt.f32 %v2915_v61  ;;  %3079 = vperm.xlu1 %4054, %v5297_v3   ;;  %v2871_v61 = vmax.f32 %v2846_v26, 0.0  ;;  %v5336_v5 = vmul.f32 0.0051020407, %v5181_v21  ;;  %v2895_v21 = vld [vmem:[%s5839_s3 + $0x68] sm:$0xff]  ;;  %v2850_v23 = vsub.f32 %v2800_v6, %v2825_v35 }
 0x395   : > { %v4068_v37 = vpop.eup %4067  ;;  %v2922_v19 = vadd.f32 1e-05, %v2872_v57  ;;  %v2849_v59 = vsub.f32 %v2799_v33, %v2824_v54  ;;  %v2740_v7 = vpop.xlane.xlu1 %2739  ;;  %v2828_v54 = vmul.f32 %v5315_v45, %v5315_v45 }
 0x396   : > { %v4070_v58 = vpop.eup %4069  ;;  %v2736_v9 = vpop.xlane.xlu0 %2735  ;;  %v5319_v41 = vmul.f32 %v4068_v37, %v2891_v18  ;;  %v5346_v18 = vmul.f32 0.0051020407, %v5183_v55  ;;  %v2921_v37 = vadd.f32 1e-05, %v2871_v61 }
 0x397   : > { %4079 = vrsqrt.f32 %v2922_v19  ;;  %v2874_v10 = vmax.f32 %v2849_v59, 0.0  ;;  %v2801_v43 = vmul.f32 0.0051020407, %v2736_v9  ;;  %v5338_v52 = vmul.f32 %v4070_v58, %v2888_v62 }
 0x398   : > { %3084 = vperm.xlu1 %4054, %v5317_v32   ;;  %3104 = vperm.xlu0 %4053, %v5319_v41   ;;  %4081 = vrsqrt.f32 %v2917_v24  ;;  %v2873_v24 = vmax.f32 %v2848_v17, 0.0  ;;  %v2802_v58 = vmul.f32 0.0051020407, %v2740_v7  ;;  %v2830_v35 = vmul.f32 %v5346_v18, %v5346_v18  ;;  %v2890_v17 = vld [vmem:[%s5839_s3 + $0x40] sm:$0xff] }
 0x399   : > { %v4072_v38 = vpop.eup %4071  ;;  %v2924_v42 = vadd.f32 1e-05, %v2874_v10  ;;  %v2851_v22 = vsub.f32 %v2801_v43, %v2826_v39  ;;  %v2748_v19 = vpop.xlane.xlu1 %2747  ;;  %v2827_v39 = vmul.f32 %v5336_v5, %v5336_v5  ;;  %v5356_v10 = vmul.f32 0.0051020407, %v5187_v40  ;;  %v2897_v40 = vld [vmem:[%s5839_s3 + $0x78] sm:$0xff] }
 0x39a   : > { %v2744_v53 = vpop.xlane.xlu0 %2743  ;;  %v5340_v57 = vmul.f32 %v4072_v38, %v2893_v16  ;;  %v4074_v33 = vpop.eup %4073  ;;  %v2923_v6 = vadd.f32 1e-05, %v2873_v24  ;;  %v2875_v38 = vmax.f32 %v2850_v23, 0.0  ;;  %v2892_v23 = vld [vmem:[%s5839_s3 + $0x50] sm:$0xff] }
 0x39b   : > { %4083 = vrsqrt.f32 %v2924_v42  ;;  %v2876_v26 = vmax.f32 %v2851_v22, 0.0  ;;  %v2803_v28 = vmul.f32 0.0051020407, %v2744_v53  ;;  %v5358_v62 = vmul.f32 %v4074_v33, %v2889_v44 }
 0x39c   : > { %3089 = vperm.xlu1 %4054, %v5338_v52   ;;  %3114 = vperm.xlu0 %4053, %v5340_v57   ;;  %4085 = vrsqrt.f32 %v2919_v15  ;;  %v2852_v42 = vsub.f32 %v2802_v58, %v2827_v39  ;;  %v2804_v22 = vmul.f32 0.0051020407, %v2748_v19  ;;  %v2899_v19 = vld [vmem:[%s5839_s3 + $0x88] sm:$0xff] }
 0x39d   : > { %v4076_v59 = vpop.eup %4075  ;;  %v2926_v55 = vadd.f32 1e-05, %v2876_v26  ;;  %v2853_v49 = vsub.f32 %v2803_v28, %v2828_v54  ;;  %v2756_v44 = vpop.xlane.xlu1 %2755 }
 0x39e   : > { %v4078_v9 = vpop.eup %4077  ;;  %v2752_v43 = vpop.xlane.xlu0 %2751  ;;  %v5360_v16 = vmul.f32 %v4076_v59, %v2895_v21  ;;  %v2829_v21 = vmul.f32 %v5356_v10, %v5356_v10  ;;  %v2925_v59 = vadd.f32 1e-05, %v2875_v38 }
 0x39f   : > { %4087 = vrsqrt.f32 %v2926_v55  ;;  %v2878_v61 = vmax.f32 %v2853_v49, 0.0  ;;  %v2805_v7 = vmul.f32 0.0051020407, %v2752_v43  ;;  %v5372_v33 = vmul.f32 %v4078_v9, %v2890_v17  ;;  %v2901_v17 = vld [vmem:[%s5839_s3 + $0x98] sm:$0xff] }
 0x3a0   : > { %4089 = vrsqrt.f32 %v2921_v37  ;;  %3094 = vperm.xlu1 %4054, %v5358_v62   ;;  %3124 = vperm.xlu0 %4053, %v5360_v16   ;;  %v5379_v37 = vmul.f32 0.0051020407, %v5193_v29  ;;  %v2877_v55 = vmax.f32 %v2852_v42, 0.0  ;;  %v2854_v29 = vsub.f32 %v2804_v22, %v2829_v21 }
 0x3a1   : > { %v4080_v15 = vpop.eup %4079  ;;  %v2928_v54 = vadd.f32 1e-05, %v2878_v61  ;;  %v2855_v53 = vsub.f32 %v2805_v7, %v2830_v35  ;;  %v2806_v49 = vmul.f32 0.0051020407, %v2756_v44  ;;  %v2894_v7 = vld [vmem:[%s5839_s3 + $0x60] sm:$0xff]  ;;  %v2903_v44 = vld [vmem:[%s5839_s3 + $0xa8] sm:$0xff] }
 0x3a2   : > { %v5374_v26 = vmul.f32 %v4080_v15, %v2897_v40  ;;  %v4082_v28 = vpop.eup %4081  ;;  %v2831_v61 = vmul.f32 %v5379_v37, %v5379_v37  ;;  %v2879_v38 = vmax.f32 %v2854_v29, 0.0 }
 0x3a3   : > { %4091 = vrsqrt.f32 %v2928_v54  ;;  %v2880_v24 = vmax.f32 %v2855_v53, 0.0  ;;  %v5389_v39 = vmul.f32 %v4082_v28, %v2892_v23  ;;  %v2896_v53 = vld [vmem:[%s5839_s3 + $0x70] sm:$0xff] }
 0x3a4   : > { %4093 = vrsqrt.f32 %v2923_v6  ;;  %3099 = vperm.xlu1 %4054, %v5372_v33   ;;  %3134 = vperm.xlu0 %4053, %v5374_v26   ;;  %v2927_v6 = vadd.f32 1e-05, %v2877_v55  ;;  %v2856_v15 = vsub.f32 %v2806_v49, %v2831_v61  ;;  %v2929_v21 = vadd.f32 1e-05, %v2879_v38  ;;  %v2905_v55 = vld [vmem:[%s5839_s3 + $0xb8] sm:$0xff] }
 0x3a5   : > { %v4084_v58 = vpop.eup %4083  ;;  %v2930_v9 = vadd.f32 1e-05, %v2880_v24  ;;  %v3007_v61 = vmul.f32 %v5226_v2, %v5185_v20  ;;  %v3009_v20 = vmul.f32 %v5265_v48, %v5189_v4  ;;  %v2904_v4 = vld [vmem:[%s5839_s3 + $0xb0] sm:$0xff]  ;;  %v2986_v48 = vld [vmem:[%s5840_s4 + $0x20] sm:$0xff] }
 0x3a6   : > { %v5391_v43 = vmul.f32 %v4084_v58, %v2899_v19  ;;  %v4086_v35 = vpop.eup %4085  ;;  %v2881_v24 = vmax.f32 %v2856_v15, 0.0  ;;  %v2898_v58 = vld [vmem:[%s5839_s3 + $0x80] sm:$0xff] }
 0x3a7   : > { %4095 = vrsqrt.f32 %v2930_v9  ;;  %v5403_v22 = vmul.f32 %v4086_v35, %v2894_v7  ;;  %v2902_v15 = vld [vmem:[%s5839_s3 + $0xa0] sm:$0xff] }
 0x3a8   : > { %3109 = vperm.xlu1 %4054, %v5389_v39   ;;  %3144 = vperm.xlu0 %4053, %v5391_v43   ;;  %4097 = vrsqrt.f32 %v2925_v59  ;;  %v2931_v49 = vadd.f32 1e-05, %v2881_v24 }
 0x3a9   : > { %v4088_v40 = vpop.eup %4087  ;;  %4099 = vrsqrt.f32 %v2927_v6 }
 0x3aa   : > { %v4090_v42 = vpop.eup %4089  ;;  %v5405_v54 = vmul.f32 %v4088_v40, %v2901_v17  ;;  %4101 = vrsqrt.f32 %v2929_v21  ;;  %v2900_v17 = vld [vmem:[%s5839_s3 + $0x90] sm:$0xff]  ;;  %v2982_v40 = vld [vmem:[%s5840_s4] sm:$0xff] }
 0x3ab   : > { %v5415_v19 = vmul.f32 %v4090_v42, %v2896_v53  ;;  %4103 = vrsqrt.f32 %v2931_v49  ;;  %v3032_v38 = vsub.f32 %v2982_v40, %v3007_v61  ;;  %v2984_v42 = vld [vmem:[%s5840_s4 + $0x10] sm:$0xff]  ;;  %v3008_v61 = vmul.f32 %v5250_v36, %v5195_v13 }
 0x3ac   : > { %3119 = vperm.xlu1 %4054, %v5403_v22   ;;  %3154 = vperm.xlu0 %4053, %v5405_v54   ;;  %v3017_v13 = vmul.f32 %v5389_v39, %v5245_v1  ;;  %v2992_v36 = vld [vmem:[%s5840_s4 + $0x50] sm:$0xff]  ;;  %v2987_v1 = vld [vmem:[%s5840_s4 + $0x28] sm:$0xff] }
 0x3ad   : > { %v4092_v28 = vpop.eup %4091 }
 0x3ae   : > { %v4094_v23 = vpop.eup %4093  ;;  %v5417_v59 = vmul.f32 %v4092_v28, %v2903_v44  ;;  %v3034_v44 = vsub.f32 %v2984_v42, %v3009_v20  ;;  %v3011_v28 = vmul.f32 %v5297_v3, %v5199_v11  ;;  %v2906_v11 = vld [vmem:[%s5839_s3 + $0xc0] sm:$0xff]  ;;  %v2988_v3 = vld [vmem:[%s5840_s4 + $0x30] sm:$0xff]  ;;  %v3042_v20 = vsub.f32 %v2992_v36, %v3017_v13 }
 0x3af   : > { %v5427_v9 = vmul.f32 %v4094_v23, %v2898_v58  ;;  %v3013_v58 = vmul.f32 %v5338_v52, %v5211_v47  ;;  %v3015_v47 = vmul.f32 %v5372_v33, %v5229_v30  ;;  %v2983_v52 = vld [vmem:[%s5840_s4 + $0x8] sm:$0xff]  ;;  %v2985_v30 = vld [vmem:[%s5840_s4 + $0x18] sm:$0xff]  ;;  %v3014_v42 = vmul.f32 %v5358_v62, %v5221_v50  ;;  %v2998_v62 = vld [vmem:[%s5840_s4 + $0x80] sm:$0xff] }
 0x3b0   : > { %3129 = vperm.xlu1 %4054, %v5415_v19   ;;  %3164 = vperm.xlu0 %4053, %v5417_v59   ;;  %v3036_v23 = vsub.f32 %v2986_v48, %v3011_v28  ;;  %v3016_v28 = vmul.f32 %v5319_v41, %v5224_v8  ;;  %v3000_v41 = vld [vmem:[%s5840_s4 + $0x90] sm:$0xff] }
 0x3b1   : > { %v4096_v29 = vpop.eup %4095  ;;  %v3038_v49 = vsub.f32 %v2988_v3, %v3013_v58  ;;  %v3023_v50 = vmul.f32 %v5427_v9, %v5295_v46  ;;  %v2993_v46 = vld [vmem:[%s5840_s4 + $0x58] sm:$0xff] }
 0x3b2   : > { %v5429_v35 = vmul.f32 %v4096_v29, %v2905_v55  ;;  %v4098_v7 = vpop.eup %4097 }
 0x3b3   : > { %v5441_v6 = vmul.f32 %v4098_v7, %v2900_v17  ;;  %v4100_v2 = vpop.eup %4099  ;;  %v2990_v7 = vld [vmem:[%s5840_s4 + $0x40] sm:$0xff]  ;;  %v3033_v17 = vsub.f32 %v2983_v52, %v3008_v61  ;;  %v3003_v61 = vld [vmem:[%s5840_s4 + $0xa8] sm:$0xff] }
 0x3b4   : > { %3139 = vperm.xlu1 %4054, %v5427_v9   ;;  %3174 = vperm.xlu0 %4053, %v5429_v35   ;;  %v5452_v53 = vmul.f32 %v4100_v2, %v2902_v15  ;;  %v4102_v21 = vpop.eup %4101  ;;  %v3040_v40 = vsub.f32 %v2990_v7, %v3015_v47  ;;  %v3012_v2 = vmul.f32 %v5317_v32, %v5209_v63  ;;  %v2996_v32 = vld [vmem:[%s5840_s4 + $0x70] sm:$0xff]  ;;  %v3005_v47 = vld [vmem:[%s5840_s4 + $0xb8] sm:$0xff] }
 0x3b5   : > { %v5463_v24 = vmul.f32 %v4102_v21, %v2904_v4  ;;  %v4104_v55 = vpop.eup %4103  ;;  %v3021_v63 = vmul.f32 %v5415_v19, %v5277_v51  ;;  %v2991_v51 = vld [vmem:[%s5840_s4 + $0x48] sm:$0xff]  ;;  %v3048_v21 = vsub.f32 %v2998_v62, %v3023_v50  ;;  %v3018_v4 = vmul.f32 %v5340_v57, %v5236_v25  ;;  %v3002_v57 = vld [vmem:[%s5840_s4 + $0xa0] sm:$0xff] }
 0x3b6   : > { %v5474_v29 = vmul.f32 %v4104_v55, %v2906_v11  ;;  %v3037_v39 = vsub.f32 %v2987_v1, %v3012_v2  ;;  %v3041_v19 = vsub.f32 %v2991_v51, %v3016_v28  ;;  %v3025_v8 = vmul.f32 %v5441_v6, %v5309_v0  ;;  %v2995_v0 = vld [vmem:[%s5840_s4 + $0x68] sm:$0xff] }
 0x3b7   : > { %v3043_v9 = vsub.f32 %v2993_v46, %v3018_v4  ;;  %v3027_v25 = vmul.f32 %v5452_v53, %v5336_v5  ;;  %v3022_v55 = vmul.f32 %v5374_v26, %v5268_v14  ;;  %v2997_v5 = vld [vmem:[%s5840_s4 + $0x78] sm:$0xff]  ;;  %v3006_v26 = vld [vmem:[%s5840_s4 + $0xc0] sm:$0xff]  ;;  %v4108_v4 = vld [vmem:[#allocation2 + $0x28] sm:$0xff] }
 0x3b8   : > { %3149 = vperm.xlu1 %4054, %v5441_v6   ;;  %3234 = vperm.xlu0 %4053, %v3032_v38   ;;  %v3010_v38 = vmul.f32 %v5282_v27, %v5201_v12  ;;  %v3019_v12 = vmul.f32 %v5403_v22, %v5263_v31  ;;  %v2994_v27 = vld [vmem:[%s5840_s4 + $0x60] sm:$0xff]  ;;  %v2989_v31 = vld [vmem:[%s5840_s4 + $0x38] sm:$0xff]  ;;  %v3050_v48 = vsub.f32 %v3000_v41, %v3025_v8 }
 0x3b9   : > { %v3039_v22 = vsub.f32 %v2989_v31, %v3014_v42  ;;  %v3052_v58 = vsub.f32 %v3002_v57, %v3027_v25  ;;  %v3047_v11 = vsub.f32 %v2997_v5, %v3022_v55  ;;  %v3031_v14 = vmul.f32 %v5474_v29, %v5379_v37  ;;  %v4105_v31 = vld [vmem:[#allocation2] sm:$0xff] }
 0x3ba   : > { %v3035_v33 = vsub.f32 %v2985_v30, %v3010_v38  ;;  %v3044_v15 = vsub.f32 %v2994_v27, %v3019_v12  ;;  %v3028_v37 = vmul.f32 %v5417_v59, %v5315_v45  ;;  %v4111_v5 = vld [vmem:[#allocation2 + $0x60] sm:$0xff] }
 0x3bc   : > { %3159 = vperm.xlu1 %4054, %v5452_v53   ;;  %3244 = vperm.xlu0 %4053, %v3034_v44   ;;  %v3046_v44 = vsub.f32 %v2996_v32, %v3021_v63  ;;  %v3024_v53 = vmul.f32 %v5391_v43, %v5280_v60  ;;  %v3056_v60 = vsub.f32 %v3006_v26, %v3031_v14  ;;  %v3001_v43 = vld [vmem:[%s5840_s4 + $0x98] sm:$0xff] }
 0x3c0   : > { %3169 = vperm.xlu1 %4054, %v5463_v24   ;;  %3254 = vperm.xlu0 %4053, %v3036_v23   ;;  %v3020_v23 = vmul.f32 %v5360_v16, %v5248_v56  ;;  %v3029_v56 = vmul.f32 %v5463_v24, %v5356_v10  ;;  %v3004_v16 = vld [vmem:[%s5840_s4 + $0xb0] sm:$0xff]  ;;  %v2999_v10 = vld [vmem:[%s5840_s4 + $0x88] sm:$0xff]  ;;  %v3026_v24 = vmul.f32 %v5405_v54, %v5303_v34 }
 0x3c1   : > { %v3030_v34 = vmul.f32 %v5429_v35, %v5346_v18  ;;  %v3053_v54 = vsub.f32 %v3003_v61, %v3028_v37  ;;  %v4115_v37 = vld [vmem:[#allocation2 + $0x80] sm:$0xff]  ;;  %v4116_v61 = vld [vmem:[#allocation2 + $0x88] sm:$0xff] }
 0x3c2   : > { %v3045_v6 = vsub.f32 %v2995_v0, %v3020_v23  ;;  %v3054_v3 = vsub.f32 %v3004_v16, %v3029_v56  ;;  %v4109_v23 = vld [vmem:[#allocation2 + $0x40] sm:$0xff]  ;;  %v4110_v0 = vld [vmem:[#allocation2 + $0x48] sm:$0xff] }
 0x3c3   : > { %v3055_v52 = vsub.f32 %v3005_v47, %v3030_v34 }
 0x3c4   : > { %3179 = vperm.xlu1 %4054, %v5474_v29   ;;  %3264 = vperm.xlu0 %4053, %v3038_v49   ;;  %v3049_v49 = vsub.f32 %v2999_v10, %v3024_v53  ;;  %v3051_v29 = vsub.f32 %v3001_v43, %v3026_v24  ;;  %v4112_v53 = vld [vmem:[#allocation2 + $0x68] sm:$0xff]  ;;  %v4113_v24 = vld [vmem:[#allocation2 + $0x10] sm:$0xff] }
 0x3c8   : > { %3239 = vperm.xlu1 %4054, %v3033_v17   ;;  %3274 = vperm.xlu0 %4053, %v3040_v40  }
 0x3cc   : > { %3249 = vperm.xlu1 %4054, %v3035_v33   ;;  %3284 = vperm.xlu0 %4053, %v3042_v20  }
 0x3d0   : > { %3259 = vperm.xlu1 %4054, %v3037_v39   ;;  %3294 = vperm.xlu0 %4053, %v3044_v15  }
 0x3d4   : > { %3269 = vperm.xlu1 %4054, %v3039_v22   ;;  %3304 = vperm.xlu0 %4053, %v3046_v44   ;;  %v4106_v22 = vld [vmem:[#allocation2 + $0x8] sm:$0xff] }
 0x3d8   : > { %3279 = vperm.xlu1 %4054, %v3041_v19   ;;  %3314 = vperm.xlu0 %4053, %v3048_v21   ;;  %v4107_v19 = vld [vmem:[#allocation2 + $0x20] sm:$0xff] }
 0x3dc   : > { %3289 = vperm.xlu1 %4054, %v3043_v9   ;;  %3324 = vperm.xlu0 %4053, %v3050_v48  }
 0x3e0   : > { %3299 = vperm.xlu1 %4054, %v3045_v6   ;;  %3334 = vperm.xlu0 %4053, %v3052_v58  }
 0x3e4   : > { %3309 = vperm.xlu1 %4054, %v3047_v11   ;;  %3344 = vperm.xlu0 %4053, %v3054_v3  }
 0x3e8   : > { %3319 = vperm.xlu1 %4054, %v3049_v49   ;;  %3354 = vperm.xlu0 %4053, %v3056_v60   ;;  %v4114_v60 = vld [vmem:[#allocation2 + $0x18] sm:$0xff] }
 0x3ec   : > { %3329 = vperm.xlu1 %4054, %v3051_v29  }
 0x3f0   : > { %3339 = vperm.xlu1 %4054, %v3053_v54  }
 0x3f4   : > { %3349 = vperm.xlu1 %4054, %v3055_v52  }
 0x402   : > { %v3060_v59 = vpop.permute.xlu0 %3059 }
 0x403   : > { %v3182_v32 = vmul.f32 %v4105_v31, %v3060_v59  ;;  %v3183_v44 = vmul.f32 %v4106_v22, %v3060_v59  ;;  %v4118_v31 = vld [vmem:[#allocation2 + $0x38] sm:$0xff] }
 0x407   : > { %v3065_v7 = vpop.permute.xlu1 %3064 }
 0x408   : > { %v3184_v49 = vmul.f32 %v4113_v24, %v3065_v7  ;;  %v3185_v43 = vmul.f32 %v4114_v60, %v3065_v7  ;;  %v4117_v7 = vld [vmem:[#allocation2 + $0x30] sm:$0xff] }
 0x40b   : > { %v3070_v17 = vpop.permute.xlu1 %3069 }
 0x40c   : > { %v3186_v21 = vmul.f32 %v4107_v19, %v3070_v17  ;;  %v3187_v8 = vmul.f32 %v4108_v4, %v3070_v17  ;;  %v4121_v4 = vld [vmem:[#allocation2 + $0x50] sm:$0xff] }
 0x40f   : > { %v5582_v45 = vpop.permute.xlu1 %3074 }
 0x413   : > { %v3080_v40 = vpop.permute.xlu1 %3079 }
 0x414   : > { %v3190_v25 = vmul.f32 %v4109_v23, %v3080_v40  ;;  %v3191_v57 = vmul.f32 %v4110_v0, %v3080_v40 }
 0x417   : > { %v5584_v38 = vpop.permute.xlu1 %3084  ;;  %v5586_v13 = vpop.permute.xlu0 %3104 }
 0x41b   : > { %v3090_v30 = vpop.permute.xlu1 %3089  ;;  %v5588_v18 = vpop.permute.xlu0 %3114 }
 0x41c   : > { %v3194_v16 = vmul.f32 %v4111_v5, %v3090_v30  ;;  %v3195_v11 = vmul.f32 %v4112_v53, %v3090_v30  ;;  %v3188_v30 = vmul.f32 %v4117_v7, %v5582_v45  ;;  %v4125_v5 = vld [vmem:[#allocation2 + $0x70] sm:$0xff]  ;;  %v4126_v53 = vld [vmem:[#allocation2 + $0x78] sm:$0xff] }
 0x41f   : > { %v5590_v35 = vpop.permute.xlu1 %3094  ;;  %v5592_v36 = vpop.permute.xlu0 %3124 }
 0x423   : > { %v3100_v33 = vpop.permute.xlu1 %3099  ;;  %v5594_v20 = vpop.permute.xlu0 %3134 }
 0x424   : > { %v3198_v29 = vmul.f32 %v4115_v37, %v3100_v33  ;;  %v3199_v34 = vmul.f32 %v4116_v61, %v3100_v33  ;;  %v3189_v33 = vmul.f32 %v4118_v31, %v5582_v45 }
 0x427   : > { %v5596_v2 = vpop.permute.xlu1 %3109  ;;  %v5598_v12 = vpop.permute.xlu0 %3144 }
 0x42b   : > { %v5600_v1 = vpop.permute.xlu1 %3119  ;;  %v5602_v27 = vpop.permute.xlu0 %3154 }
 0x42f   : > { %v5604_v39 = vpop.permute.xlu1 %3129  ;;  %v5606_v15 = vpop.permute.xlu0 %3164 }
 0x433   : > { %v5608_v42 = vpop.permute.xlu1 %3139  ;;  %v5610_v63 = vpop.permute.xlu0 %3174 }
 0x437   : > { %v5612_v28 = vpop.permute.xlu1 %3149  ;;  %v3235_v50 = vpop.permute.xlu0 %3234 }
 0x438   : > { %v3357_v51 = vadd.f32 %v3235_v50, %v3182_v32  ;;  %v3358_v62 = vadd.f32 %v3235_v50, %v3183_v44  ;;  %v4119_v32 = vld [vmem:[#allocation2 + $0xa0] sm:$0xff]  ;;  %v4120_v44 = vld [vmem:[#allocation2 + $0xa8] sm:$0xff] }
 0x439   : > { %v3202_v22 = vmul.f32 %v4119_v32, %v5596_v2  ;;  %v3203_v50 = vmul.f32 %v4120_v44, %v5596_v2 }
 0x43a   : > { %3407 = vst [vmem:[%s5841_s5] sm:$0xff] %v3357_v51  ;;  %3408 = vst.msk [vmem:[%s5841_s5 + $0x8] sm:$0xff] %vm2403_vm3, %v3358_v62 }
 0x43b   : > { %v5621_v46 = vpop.permute.xlu1 %3159  ;;  %v3245_v41 = vpop.permute.xlu0 %3244 }
 0x43c   : > { %v3361_v9 = vadd.f32 %v3245_v41, %v3186_v21  ;;  %v3362_v48 = vadd.f32 %v3245_v41, %v3187_v8  ;;  %v3192_v8 = vmul.f32 %v4121_v4, %v5584_v38  ;;  %v4122_v41 = vld [vmem:[#allocation2 + $0x58] sm:$0xff] }
 0x43e   : > { %3411 = vst [vmem:[%s5841_s5 + $0x20] sm:$0xff] %v3361_v9  ;;  %3412 = vst.msk [vmem:[%s5841_s5 + $0x28] sm:$0xff] %vm2403_vm3, %v3362_v48  ;;  %v3193_v9 = vmul.f32 %v4122_v41, %v5584_v38  ;;  %v4123_v48 = vld [vmem:[#allocation2 + $0xc0] sm:$0xff] }
 0x43f   : > { %v5630_v6 = vpop.permute.xlu1 %3169  ;;  %v3255_v58 = vpop.permute.xlu0 %3254  ;;  %v3206_v23 = vmul.f32 %v4123_v48, %v5600_v1 }
 0x440   : > { %v3365_v55 = vadd.f32 %v3255_v58, %v3190_v25  ;;  %v3366_v56 = vadd.f32 %v3255_v58, %v3191_v57  ;;  %v4124_v25 = vld [vmem:[#allocation2 + $0xc8] sm:$0xff] }
 0x441   : > { %v3207_v0 = vmul.f32 %v4124_v25, %v5600_v1 }
 0x442   : > { %3415 = vst [vmem:[%s5841_s5 + $0x40] sm:$0xff] %v3365_v55  ;;  %3416 = vst.msk [vmem:[%s5841_s5 + $0x48] sm:$0xff] %vm2403_vm3, %v3366_v56 }
 0x443   : > { %v5639_v3 = vpop.permute.xlu1 %3179  ;;  %v3265_v14 = vpop.permute.xlu0 %3264 }
 0x444   : > { %v3369_v10 = vadd.f32 %v3265_v14, %v3194_v16  ;;  %v3370_v26 = vadd.f32 %v3265_v14, %v3195_v11  ;;  %v3196_v16 = vmul.f32 %v4125_v5, %v5590_v35  ;;  %v3197_v11 = vmul.f32 %v4126_v53, %v5590_v35  ;;  %v4127_v14 = vld [vmem:[#allocation2 + $0xe0] sm:$0xff] }
 0x446   : > { %3419 = vst [vmem:[%s5841_s5 + $0x60] sm:$0xff] %v3369_v10  ;;  %3420 = vst.msk [vmem:[%s5841_s5 + $0x68] sm:$0xff] %vm2403_vm3, %v3370_v26  ;;  %v3210_v10 = vmul.f32 %v4127_v14, %v5604_v39  ;;  %v4128_v26 = vld [vmem:[#allocation2 + $0xe8] sm:$0xff] }
 0x447   : > { %v3240_v54 = vpop.permute.xlu1 %3239  ;;  %v3275_v47 = vpop.permute.xlu0 %3274  ;;  %v3211_v24 = vmul.f32 %v4128_v26, %v5604_v39 }
 0x448   : > { %v3359_v52 = vadd.f32 %v3240_v54, %v3184_v49  ;;  %v3360_v17 = vadd.f32 %v3240_v54, %v3185_v43  ;;  %v3373_v59 = vadd.f32 %v3275_v47, %v3198_v29  ;;  %v3374_v40 = vadd.f32 %v3275_v47, %v3199_v34  ;;  %v4129_v29 = vld [vmem:[#allocation2 + $0x90] sm:$0xff]  ;;  %v4130_v34 = vld [vmem:[#allocation2 + $0x98] sm:$0xff]  ;;  %v4131_v47 = vld [vmem:[#allocation2 + $0x100] sm:$0xff] }
 0x449   : > { %v3200_v61 = vmul.f32 %v4129_v29, %v5586_v13  ;;  %v3201_v54 = vmul.f32 %v4130_v34, %v5586_v13 }
 0x44a   : > { %3409 = vst [vmem:[%s5841_s5 + $0x10] sm:$0xff] %v3359_v52  ;;  %3410 = vst.msk [vmem:[%s5841_s5 + $0x18] sm:$0xff] %vm2403_vm3, %v3360_v17  ;;  %v3214_v52 = vmul.f32 %v4131_v47, %v5608_v42  ;;  %v4132_v17 = vld [vmem:[#allocation2 + $0x108] sm:$0xff] }
 0x44b   : > { %3423 = vst [vmem:[%s5841_s5 + $0x80] sm:$0xff] %v3373_v59  ;;  %3424 = vst.msk [vmem:[%s5841_s5 + $0x88] sm:$0xff] %vm2403_vm3, %v3374_v40  ;;  %v3250_v45 = vpop.permute.xlu1 %3249  ;;  %v3285_v2 = vpop.permute.xlu0 %3284  ;;  %v3215_v59 = vmul.f32 %v4132_v17, %v5608_v42 }
 0x44c   : > { %v3363_v51 = vadd.f32 %v3250_v45, %v3188_v30  ;;  %v3364_v62 = vadd.f32 %v3250_v45, %v3189_v33  ;;  %v3377_v19 = vadd.f32 %v3285_v2, %v3202_v22  ;;  %v3378_v21 = vadd.f32 %v3285_v2, %v3203_v50  ;;  %v4133_v33 = vld [vmem:[#allocation2 + $0xb0] sm:$0xff]  ;;  %v4134_v22 = vld [vmem:[#allocation2 + $0xb8] sm:$0xff]  ;;  %v4135_v50 = vld [vmem:[#allocation2 + $0x120] sm:$0xff] }
 0x44d   : > { %v3204_v32 = vmul.f32 %v4133_v33, %v5588_v18  ;;  %v3205_v44 = vmul.f32 %v4134_v22, %v5588_v18  ;;  %v3218_v45 = vmul.f32 %v4135_v50, %v5612_v28  ;;  %v4136_v2 = vld [vmem:[#allocation2 + $0x128] sm:$0xff] }
 0x44e   : > { %3413 = vst [vmem:[%s5841_s5 + $0x30] sm:$0xff] %v3363_v51  ;;  %3414 = vst.msk [vmem:[%s5841_s5 + $0x38] sm:$0xff] %vm2403_vm3, %v3364_v62  ;;  %v3219_v51 = vmul.f32 %v4136_v2, %v5612_v28 }
 0x44f   : > { %3427 = vst [vmem:[%s5841_s5 + $0xa0] sm:$0xff] %v3377_v19  ;;  %3428 = vst.msk [vmem:[%s5841_s5 + $0xa8] sm:$0xff] %vm2403_vm3, %v3378_v21  ;;  %v3260_v38 = vpop.permute.xlu1 %3259  ;;  %v3295_v1 = vpop.permute.xlu0 %3294 }
 0x450   : > { %v3367_v57 = vadd.f32 %v3260_v38, %v3192_v8  ;;  %v3368_v58 = vadd.f32 %v3260_v38, %v3193_v9  ;;  %v3381_v55 = vadd.f32 %v3295_v1, %v3206_v23  ;;  %v3382_v56 = vadd.f32 %v3295_v1, %v3207_v0  ;;  %v4137_v8 = vld [vmem:[#allocation2 + $0xd0] sm:$0xff]  ;;  %v4138_v9 = vld [vmem:[#allocation2 + $0xd8] sm:$0xff]  ;;  %v4139_v23 = vld [vmem:[#allocation2 + $0x140] sm:$0xff] }
 0x451   : > { %v3208_v41 = vmul.f32 %v4137_v8, %v5592_v36  ;;  %v3209_v48 = vmul.f32 %v4138_v9, %v5592_v36  ;;  %v3222_v25 = vmul.f32 %v4139_v23, %v5621_v46  ;;  %v4140_v0 = vld [vmem:[#allocation2 + $0x148] sm:$0xff] }
 0x452   : > { %3417 = vst [vmem:[%s5841_s5 + $0x50] sm:$0xff] %v3367_v57  ;;  %3418 = vst.msk [vmem:[%s5841_s5 + $0x58] sm:$0xff] %vm2403_vm3, %v3368_v58  ;;  %v3223_v38 = vmul.f32 %v4140_v0, %v5621_v46 }
 0x453   : > { %3431 = vst [vmem:[%s5841_s5 + $0xc0] sm:$0xff] %v3381_v55  ;;  %3432 = vst.msk [vmem:[%s5841_s5 + $0xc8] sm:$0xff] %vm2403_vm3, %v3382_v56  ;;  %v3270_v35 = vpop.permute.xlu1 %3269  ;;  %v3305_v39 = vpop.permute.xlu0 %3304  ;;  %v4141_v56 = vld [vmem:[#allocation2 + $0xf0] sm:$0xff] }
 0x454   : > { %v3371_v49 = vadd.f32 %v3270_v35, %v3196_v16  ;;  %v3372_v60 = vadd.f32 %v3270_v35, %v3197_v11  ;;  %v3385_v43 = vadd.f32 %v3305_v39, %v3210_v10  ;;  %v3386_v37 = vadd.f32 %v3305_v39, %v3211_v24  ;;  %v4142_v16 = vld [vmem:[#allocation2 + $0xf8] sm:$0xff]  ;;  %v4143_v11 = vld [vmem:[#allocation2 + $0x160] sm:$0xff]  ;;  %v4144_v10 = vld [vmem:[#allocation2 + $0x168] sm:$0xff] }
 0x455   : > { %v3212_v5 = vmul.f32 %v4141_v56, %v5594_v20  ;;  %v3213_v53 = vmul.f32 %v4142_v16, %v5594_v20  ;;  %v3226_v14 = vmul.f32 %v4143_v11, %v5630_v6  ;;  %v3227_v26 = vmul.f32 %v4144_v10, %v5630_v6 }
 0x456   : > { %3421 = vst [vmem:[%s5841_s5 + $0x70] sm:$0xff] %v3371_v49  ;;  %3422 = vst.msk [vmem:[%s5841_s5 + $0x78] sm:$0xff] %vm2403_vm3, %v3372_v60  ;;  %v4145_v60 = vld [vmem:[#allocation2 + $0x110] sm:$0xff] }
 0x457   : > { %3435 = vst [vmem:[%s5841_s5 + $0xe0] sm:$0xff] %v3385_v43  ;;  %3436 = vst.msk [vmem:[%s5841_s5 + $0xe8] sm:$0xff] %vm2403_vm3, %v3386_v37  ;;  %v3280_v13 = vpop.permute.xlu1 %3279  ;;  %v3315_v42 = vpop.permute.xlu0 %3314  ;;  %v3216_v43 = vmul.f32 %v4145_v60, %v5598_v12  ;;  %v4146_v37 = vld [vmem:[#allocation2 + $0x118] sm:$0xff] }
 0x458   : > { %v3375_v40 = vadd.f32 %v3280_v13, %v3200_v61  ;;  %v3376_v7 = vadd.f32 %v3280_v13, %v3201_v54  ;;  %v3389_v30 = vadd.f32 %v3315_v42, %v3214_v52  ;;  %v3390_v31 = vadd.f32 %v3315_v42, %v3215_v59  ;;  %v4147_v61 = vld [vmem:[#allocation2 + $0x180] sm:$0xff]  ;;  %v4148_v54 = vld [vmem:[#allocation2 + $0x188] sm:$0xff]  ;;  %v4149_v42 = vld [vmem:[#allocation2 + $0x130] sm:$0xff] }
 0x459   : > { %v3217_v29 = vmul.f32 %v4146_v37, %v5598_v12  ;;  %v3230_v34 = vmul.f32 %v4147_v61, %v5639_v3  ;;  %v3231_v47 = vmul.f32 %v4148_v54, %v5639_v3 }
 0x45a   : > { %3425 = vst [vmem:[%s5841_s5 + $0x90] sm:$0xff] %v3375_v40  ;;  %3426 = vst.msk [vmem:[%s5841_s5 + $0x98] sm:$0xff] %vm2403_vm3, %v3376_v7  ;;  %v3220_v40 = vmul.f32 %v4149_v42, %v5602_v27  ;;  %v4150_v7 = vld [vmem:[#allocation2 + $0x138] sm:$0xff] }
 0x45b   : > { %3439 = vst [vmem:[%s5841_s5 + $0x100] sm:$0xff] %v3389_v30  ;;  %3440 = vst.msk [vmem:[%s5841_s5 + $0x108] sm:$0xff] %vm2403_vm3, %v3390_v31  ;;  %v3290_v18 = vpop.permute.xlu1 %3289  ;;  %v3325_v28 = vpop.permute.xlu0 %3324  ;;  %v3221_v30 = vmul.f32 %v4150_v7, %v5602_v27 }
 0x45c   : > { %v3379_v62 = vadd.f32 %v3290_v18, %v3204_v32  ;;  %v3380_v19 = vadd.f32 %v3290_v18, %v3205_v44  ;;  %v3393_v21 = vadd.f32 %v3325_v28, %v3218_v45  ;;  %v3394_v4 = vadd.f32 %v3325_v28, %v3219_v51  ;;  %v4151_v32 = vld [vmem:[#allocation2 + $0x150] sm:$0xff]  ;;  %v4152_v44 = vld [vmem:[#allocation2 + $0x158] sm:$0xff] }
 0x45d   : > { %v3224_v22 = vmul.f32 %v4151_v32, %v5606_v15  ;;  %v3225_v50 = vmul.f32 %v4152_v44, %v5606_v15  ;;  %v4153_v18 = vld [vmem:[#allocation2 + $0x170] sm:$0xff] }
 0x45e   : > { %3429 = vst [vmem:[%s5841_s5 + $0xb0] sm:$0xff] %v3379_v62  ;;  %3430 = vst.msk [vmem:[%s5841_s5 + $0xb8] sm:$0xff] %vm2403_vm3, %v3380_v19  ;;  %v3228_v28 = vmul.f32 %v4153_v18, %v5610_v63  ;;  %v4154_v62 = vld [vmem:[#allocation2 + $0x178] sm:$0xff] }
 0x45f   : > { %3443 = vst [vmem:[%s5841_s5 + $0x120] sm:$0xff] %v3393_v21  ;;  %3444 = vst.msk [vmem:[%s5841_s5 + $0x128] sm:$0xff] %vm2403_vm3, %v3394_v4  ;;  %v3300_v36 = vpop.permute.xlu1 %3299  ;;  %v3335_v46 = vpop.permute.xlu0 %3334  ;;  %v3229_v19 = vmul.f32 %v4154_v62, %v5610_v63 }
 0x460   : > { %v3383_v1 = vadd.f32 %v3300_v36, %v3208_v41  ;;  %v3384_v57 = vadd.f32 %v3300_v36, %v3209_v48  ;;  %v3397_v58 = vadd.f32 %v3335_v46, %v3222_v25  ;;  %v3398_v55 = vadd.f32 %v3335_v46, %v3223_v38 }
 0x462   : > { %3433 = vst [vmem:[%s5841_s5 + $0xd0] sm:$0xff] %v3383_v1  ;;  %3434 = vst.msk [vmem:[%s5841_s5 + $0xd8] sm:$0xff] %vm2403_vm3, %v3384_v57 }
 0x463   : > { %3447 = vst [vmem:[%s5841_s5 + $0x140] sm:$0xff] %v3397_v58  ;;  %3448 = vst.msk [vmem:[%s5841_s5 + $0x148] sm:$0xff] %vm2403_vm3, %v3398_v55  ;;  %v3310_v20 = vpop.permute.xlu1 %3309  ;;  %v3345_v6 = vpop.permute.xlu0 %3344 }
 0x464   : > { %v3387_v24 = vadd.f32 %v3310_v20, %v3212_v5  ;;  %v3388_v35 = vadd.f32 %v3310_v20, %v3213_v53  ;;  %v3401_v39 = vadd.f32 %v3345_v6, %v3226_v14  ;;  %v3402_v49 = vadd.f32 %v3345_v6, %v3227_v26 }
 0x466   : > { %3437 = vst [vmem:[%s5841_s5 + $0xf0] sm:$0xff] %v3387_v24  ;;  %3438 = vst.msk [vmem:[%s5841_s5 + $0xf8] sm:$0xff] %vm2403_vm3, %v3388_v35 }
 0x467   : > { %3451 = vst [vmem:[%s5841_s5 + $0x160] sm:$0xff] %v3401_v39  ;;  %3452 = vst.msk [vmem:[%s5841_s5 + $0x168] sm:$0xff] %vm2403_vm3, %v3402_v49  ;;  %v3320_v12 = vpop.permute.xlu1 %3319  ;;  %v3355_v3 = vpop.permute.xlu0 %3354 }
 0x468   : > { %v3391_v52 = vadd.f32 %v3320_v12, %v3216_v43  ;;  %v3392_v17 = vadd.f32 %v3320_v12, %v3217_v29  ;;  %v3405_v59 = vadd.f32 %v3355_v3, %v3230_v34  ;;  %v3406_v13 = vadd.f32 %v3355_v3, %v3231_v47 }
 0x46a   : > { %3441 = vst [vmem:[%s5841_s5 + $0x110] sm:$0xff] %v3391_v52  ;;  %3442 = vst.msk [vmem:[%s5841_s5 + $0x118] sm:$0xff] %vm2403_vm3, %v3392_v17 }
 0x46b   : > { %3455 = vst [vmem:[%s5841_s5 + $0x180] sm:$0xff] %v3405_v59  ;;  %3456 = vst.msk [vmem:[%s5841_s5 + $0x188] sm:$0xff] %vm2403_vm3, %v3406_v13  ;;  %v3330_v31 = vpop.permute.xlu1 %3329 }
 0x46c   : > { %v3395_v27 = vadd.f32 %v3330_v31, %v3220_v40  ;;  %v3396_v33 = vadd.f32 %v3330_v31, %v3221_v30 }
 0x46e   : > { %3445 = vst [vmem:[%s5841_s5 + $0x130] sm:$0xff] %v3395_v27  ;;  %3446 = vst.msk [vmem:[%s5841_s5 + $0x138] sm:$0xff] %vm2403_vm3, %v3396_v33 }
 0x46f   : > { %v3340_v45 = vpop.permute.xlu1 %3339 }
 0x470   : > { %v3399_v2 = vadd.f32 %v3340_v45, %v3224_v22  ;;  %v3400_v51 = vadd.f32 %v3340_v45, %v3225_v50 }
 0x472   : > { %3449 = vst [vmem:[%s5841_s5 + $0x150] sm:$0xff] %v3399_v2  ;;  %3450 = vst.msk [vmem:[%s5841_s5 + $0x158] sm:$0xff] %vm2403_vm3, %v3400_v51 }
 0x473   : > { %v3350_v15 = vpop.permute.xlu1 %3349 }
 0x474   : > { %v3403_v21 = vadd.f32 %v3350_v15, %v3228_v28  ;;  %v3404_v4 = vadd.f32 %v3350_v15, %v3229_v19 }
 0x476   : > { %3453 = vst [vmem:[%s5841_s5 + $0x170] sm:$0xff] %v3403_v21  ;;  %3454 = vst.msk [vmem:[%s5841_s5 + $0x178] sm:$0xff] %vm2403_vm3, %v3404_v4 }
 0x477 PF: > { %s15_s18 = sadd.s32 1, %s4161_s18  }
 0x478   : > { %p12_p6 = scmp.ge.s32.totalorder %s15_s18, 4  }
 0x47a   :  { %14 = sbr.rel (!%p12_p6) target bundleno = 1 (0x1), region = 80 }

</bundles_post_ra>
